<compile_context>
chip_gen: v6e
topology: v6e:2x2x1
jax: 0.10.0
libtpu: 0.0.40
codegen_flags: <defaults>
</compile_context>

<pallas_src>
import math

import jax
import jax.numpy as jnp
import numpy as np
from jax.experimental import pallas as pl
from jax.experimental.pallas import tpu as pltpu  # noqa: F401  (kept for TPU-specific params if needed)

# ---------------- synthetic (small) configuration ----------------
N_FEATURES = 16          # n_features
EMSIZE = 32              # emsize
NHEAD = 2                # nhead
HEAD_DIM = EMSIZE // NHEAD
NHID_FACTOR = 2
NHID = EMSIZE * NHID_FACTOR        # transformer FFN hidden
NLAYERS = 2                        # nlayers
DECODER_EMBED_DIM = 64             # decoder_embed_dim (2048 in real model; small here)
DECODER_HIDDEN = NHID              # decoder_hidden_size defaults to nhid
PRED_HIDDEN = 16                   # predicted_hidden_layer_size
N_OUT = 1                          # bins_output_n == 0 -> 1
SEQ = 12
SINGLE_EVAL_POS = 8                # -> S_train = 8 (multiple of 8: clean sublane retiles)
BATCH = 2

TOTAL_PRED = N_FEATURES * PRED_HIDDEN + PRED_HIDDEN + PRED_HIDDEN * N_OUT + N_OUT  # 289

LN_EPS = 1e-5


# ---------------- helpers usable inside kernels ----------------
def _layer_norm(x, w, b):
    mu = jnp.mean(x, axis=-1, keepdims=True)
    var = jnp.mean((x - mu) ** 2, axis=-1, keepdims=True)
    return (x - mu) * jax.lax.rsqrt(var + LN_EPS) * w + b


def _erf(x):
    # Abramowitz & Stegun 7.1.26 polynomial erf (max abs error ~1.5e-7).
    # Built only from mul/add/exp/abs/where so it lowers cleanly in Mosaic.
    a1, a2, a3, a4, a5 = 0.254829592, -0.284496736, 1.421413741, -1.453152027, 1.061405429
    pp = 0.3275911
    ax = jnp.abs(x)
    t = 1.0 / (1.0 + pp * ax)
    poly = ((((a5 * t + a4) * t + a3) * t + a2) * t + a1) * t
    y = 1.0 - poly * jnp.exp(-ax * ax)
    return jnp.where(x >= 0, y, -y)


def _gelu_exact(x):
    # exact (erf-based) GELU, matching torch.nn.functional.gelu default
    return 0.5 * x * (1.0 + _erf(x * 0.7071067811865475))


# ---------------- the single fused kernel ----------------
def _mothernet_fused_kernel(
        xtr_ref, ytr_ref, xte_ref,
        encw_ref, encb_ref, yencw_ref, yencb_ref,
        wq_ref, bq_ref, wk_ref, bk_ref, wv_ref, bv_ref,
        wo_ref, bo_ref, ln1w_ref, ln1b_ref,
        w1_ref, b1_ref, w2_ref, b2_ref, ln2w_ref, ln2b_ref,
        dq_ref, dwk_ref, dwv_ref, dwh_ref, dbh_ref, dwo_ref, dbo_ref,
        o_ref):
    b, t, f = xte_ref.shape
    bs = xtr_ref.shape[0]
    s = bs // b

    # ---- encoder (Linear, replace_nan_by_zero=True) + y_encoder ----
    x = xtr_ref[...]                                       # (B*S, F)
    x = jnp.where(jnp.isnan(x), 0.0, x)
    h = jnp.dot(x, encw_ref[...], preferred_element_type=jnp.float32) + encb_ref[...]
    # y encoder is Linear(1, E): y * w + b  (broadcast multiply, no K=1 matmul)
    h = h + ytr_ref[...] * yencw_ref[...] + yencb_ref[...]   # (B*S, E)

    # ---- transformer encoder (post-norm, exact GELU FFN, MHA) ----
    scale = 1.0 / math.sqrt(HEAD_DIM)
    for l in range(NLAYERS):                               # unrolled static loop over layers
        heads = []
        for hh in range(NHEAD):                            # per-head weights pre-split: no lane slicing
            qh = jnp.dot(h, wq_ref[l, hh], preferred_element_type=jnp.float32) + bq_ref[l, hh]
            kh = jnp.dot(h, wk_ref[l, hh], preferred_element_type=jnp.float32) + bk_ref[l, hh]
            vh = jnp.dot(h, wv_ref[l, hh], preferred_element_type=jnp.float32) + bv_ref[l, hh]
            q3 = qh.reshape(b, s, HEAD_DIM)                # clean sublane retile (B*S -> B, S)
            k3 = kh.reshape(b, s, HEAD_DIM)
            v3 = vh.reshape(b, s, HEAD_DIM)
            sc = jnp.einsum("bqd,bkd->bqk", q3, k3,
                            preferred_element_type=jnp.float32) * scale   # (B, S, S)
            sc = sc - jnp.max(sc, axis=-1, keepdims=True)
            pr = jnp.exp(sc)
            pr = pr / jnp.sum(pr, axis=-1, keepdims=True)
            ctx = jnp.einsum("bqk,bkd->bqd", pr, v3,
                             preferred_element_type=jnp.float32)          # (B, S, hd)
            heads.append(ctx.reshape(bs, HEAD_DIM))
        ctx_all = jnp.concatenate(heads, axis=-1)          # (B*S, E): concat heads once
        attn = jnp.dot(ctx_all, wo_ref[l], preferred_element_type=jnp.float32) + bo_ref[l]
        h = _layer_norm(h + attn, ln1w_ref[l], ln1b_ref[l])               # post-norm
        ff = jnp.dot(
            _gelu_exact(jnp.dot(h, w1_ref[l], preferred_element_type=jnp.float32) + b1_ref[l]),
            w2_ref[l], preferred_element_type=jnp.float32) + b2_ref[l]
        h = _layer_norm(h + ff, ln2w_ref[l], ln2b_ref[l])

    # ---- MLPModelDecoder ('output_attention'): learned-query pooling + MLP head ----
    # TODO(synk): MLPModelDecoder internals are not in the reference file; this is the
    # standard output-attention variant (query pools over the sequence, MLP emits the
    # flattened weights of the predicted per-task MLP).
    dd = DECODER_EMBED_DIM
    kd = jnp.dot(h, dwk_ref[...], preferred_element_type=jnp.float32).reshape(b, s, dd)
    vd = jnp.dot(h, dwv_ref[...], preferred_element_type=jnp.float32).reshape(b, s, dd)
    q = dq_ref[...]                                        # (1, D)
    sc = jnp.sum(kd * q[None], axis=-1, keepdims=True) * (1.0 / math.sqrt(dd))  # (B, S, 1)
    sc = sc - jnp.max(sc, axis=1, keepdims=True)
    pr = jnp.exp(sc)
    pr = pr / jnp.sum(pr, axis=1, keepdims=True)
    pooled = jnp.sum(pr * vd, axis=1)                      # (B, D)  batched pooling, one pass
    hid = jnp.maximum(
        jnp.dot(pooled, dwh_ref[...], preferred_element_type=jnp.float32) + dbh_ref[...],
        0.0)                                               # decoder_activation='relu'
    flat = jnp.dot(hid, dwo_ref[...], preferred_element_type=jnp.float32) + dbo_ref[...]  # (B, total)

    # ---- predicted per-task MLP (nn_forward), consumed straight from registers ----
    xt = xte_ref[...]                                      # (B, T, F)
    xt = jnp.where(jnp.isnan(xt), 0.0, xt)                 # torch.nan_to_num(x_test, nan=0)
    # layer 1: h1[b,t,p] = sum_f x[b,t,f] * W1[b,f,p]; W1 rows are consumed as lane
    # slices of `flat` (unrolled over F) to avoid a cross-tile lane->sublane reshape.
    h1 = jnp.zeros((b, t, PRED_HIDDEN), jnp.float32)
    for ff_ in range(N_FEATURES):
        w1_f = flat[:, ff_ * PRED_HIDDEN:(ff_ + 1) * PRED_HIDDEN]          # (B, PH)
        h1 = h1 + xt[:, :, ff_:ff_ + 1] * w1_f[:, None, :]
    off = N_FEATURES * PRED_HIDDEN
    b1p = flat[:, off:off + PRED_HIDDEN]                                   # (B, PH)
    h1 = jnp.maximum(h1 + b1p[:, None, :], 0.0)                            # predicted_activation='relu'
    # layer 2 (N_OUT == 1): out[b,t] = sum_p h1[b,t,p] * w2[b,p] + b2[b]
    w2p = flat[:, off + PRED_HIDDEN:off + PRED_HIDDEN + PRED_HIDDEN * N_OUT]   # (B, PH)
    b2p = flat[:, off + PRED_HIDDEN + PRED_HIDDEN * N_OUT:
               off + PRED_HIDDEN + PRED_HIDDEN * N_OUT + N_OUT]                # (B, 1)
    out = jnp.sum(h1 * w2p[:, None, :], axis=-1) + b2p                     # (B, T)
    o_ref[...] = out


# ---------------- parameter packing (wrapper side, free under jit) ----------------
def _pack_params(p):
    def stack(key):
        return jnp.stack([lp[key] for lp in p["layers"]], axis=0)

    def per_head_w(w):   # (L, E, E) -> (L, H, E, hd)   (column blocks = heads)
        return w.reshape(NLAYERS, EMSIZE, NHEAD, HEAD_DIM).transpose(0, 2, 1, 3)

    def per_head_b(bb):  # (L, 1, E) -> (L, H, 1, hd)
        return bb.reshape(NLAYERS, 1, NHEAD, HEAD_DIM).transpose(0, 2, 1, 3)

    d = p["dec"]
    return (
        p["enc_w"], p["enc_b"], p["yenc_w"], p["yenc_b"],
        per_head_w(stack("wq")), per_head_b(stack("bq")),
        per_head_w(stack("wk")), per_head_b(stack("bk")),
        per_head_w(stack("wv")), per_head_b(stack("bv")),
        stack("wo"), stack("bo"), stack("ln1w"), stack("ln1b"),
        stack("w1"), stack("b1"), stack("w2"), stack("b2"),
        stack("ln2w"), stack("ln2b"),
        d["q"], d["wk"], d["wv"], d["wh"], d["bh"], d["wo"], d["bo"],
    )


# ---------------- full forward: one pallas_call ----------------
def _mothernet_forward_impl(params, x, y, single_eval_pos):
    x_train, y_train = x[:single_eval_pos], y[:single_eval_pos]
    x_test = x[single_eval_pos:]
    s_tr, b, f = x_train.shape
    t = x_test.shape[0]

    # batch-major flattening (tiny, one-shot, fused under jit)
    xtr2 = jnp.transpose(x_train, (1, 0, 2)).reshape(b * s_tr, f)
    ytr2 = jnp.transpose(y_train, (1, 0)).reshape(b * s_tr, 1)
    xte3 = jnp.transpose(x_test, (1, 0, 2))                # (B, T, F)

    packed = _pack_params(params)
    out = pl.pallas_call(
        _mothernet_fused_kernel,
        out_shape=jax.ShapeDtypeStruct((b, t), jnp.float32),
    )(xtr2, ytr2, xte3, *packed)                           # (B, T)
    return jnp.transpose(out, (1, 0))[..., None]           # (T, B, n_out) torch layout


mothernet_forward = jax.jit(_mothernet_forward_impl, static_argnums=3)


# ---------------- parameters (deterministic, synthetic) ----------------
def init_params(key):
    keys = iter(jax.random.split(key, 128))

    def nrm(shape, scale=0.05):
        return (scale * jax.random.normal(next(keys), shape)).astype(jnp.float32)

    p = {
        "enc_w": nrm((N_FEATURES, EMSIZE)),
        "enc_b": nrm((1, EMSIZE)),
        "yenc_w": nrm((1, EMSIZE)),
        "yenc_b": nrm((1, EMSIZE)),
    }
    layers = []
    for _ in range(NLAYERS):
        # NOTE: tabpfn_zero_weights=True would zero out_proj / linear2 at init;
        # random values are used so the kernel does non-trivial work.
        layers.append({
            "wq": nrm((EMSIZE, EMSIZE)), "bq": nrm((1, EMSIZE)),
            "wk": nrm((EMSIZE, EMSIZE)), "bk": nrm((1, EMSIZE)),
            "wv": nrm((EMSIZE, EMSIZE)), "bv": nrm((1, EMSIZE)),
            "wo": nrm((EMSIZE, EMSIZE)), "bo": nrm((1, EMSIZE)),
            "ln1w": jnp.ones((1, EMSIZE), jnp.float32),
            "ln1b": jnp.zeros((1, EMSIZE), jnp.float32),
            "w1": nrm((EMSIZE, NHID)), "b1": nrm((1, NHID)),
            "w2": nrm((NHID, EMSIZE)), "b2": nrm((1, EMSIZE)),
            "ln2w": jnp.ones((1, EMSIZE), jnp.float32),
            "ln2b": jnp.zeros((1, EMSIZE), jnp.float32),
        })
    p["layers"] = layers
    p["dec"] = {
        "q": nrm((1, DECODER_EMBED_DIM)),
        "wk": nrm((EMSIZE, DECODER_EMBED_DIM)),
        "wv": nrm((EMSIZE, DECODER_EMBED_DIM)),
        "wh": nrm((DECODER_EMBED_DIM, DECODER_HIDDEN)),
        "bh": nrm((1, DECODER_HIDDEN)),
        "wo": nrm((DECODER_HIDDEN, TOTAL_PRED)),
        "bo": nrm((1, TOTAL_PRED)),
    }
    return p


# ---------------- plain-JAX reference for verification ----------------
def reference_forward(params, x, y, single_eval_pos):
    x_train, y_train = x[:single_eval_pos], y[:single_eval_pos]
    x_test = x[single_eval_pos:]

    xtr = jnp.nan_to_num(x_train, nan=0.0)
    x_enc = xtr @ params["enc_w"] + params["enc_b"][0]
    y_enc = y_train[..., None] @ params["yenc_w"] + params["yenc_b"][0]
    h = jnp.transpose(x_enc + y_enc, (1, 0, 2))            # (B, S, E)
    b, s, e = h.shape

    for lp in params["layers"]:
        q = h @ lp["wq"] + lp["bq"][0]
        k = h @ lp["wk"] + lp["bk"][0]
        v = h @ lp["wv"] + lp["bv"][0]
        qh = q.reshape(b, s, NHEAD, HEAD_DIM)
        kh = k.reshape(b, s, NHEAD, HEAD_DIM)
        vh = v.reshape(b, s, NHEAD, HEAD_DIM)
        sc = jnp.einsum("bqhd,bkhd->bhqk", qh, kh) / math.sqrt(HEAD_DIM)
        pr = jax.nn.softmax(sc, axis=-1)
        ctx = jnp.einsum("bhqk,bkhd->bqhd", pr, vh).reshape(b, s, e)
        attn = ctx @ lp["wo"] + lp["bo"][0]
        h = _layer_norm(h + attn, lp["ln1w"][0], lp["ln1b"][0])
        ff = jax.nn.gelu(h @ lp["w1"] + lp["b1"][0], approximate=False) @ lp["w2"] + lp["b2"][0]
        h = _layer_norm(h + ff, lp["ln2w"][0], lp["ln2b"][0])

    dp = params["dec"]
    kd = h @ dp["wk"]
    vd = h @ dp["wv"]
    sc = jnp.einsum("bsd,d->bs", kd, dp["q"][0]) / math.sqrt(DECODER_EMBED_DIM)
    pr = jax.nn.softmax(sc, axis=-1)
    pooled = jnp.einsum("bs,bsd->bd", pr, vd)
    hid = jax.nn.relu(pooled @ dp["wh"] + dp["bh"][0])
    flat = hid @ dp["wo"] + dp["bo"][0]

    f_, ph, no = N_FEATURES, PRED_HIDDEN, N_OUT
    w1 = flat[:, :f_ * ph].reshape(-1, f_, ph)
    b1 = flat[:, f_ * ph:f_ * ph + ph]
    w2 = flat[:, f_ * ph + ph:f_ * ph + ph + ph * no].reshape(-1, ph, no)
    b2 = flat[:, f_ * ph + ph + ph * no:]

    # torch-style nn_forward broadcasting: (T,B,F,1)*(1,B,F,H) sum over F
    xt = jnp.nan_to_num(x_test, nan=0.0)                   # (T, B, F)
    h1 = jnp.einsum("tbf,bfp->tbp", xt, w1) + b1[None]
    h1 = jax.nn.relu(h1)
    out = jnp.einsum("tbp,bpo->tbo", h1, w2) + b2[None]
    return out                                             # (T, B, n_out)


if __name__ == "__main__":
    key = jax.random.PRNGKey(0)
    kp, kx, ky = jax.random.split(key, 3)
    params = init_params(kp)

    x = jax.random.normal(kx, (SEQ, BATCH, N_FEATURES), jnp.float32)
    y = jax.random.normal(ky, (SEQ, BATCH), jnp.float32)
    # exercise the nan_to_num paths (encoder + nn_forward)
    x = x.at[0, 0, 0].set(jnp.nan)
    x = x.at[SINGLE_EVAL_POS, 1, 2].set(jnp.nan)

    y_pred = mothernet_forward(params, x, y, SINGLE_EVAL_POS)
    y_pred = jax.block_until_ready(y_pred)

    y_ref = reference_forward(params, x, y, SINGLE_EVAL_POS)
    assert y_pred.shape == (SEQ - SINGLE_EVAL_POS, BATCH, N_OUT)
    np.testing.assert_allclose(np.asarray(y_pred), np.asarray(y_ref), rtol=1e-3, atol=1e-3)
    print("KERNEL_OK")
</pallas_src>

<mosaic_0001>
module attributes {stable_mosaic.version = 11 : i64} {
  func.func @_mothernet_fused_kernel(%arg0: memref<16x16xf32, #tpu.memory_space<vmem>>, %arg1: memref<16x1xf32, #tpu.memory_space<vmem>>, %arg2: memref<2x4x16xf32, #tpu.memory_space<vmem>>, %arg3: memref<16x32xf32, #tpu.memory_space<vmem>>, %arg4: memref<1x32xf32, #tpu.memory_space<vmem>>, %arg5: memref<1x32xf32, #tpu.memory_space<vmem>>, %arg6: memref<1x32xf32, #tpu.memory_space<vmem>>, %arg7: memref<2x2x32x16xf32, #tpu.memory_space<vmem>>, %arg8: memref<2x2x1x16xf32, #tpu.memory_space<vmem>>, %arg9: memref<2x2x32x16xf32, #tpu.memory_space<vmem>>, %arg10: memref<2x2x1x16xf32, #tpu.memory_space<vmem>>, %arg11: memref<2x2x32x16xf32, #tpu.memory_space<vmem>>, %arg12: memref<2x2x1x16xf32, #tpu.memory_space<vmem>>, %arg13: memref<2x32x32xf32, #tpu.memory_space<vmem>>, %arg14: memref<2x1x32xf32, #tpu.memory_space<vmem>>, %arg15: memref<2x1x32xf32, #tpu.memory_space<vmem>>, %arg16: memref<2x1x32xf32, #tpu.memory_space<vmem>>, %arg17: memref<2x32x64xf32, #tpu.memory_space<vmem>>, %arg18: memref<2x1x64xf32, #tpu.memory_space<vmem>>, %arg19: memref<2x64x32xf32, #tpu.memory_space<vmem>>, %arg20: memref<2x1x32xf32, #tpu.memory_space<vmem>>, %arg21: memref<2x1x32xf32, #tpu.memory_space<vmem>>, %arg22: memref<2x1x32xf32, #tpu.memory_space<vmem>>, %arg23: memref<1x64xf32, #tpu.memory_space<vmem>>, %arg24: memref<32x64xf32, #tpu.memory_space<vmem>>, %arg25: memref<32x64xf32, #tpu.memory_space<vmem>>, %arg26: memref<64x64xf32, #tpu.memory_space<vmem>>, %arg27: memref<1x64xf32, #tpu.memory_space<vmem>>, %arg28: memref<64x289xf32, #tpu.memory_space<vmem>>, %arg29: memref<1x289xf32, #tpu.memory_space<vmem>>, %arg30: memref<2x4xf32, #tpu.memory_space<vmem>>) attributes {dimension_semantics = [], scalar_prefetch = 0 : i64, scratch_operands = 0 : i64, tpu.core_type = #tpu.core_type<tc>} {
    %c0 = arith.constant 0 : index
    %c0_0 = arith.constant 0 : index
    %0 = vector.load %arg0[%c0, %c0_0] : memref<16x16xf32, #tpu.memory_space<vmem>>, vector<16x16xf32>
    %1 = arith.cmpf one, %0, %0 : vector<16x16xf32>
    %cst = arith.constant 0.000000e+00 : f32
    %2 = vector.broadcast %cst : f32 to vector<16x16xf32>
    %3 = arith.select %1, %2, %0 : vector<16x16xi1>, vector<16x16xf32>
    %c0_1 = arith.constant 0 : index
    %c0_2 = arith.constant 0 : index
    %4 = vector.load %arg3[%c0_1, %c0_2] : memref<16x32xf32, #tpu.memory_space<vmem>>, vector<16x32xf32>
    %cst_3 = arith.constant dense<0.000000e+00> : vector<16x32xf32>
    %5 = tpu.matmul %3, %4, %cst_3 {dimension_numbers = #tpu.dot_dimension_numbers<[1], [0], [0], [1], [0, 0, 1, 1], [], []>} : vector<16x16xf32>, vector<16x32xf32>, vector<16x32xf32> -> vector<16x32xf32>
    %c0_4 = arith.constant 0 : index
    %c0_5 = arith.constant 0 : index
    %6 = vector.load %arg4[%c0_4, %c0_5] : memref<1x32xf32, #tpu.memory_space<vmem>>, vector<1x32xf32>
    %7 = vector.broadcast %6 : vector<1x32xf32> to vector<16x32xf32>
    %8 = arith.addf %5, %7 : vector<16x32xf32>
    %c0_6 = arith.constant 0 : index
    %c0_7 = arith.constant 0 : index
    %9 = vector.load %arg1[%c0_6, %c0_7] : memref<16x1xf32, #tpu.memory_space<vmem>>, vector<16x1xf32>
    %c0_8 = arith.constant 0 : index
    %c0_9 = arith.constant 0 : index
    %10 = vector.load %arg5[%c0_8, %c0_9] : memref<1x32xf32, #tpu.memory_space<vmem>>, vector<1x32xf32>
    %11 = vector.broadcast %9 : vector<16x1xf32> to vector<16x32xf32>
    %12 = vector.broadcast %10 : vector<1x32xf32> to vector<16x32xf32>
    %13 = arith.mulf %11, %12 : vector<16x32xf32>
    %14 = arith.addf %8, %13 : vector<16x32xf32>
    %c0_10 = arith.constant 0 : index
    %c0_11 = arith.constant 0 : index
    %15 = vector.load %arg6[%c0_10, %c0_11] : memref<1x32xf32, #tpu.memory_space<vmem>>, vector<1x32xf32>
    %16 = vector.broadcast %15 : vector<1x32xf32> to vector<16x32xf32>
    %17 = arith.addf %14, %16 : vector<16x32xf32>
    %c0_12 = arith.constant 0 : index
    %c0_13 = arith.constant 0 : index
    %c0_14 = arith.constant 0 : index
    %c0_15 = arith.constant 0 : index
    %18 = vector.load %arg7[%c0_12, %c0_13, %c0_14, %c0_15] : memref<2x2x32x16xf32, #tpu.memory_space<vmem>>, vector<1x1x32x16xf32>
    %19 = vector.shape_cast %18 : vector<1x1x32x16xf32> to vector<32x16xf32>
    %cst_16 = arith.constant dense<0.000000e+00> : vector<16x16xf32>
    %20 = tpu.matmul %17, %19, %cst_16 {dimension_numbers = #tpu.dot_dimension_numbers<[1], [0], [0], [1], [0, 0, 1, 1], [], []>} : vector<16x32xf32>, vector<32x16xf32>, vector<16x16xf32> -> vector<16x16xf32>
    %c0_17 = arith.constant 0 : index
    %c0_18 = arith.constant 0 : index
    %c0_19 = arith.constant 0 : index
    %c0_20 = arith.constant 0 : index
    %21 = vector.load %arg8[%c0_17, %c0_18, %c0_19, %c0_20] : memref<2x2x1x16xf32, #tpu.memory_space<vmem>>, vector<1x1x1x16xf32>
    %22 = vector.shape_cast %21 : vector<1x1x1x16xf32> to vector<1x16xf32>
    %23 = vector.broadcast %22 : vector<1x16xf32> to vector<16x16xf32>
    %24 = arith.addf %20, %23 : vector<16x16xf32>
    %c0_21 = arith.constant 0 : index
    %c0_22 = arith.constant 0 : index
    %c0_23 = arith.constant 0 : index
    %c0_24 = arith.constant 0 : index
    %25 = vector.load %arg9[%c0_21, %c0_22, %c0_23, %c0_24] : memref<2x2x32x16xf32, #tpu.memory_space<vmem>>, vector<1x1x32x16xf32>
    %26 = vector.shape_cast %25 : vector<1x1x32x16xf32> to vector<32x16xf32>
    %cst_25 = arith.constant dense<0.000000e+00> : vector<16x16xf32>
    %27 = tpu.matmul %17, %26, %cst_25 {dimension_numbers = #tpu.dot_dimension_numbers<[1], [0], [0], [1], [0, 0, 1, 1], [], []>} : vector<16x32xf32>, vector<32x16xf32>, vector<16x16xf32> -> vector<16x16xf32>
    %c0_26 = arith.constant 0 : index
    %c0_27 = arith.constant 0 : index
    %c0_28 = arith.constant 0 : index
    %c0_29 = arith.constant 0 : index
    %28 = vector.load %arg10[%c0_26, %c0_27, %c0_28, %c0_29] : memref<2x2x1x16xf32, #tpu.memory_space<vmem>>, vector<1x1x1x16xf32>
    %29 = vector.shape_cast %28 : vector<1x1x1x16xf32> to vector<1x16xf32>
    %30 = vector.broadcast %29 : vector<1x16xf32> to vector<16x16xf32>
    %31 = arith.addf %27, %30 : vector<16x16xf32>
    %c0_30 = arith.constant 0 : index
    %c0_31 = arith.constant 0 : index
    %c0_32 = arith.constant 0 : index
    %c0_33 = arith.constant 0 : index
    %32 = vector.load %arg11[%c0_30, %c0_31, %c0_32, %c0_33] : memref<2x2x32x16xf32, #tpu.memory_space<vmem>>, vector<1x1x32x16xf32>
    %33 = vector.shape_cast %32 : vector<1x1x32x16xf32> to vector<32x16xf32>
    %cst_34 = arith.constant dense<0.000000e+00> : vector<16x16xf32>
    %34 = tpu.matmul %17, %33, %cst_34 {dimension_numbers = #tpu.dot_dimension_numbers<[1], [0], [0], [1], [0, 0, 1, 1], [], []>} : vector<16x32xf32>, vector<32x16xf32>, vector<16x16xf32> -> vector<16x16xf32>
    %c0_35 = arith.constant 0 : index
    %c0_36 = arith.constant 0 : index
    %c0_37 = arith.constant 0 : index
    %c0_38 = arith.constant 0 : index
    %35 = vector.load %arg12[%c0_35, %c0_36, %c0_37, %c0_38] : memref<2x2x1x16xf32, #tpu.memory_space<vmem>>, vector<1x1x1x16xf32>
    %36 = vector.shape_cast %35 : vector<1x1x1x16xf32> to vector<1x16xf32>
    %37 = vector.broadcast %36 : vector<1x16xf32> to vector<16x16xf32>
    %38 = arith.addf %34, %37 : vector<16x16xf32>
    %39 = vector.shape_cast %24 : vector<16x16xf32> to vector<2x8x16xf32>
    %40 = vector.shape_cast %31 : vector<16x16xf32> to vector<2x8x16xf32>
    %41 = vector.shape_cast %38 : vector<16x16xf32> to vector<2x8x16xf32>
    "tpu.trace_start"() <{level = 10 : i32, message = "bqd,bkd->bqk"}> : () -> ()
    %cst_39 = arith.constant dense<0.000000e+00> : vector<2x8x8xf32>
    %42 = tpu.matmul %39, %40, %cst_39 {dimension_numbers = #tpu.dot_dimension_numbers<[2], [2], [1], [1], [0, 0, 0, 1, 1, 1], [0], [0]>} : vector<2x8x16xf32>, vector<2x8x16xf32>, vector<2x8x8xf32> -> vector<2x8x8xf32>
    "tpu.trace_stop"() : () -> ()
    %cst_40 = arith.constant 2.500000e-01 : f32
    %43 = vector.broadcast %cst_40 : f32 to vector<2x8x8xf32>
    %44 = arith.mulf %42, %43 : vector<2x8x8xf32>
    %cst_41 = arith.constant dense<0xFF800000> : vector<2x8xf32>
    %45 = vector.multi_reduction <maximumf>, %44, %cst_41 [2] : vector<2x8x8xf32> to vector<2x8xf32>
    %46 = vector.shape_cast %45 : vector<2x8xf32> to vector<2x8x1xf32>
    %47 = vector.broadcast %46 : vector<2x8x1xf32> to vector<2x8x8xf32>
    %48 = arith.subf %44, %47 : vector<2x8x8xf32>
    %49 = math.exp %48 : vector<2x8x8xf32>
    %cst_42 = arith.constant dense<0.000000e+00> : vector<2x8xf32>
    %50 = vector.multi_reduction <add>, %49, %cst_42 [2] : vector<2x8x8xf32> to vector<2x8xf32>
    %51 = vector.shape_cast %50 : vector<2x8xf32> to vector<2x8x1xf32>
    %52 = vector.broadcast %51 : vector<2x8x1xf32> to vector<2x8x8xf32>
    %53 = arith.divf %49, %52 : vector<2x8x8xf32>
    "tpu.trace_start"() <{level = 10 : i32, message = "bqk,bkd->bqd"}> : () -> ()
    %cst_43 = arith.constant dense<0.000000e+00> : vector<2x8x16xf32>
    %54 = tpu.matmul %53, %41, %cst_43 {dimension_numbers = #tpu.dot_dimension_numbers<[2], [1], [1], [2], [0, 0, 0, 1, 1, 2], [0], [0]>} : vector<2x8x8xf32>, vector<2x8x16xf32>, vector<2x8x16xf32> -> vector<2x8x16xf32>
    "tpu.trace_stop"() : () -> ()
    %55 = vector.shape_cast %54 : vector<2x8x16xf32> to vector<16x16xf32>
    %c0_44 = arith.constant 0 : index
    %c1 = arith.constant 1 : index
    %c0_45 = arith.constant 0 : index
    %c0_46 = arith.constant 0 : index
    %56 = vector.load %arg7[%c0_44, %c1, %c0_45, %c0_46] : memref<2x2x32x16xf32, #tpu.memory_space<vmem>>, vector<1x1x32x16xf32>
    %57 = vector.shape_cast %56 : vector<1x1x32x16xf32> to vector<32x16xf32>
    %cst_47 = arith.constant dense<0.000000e+00> : vector<16x16xf32>
    %58 = tpu.matmul %17, %57, %cst_47 {dimension_numbers = #tpu.dot_dimension_numbers<[1], [0], [0], [1], [0, 0, 1, 1], [], []>} : vector<16x32xf32>, vector<32x16xf32>, vector<16x16xf32> -> vector<16x16xf32>
    %c0_48 = arith.constant 0 : index
    %c1_49 = arith.constant 1 : index
    %c0_50 = arith.constant 0 : index
    %c0_51 = arith.constant 0 : index
    %59 = vector.load %arg8[%c0_48, %c1_49, %c0_50, %c0_51] : memref<2x2x1x16xf32, #tpu.memory_space<vmem>>, vector<1x1x1x16xf32>
    %60 = vector.shape_cast %59 : vector<1x1x1x16xf32> to vector<1x16xf32>
    %61 = vector.broadcast %60 : vector<1x16xf32> to vector<16x16xf32>
    %62 = arith.addf %58, %61 : vector<16x16xf32>
    %c0_52 = arith.constant 0 : index
    %c1_53 = arith.constant 1 : index
    %c0_54 = arith.constant 0 : index
    %c0_55 = arith.constant 0 : index
    %63 = vector.load %arg9[%c0_52, %c1_53, %c0_54, %c0_55] : memref<2x2x32x16xf32, #tpu.memory_space<vmem>>, vector<1x1x32x16xf32>
    %64 = vector.shape_cast %63 : vector<1x1x32x16xf32> to vector<32x16xf32>
    %cst_56 = arith.constant dense<0.000000e+00> : vector<16x16xf32>
    %65 = tpu.matmul %17, %64, %cst_56 {dimension_numbers = #tpu.dot_dimension_numbers<[1], [0], [0], [1], [0, 0, 1, 1], [], []>} : vector<16x32xf32>, vector<32x16xf32>, vector<16x16xf32> -> vector<16x16xf32>
    %c0_57 = arith.constant 0 : index
    %c1_58 = arith.constant 1 : index
    %c0_59 = arith.constant 0 : index
    %c0_60 = arith.constant 0 : index
    %66 = vector.load %arg10[%c0_57, %c1_58, %c0_59, %c0_60] : memref<2x2x1x16xf32, #tpu.memory_space<vmem>>, vector<1x1x1x16xf32>
    %67 = vector.shape_cast %66 : vector<1x1x1x16xf32> to vector<1x16xf32>
    %68 = vector.broadcast %67 : vector<1x16xf32> to vector<16x16xf32>
    %69 = arith.addf %65, %68 : vector<16x16xf32>
    %c0_61 = arith.constant 0 : index
    %c1_62 = arith.constant 1 : index
    %c0_63 = arith.constant 0 : index
    %c0_64 = arith.constant 0 : index
    %70 = vector.load %arg11[%c0_61, %c1_62, %c0_63, %c0_64] : memref<2x2x32x16xf32, #tpu.memory_space<vmem>>, vector<1x1x32x16xf32>
    %71 = vector.shape_cast %70 : vector<1x1x32x16xf32> to vector<32x16xf32>
    %cst_65 = arith.constant dense<0.000000e+00> : vector<16x16xf32>
    %72 = tpu.matmul %17, %71, %cst_65 {dimension_numbers = #tpu.dot_dimension_numbers<[1], [0], [0], [1], [0, 0, 1, 1], [], []>} : vector<16x32xf32>, vector<32x16xf32>, vector<16x16xf32> -> vector<16x16xf32>
    %c0_66 = arith.constant 0 : index
    %c1_67 = arith.constant 1 : index
    %c0_68 = arith.constant 0 : index
    %c0_69 = arith.constant 0 : index
    %73 = vector.load %arg12[%c0_66, %c1_67, %c0_68, %c0_69] : memref<2x2x1x16xf32, #tpu.memory_space<vmem>>, vector<1x1x1x16xf32>
    %74 = vector.shape_cast %73 : vector<1x1x1x16xf32> to vector<1x16xf32>
    %75 = vector.broadcast %74 : vector<1x16xf32> to vector<16x16xf32>
    %76 = arith.addf %72, %75 : vector<16x16xf32>
    %77 = vector.shape_cast %62 : vector<16x16xf32> to vector<2x8x16xf32>
    %78 = vector.shape_cast %69 : vector<16x16xf32> to vector<2x8x16xf32>
    %79 = vector.shape_cast %76 : vector<16x16xf32> to vector<2x8x16xf32>
    "tpu.trace_start"() <{level = 10 : i32, message = "bqd,bkd->bqk"}> : () -> ()
    %cst_70 = arith.constant dense<0.000000e+00> : vector<2x8x8xf32>
    %80 = tpu.matmul %77, %78, %cst_70 {dimension_numbers = #tpu.dot_dimension_numbers<[2], [2], [1], [1], [0, 0, 0, 1, 1, 1], [0], [0]>} : vector<2x8x16xf32>, vector<2x8x16xf32>, vector<2x8x8xf32> -> vector<2x8x8xf32>
    "tpu.trace_stop"() : () -> ()
    %cst_71 = arith.constant 2.500000e-01 : f32
    %81 = vector.broadcast %cst_71 : f32 to vector<2x8x8xf32>
    %82 = arith.mulf %80, %81 : vector<2x8x8xf32>
    %cst_72 = arith.constant dense<0xFF800000> : vector<2x8xf32>
    %83 = vector.multi_reduction <maximumf>, %82, %cst_72 [2] : vector<2x8x8xf32> to vector<2x8xf32>
    %84 = vector.shape_cast %83 : vector<2x8xf32> to vector<2x8x1xf32>
    %85 = vector.broadcast %84 : vector<2x8x1xf32> to vector<2x8x8xf32>
    %86 = arith.subf %82, %85 : vector<2x8x8xf32>
    %87 = math.exp %86 : vector<2x8x8xf32>
    %cst_73 = arith.constant dense<0.000000e+00> : vector<2x8xf32>
    %88 = vector.multi_reduction <add>, %87, %cst_73 [2] : vector<2x8x8xf32> to vector<2x8xf32>
    %89 = vector.shape_cast %88 : vector<2x8xf32> to vector<2x8x1xf32>
    %90 = vector.broadcast %89 : vector<2x8x1xf32> to vector<2x8x8xf32>
    %91 = arith.divf %87, %90 : vector<2x8x8xf32>
    "tpu.trace_start"() <{level = 10 : i32, message = "bqk,bkd->bqd"}> : () -> ()
    %cst_74 = arith.constant dense<0.000000e+00> : vector<2x8x16xf32>
    %92 = tpu.matmul %91, %79, %cst_74 {dimension_numbers = #tpu.dot_dimension_numbers<[2], [1], [1], [2], [0, 0, 0, 1, 1, 2], [0], [0]>} : vector<2x8x8xf32>, vector<2x8x16xf32>, vector<2x8x16xf32> -> vector<2x8x16xf32>
    "tpu.trace_stop"() : () -> ()
    %93 = vector.shape_cast %92 : vector<2x8x16xf32> to vector<16x16xf32>
    %94 = tpu.concatenate %55, %93 in 1 : vector<16x16xf32>, vector<16x16xf32> -> vector<16x32xf32>
    %c0_75 = arith.constant 0 : index
    %c0_76 = arith.constant 0 : index
    %c0_77 = arith.constant 0 : index
    %95 = vector.load %arg13[%c0_75, %c0_76, %c0_77] : memref<2x32x32xf32, #tpu.memory_space<vmem>>, vector<1x32x32xf32>
    %96 = vector.shape_cast %95 : vector<1x32x32xf32> to vector<32x32xf32>
    %cst_78 = arith.constant dense<0.000000e+00> : vector<16x32xf32>
    %97 = tpu.matmul %94, %96, %cst_78 {dimension_numbers = #tpu.dot_dimension_numbers<[1], [0], [0], [1], [0, 0, 1, 1], [], []>} : vector<16x32xf32>, vector<32x32xf32>, vector<16x32xf32> -> vector<16x32xf32>
    %c0_79 = arith.constant 0 : index
    %c0_80 = arith.constant 0 : index
    %c0_81 = arith.constant 0 : index
    %98 = vector.load %arg14[%c0_79, %c0_80, %c0_81] : memref<2x1x32xf32, #tpu.memory_space<vmem>>, vector<1x1x32xf32>
    %99 = vector.shape_cast %98 : vector<1x1x32xf32> to vector<1x32xf32>
    %100 = vector.broadcast %99 : vector<1x32xf32> to vector<16x32xf32>
    %101 = arith.addf %97, %100 : vector<16x32xf32>
    %102 = arith.addf %17, %101 : vector<16x32xf32>
    %c0_82 = arith.constant 0 : index
    %c0_83 = arith.constant 0 : index
    %c0_84 = arith.constant 0 : index
    %103 = vector.load %arg15[%c0_82, %c0_83, %c0_84] : memref<2x1x32xf32, #tpu.memory_space<vmem>>, vector<1x1x32xf32>
    %104 = vector.shape_cast %103 : vector<1x1x32xf32> to vector<1x32xf32>
    %c0_85 = arith.constant 0 : index
    %c0_86 = arith.constant 0 : index
    %c0_87 = arith.constant 0 : index
    %105 = vector.load %arg16[%c0_85, %c0_86, %c0_87] : memref<2x1x32xf32, #tpu.memory_space<vmem>>, vector<1x1x32xf32>
    %106 = vector.shape_cast %105 : vector<1x1x32xf32> to vector<1x32xf32>
    %cst_88 = arith.constant dense<0.000000e+00> : vector<16xf32>
    %107 = vector.multi_reduction <add>, %102, %cst_88 [1] : vector<16x32xf32> to vector<16xf32>
    %108 = vector.shape_cast %107 : vector<16xf32> to vector<16x1xf32>
    %cst_89 = arith.constant 3.200000e+01 : f32
    %109 = vector.broadcast %cst_89 : f32 to vector<16x1xf32>
    %110 = arith.divf %108, %109 : vector<16x1xf32>
    %111 = vector.broadcast %110 : vector<16x1xf32> to vector<16x32xf32>
    %112 = arith.subf %102, %111 : vector<16x32xf32>
    %113 = arith.mulf %112, %112 : vector<16x32xf32>
    %cst_90 = arith.constant dense<0.000000e+00> : vector<16xf32>
    %114 = vector.multi_reduction <add>, %113, %cst_90 [1] : vector<16x32xf32> to vector<16xf32>
    %115 = vector.shape_cast %114 : vector<16xf32> to vector<16x1xf32>
    %cst_91 = arith.constant 3.200000e+01 : f32
    %116 = vector.broadcast %cst_91 : f32 to vector<16x1xf32>
    %117 = arith.divf %115, %116 : vector<16x1xf32>
    %118 = vector.broadcast %110 : vector<16x1xf32> to vector<16x32xf32>
    %119 = arith.subf %102, %118 : vector<16x32xf32>
    %cst_92 = arith.constant 9.99999974E-6 : f32
    %120 = vector.broadcast %cst_92 : f32 to vector<16x1xf32>
    %121 = arith.addf %117, %120 : vector<16x1xf32>
    %122 = math.rsqrt %121 : vector<16x1xf32>
    %123 = vector.broadcast %122 : vector<16x1xf32> to vector<16x32xf32>
    %124 = arith.mulf %119, %123 : vector<16x32xf32>
    %125 = vector.broadcast %104 : vector<1x32xf32> to vector<16x32xf32>
    %126 = arith.mulf %124, %125 : vector<16x32xf32>
    %127 = vector.broadcast %106 : vector<1x32xf32> to vector<16x32xf32>
    %128 = arith.addf %126, %127 : vector<16x32xf32>
    %c0_93 = arith.constant 0 : index
    %c0_94 = arith.constant 0 : index
    %c0_95 = arith.constant 0 : index
    %129 = vector.load %arg17[%c0_93, %c0_94, %c0_95] : memref<2x32x64xf32, #tpu.memory_space<vmem>>, vector<1x32x64xf32>
    %130 = vector.shape_cast %129 : vector<1x32x64xf32> to vector<32x64xf32>
    %cst_96 = arith.constant dense<0.000000e+00> : vector<16x64xf32>
    %131 = tpu.matmul %128, %130, %cst_96 {dimension_numbers = #tpu.dot_dimension_numbers<[1], [0], [0], [1], [0, 0, 1, 1], [], []>} : vector<16x32xf32>, vector<32x64xf32>, vector<16x64xf32> -> vector<16x64xf32>
    %c0_97 = arith.constant 0 : index
    %c0_98 = arith.constant 0 : index
    %c0_99 = arith.constant 0 : index
    %132 = vector.load %arg18[%c0_97, %c0_98, %c0_99] : memref<2x1x64xf32, #tpu.memory_space<vmem>>, vector<1x1x64xf32>
    %133 = vector.shape_cast %132 : vector<1x1x64xf32> to vector<1x64xf32>
    %134 = vector.broadcast %133 : vector<1x64xf32> to vector<16x64xf32>
    %135 = arith.addf %131, %134 : vector<16x64xf32>
    %cst_100 = arith.constant 5.000000e-01 : f32
    %136 = vector.broadcast %cst_100 : f32 to vector<16x64xf32>
    %137 = arith.mulf %136, %135 : vector<16x64xf32>
    %cst_101 = arith.constant 0.707106769 : f32
    %138 = vector.broadcast %cst_101 : f32 to vector<16x64xf32>
    %139 = arith.mulf %135, %138 : vector<16x64xf32>
    %140 = math.absf %139 : vector<16x64xf32>
    %cst_102 = arith.constant 0.327591091 : f32
    %141 = vector.broadcast %cst_102 : f32 to vector<16x64xf32>
    %142 = arith.mulf %141, %140 : vector<16x64xf32>
    %cst_103 = arith.constant 1.000000e+00 : f32
    %143 = vector.broadcast %cst_103 : f32 to vector<16x64xf32>
    %144 = arith.addf %143, %142 : vector<16x64xf32>
    %cst_104 = arith.constant 1.000000e+00 : f32
    %145 = vector.broadcast %cst_104 : f32 to vector<16x64xf32>
    %146 = arith.divf %145, %144 : vector<16x64xf32>
    %cst_105 = arith.constant 1.06140542 : f32
    %147 = vector.broadcast %cst_105 : f32 to vector<16x64xf32>
    %148 = arith.mulf %147, %146 : vector<16x64xf32>
    %cst_106 = arith.constant -1.45315206 : f32
    %149 = vector.broadcast %cst_106 : f32 to vector<16x64xf32>
    %150 = arith.addf %148, %149 : vector<16x64xf32>
    %151 = arith.mulf %150, %146 : vector<16x64xf32>
    %cst_107 = arith.constant 1.42141378 : f32
    %152 = vector.broadcast %cst_107 : f32 to vector<16x64xf32>
    %153 = arith.addf %151, %152 : vector<16x64xf32>
    %154 = arith.mulf %153, %146 : vector<16x64xf32>
    %cst_108 = arith.constant -0.284496725 : f32
    %155 = vector.broadcast %cst_108 : f32 to vector<16x64xf32>
    %156 = arith.addf %154, %155 : vector<16x64xf32>
    %157 = arith.mulf %156, %146 : vector<16x64xf32>
    %cst_109 = arith.constant 0.254829586 : f32
    %158 = vector.broadcast %cst_109 : f32 to vector<16x64xf32>
    %159 = arith.addf %157, %158 : vector<16x64xf32>
    %160 = arith.mulf %159, %146 : vector<16x64xf32>
    %cst_110 = arith.constant 0.000000e+00 : f32
    %161 = vector.broadcast %cst_110 : f32 to vector<16x64xf32>
    %162 = arith.subf %161, %140 : vector<16x64xf32>
    %163 = arith.mulf %162, %140 : vector<16x64xf32>
    %164 = math.exp %163 : vector<16x64xf32>
    %165 = arith.mulf %160, %164 : vector<16x64xf32>
    %cst_111 = arith.constant 1.000000e+00 : f32
    %166 = vector.broadcast %cst_111 : f32 to vector<16x64xf32>
    %167 = arith.subf %166, %165 : vector<16x64xf32>
    %cst_112 = arith.constant 0.000000e+00 : f32
    %168 = vector.broadcast %cst_112 : f32 to vector<16x64xf32>
    %169 = arith.cmpf oge, %139, %168 : vector<16x64xf32>
    %cst_113 = arith.constant 0.000000e+00 : f32
    %170 = vector.broadcast %cst_113 : f32 to vector<16x64xf32>
    %171 = arith.subf %170, %167 : vector<16x64xf32>
    %172 = arith.select %169, %167, %171 : vector<16x64xi1>, vector<16x64xf32>
    %cst_114 = arith.constant 1.000000e+00 : f32
    %173 = vector.broadcast %cst_114 : f32 to vector<16x64xf32>
    %174 = arith.addf %173, %172 : vector<16x64xf32>
    %175 = arith.mulf %137, %174 : vector<16x64xf32>
    %c0_115 = arith.constant 0 : index
    %c0_116 = arith.constant 0 : index
    %c0_117 = arith.constant 0 : index
    %176 = vector.load %arg19[%c0_115, %c0_116, %c0_117] : memref<2x64x32xf32, #tpu.memory_space<vmem>>, vector<1x64x32xf32>
    %177 = vector.shape_cast %176 : vector<1x64x32xf32> to vector<64x32xf32>
    %cst_118 = arith.constant dense<0.000000e+00> : vector<16x32xf32>
    %178 = tpu.matmul %175, %177, %cst_118 {dimension_numbers = #tpu.dot_dimension_numbers<[1], [0], [0], [1], [0, 0, 1, 1], [], []>} : vector<16x64xf32>, vector<64x32xf32>, vector<16x32xf32> -> vector<16x32xf32>
    %c0_119 = arith.constant 0 : index
    %c0_120 = arith.constant 0 : index
    %c0_121 = arith.constant 0 : index
    %179 = vector.load %arg20[%c0_119, %c0_120, %c0_121] : memref<2x1x32xf32, #tpu.memory_space<vmem>>, vector<1x1x32xf32>
    %180 = vector.shape_cast %179 : vector<1x1x32xf32> to vector<1x32xf32>
    %181 = vector.broadcast %180 : vector<1x32xf32> to vector<16x32xf32>
    %182 = arith.addf %178, %181 : vector<16x32xf32>
    %183 = arith.addf %128, %182 : vector<16x32xf32>
    %c0_122 = arith.constant 0 : index
    %c0_123 = arith.constant 0 : index
    %c0_124 = arith.constant 0 : index
    %184 = vector.load %arg21[%c0_122, %c0_123, %c0_124] : memref<2x1x32xf32, #tpu.memory_space<vmem>>, vector<1x1x32xf32>
    %185 = vector.shape_cast %184 : vector<1x1x32xf32> to vector<1x32xf32>
    %c0_125 = arith.constant 0 : index
    %c0_126 = arith.constant 0 : index
    %c0_127 = arith.constant 0 : index
    %186 = vector.load %arg22[%c0_125, %c0_126, %c0_127] : memref<2x1x32xf32, #tpu.memory_space<vmem>>, vector<1x1x32xf32>
    %187 = vector.shape_cast %186 : vector<1x1x32xf32> to vector<1x32xf32>
    %cst_128 = arith.constant dense<0.000000e+00> : vector<16xf32>
    %188 = vector.multi_reduction <add>, %183, %cst_128 [1] : vector<16x32xf32> to vector<16xf32>
    %189 = vector.shape_cast %188 : vector<16xf32> to vector<16x1xf32>
    %cst_129 = arith.constant 3.200000e+01 : f32
    %190 = vector.broadcast %cst_129 : f32 to vector<16x1xf32>
    %191 = arith.divf %189, %190 : vector<16x1xf32>
    %192 = vector.broadcast %191 : vector<16x1xf32> to vector<16x32xf32>
    %193 = arith.subf %183, %192 : vector<16x32xf32>
    %194 = arith.mulf %193, %193 : vector<16x32xf32>
    %cst_130 = arith.constant dense<0.000000e+00> : vector<16xf32>
    %195 = vector.multi_reduction <add>, %194, %cst_130 [1] : vector<16x32xf32> to vector<16xf32>
    %196 = vector.shape_cast %195 : vector<16xf32> to vector<16x1xf32>
    %cst_131 = arith.constant 3.200000e+01 : f32
    %197 = vector.broadcast %cst_131 : f32 to vector<16x1xf32>
    %198 = arith.divf %196, %197 : vector<16x1xf32>
    %199 = vector.broadcast %191 : vector<16x1xf32> to vector<16x32xf32>
    %200 = arith.subf %183, %199 : vector<16x32xf32>
    %cst_132 = arith.constant 9.99999974E-6 : f32
    %201 = vector.broadcast %cst_132 : f32 to vector<16x1xf32>
    %202 = arith.addf %198, %201 : vector<16x1xf32>
    %203 = math.rsqrt %202 : vector<16x1xf32>
    %204 = vector.broadcast %203 : vector<16x1xf32> to vector<16x32xf32>
    %205 = arith.mulf %200, %204 : vector<16x32xf32>
    %206 = vector.broadcast %185 : vector<1x32xf32> to vector<16x32xf32>
    %207 = arith.mulf %205, %206 : vector<16x32xf32>
    %208 = vector.broadcast %187 : vector<1x32xf32> to vector<16x32xf32>
    %209 = arith.addf %207, %208 : vector<16x32xf32>
    %c1_133 = arith.constant 1 : index
    %c0_134 = arith.constant 0 : index
    %c0_135 = arith.constant 0 : index
    %c0_136 = arith.constant 0 : index
    %210 = vector.load %arg7[%c1_133, %c0_134, %c0_135, %c0_136] : memref<2x2x32x16xf32, #tpu.memory_space<vmem>>, vector<1x1x32x16xf32>
    %211 = vector.shape_cast %210 : vector<1x1x32x16xf32> to vector<32x16xf32>
    %cst_137 = arith.constant dense<0.000000e+00> : vector<16x16xf32>
    %212 = tpu.matmul %209, %211, %cst_137 {dimension_numbers = #tpu.dot_dimension_numbers<[1], [0], [0], [1], [0, 0, 1, 1], [], []>} : vector<16x32xf32>, vector<32x16xf32>, vector<16x16xf32> -> vector<16x16xf32>
    %c1_138 = arith.constant 1 : index
    %c0_139 = arith.constant 0 : index
    %c0_140 = arith.constant 0 : index
    %c0_141 = arith.constant 0 : index
    %213 = vector.load %arg8[%c1_138, %c0_139, %c0_140, %c0_141] : memref<2x2x1x16xf32, #tpu.memory_space<vmem>>, vector<1x1x1x16xf32>
    %214 = vector.shape_cast %213 : vector<1x1x1x16xf32> to vector<1x16xf32>
    %215 = vector.broadcast %214 : vector<1x16xf32> to vector<16x16xf32>
    %216 = arith.addf %212, %215 : vector<16x16xf32>
    %c1_142 = arith.constant 1 : index
    %c0_143 = arith.constant 0 : index
    %c0_144 = arith.constant 0 : index
    %c0_145 = arith.constant 0 : index
    %217 = vector.load %arg9[%c1_142, %c0_143, %c0_144, %c0_145] : memref<2x2x32x16xf32, #tpu.memory_space<vmem>>, vector<1x1x32x16xf32>
    %218 = vector.shape_cast %217 : vector<1x1x32x16xf32> to vector<32x16xf32>
    %cst_146 = arith.constant dense<0.000000e+00> : vector<16x16xf32>
    %219 = tpu.matmul %209, %218, %cst_146 {dimension_numbers = #tpu.dot_dimension_numbers<[1], [0], [0], [1], [0, 0, 1, 1], [], []>} : vector<16x32xf32>, vector<32x16xf32>, vector<16x16xf32> -> vector<16x16xf32>
    %c1_147 = arith.constant 1 : index
    %c0_148 = arith.constant 0 : index
    %c0_149 = arith.constant 0 : index
    %c0_150 = arith.constant 0 : index
    %220 = vector.load %arg10[%c1_147, %c0_148, %c0_149, %c0_150] : memref<2x2x1x16xf32, #tpu.memory_space<vmem>>, vector<1x1x1x16xf32>
    %221 = vector.shape_cast %220 : vector<1x1x1x16xf32> to vector<1x16xf32>
    %222 = vector.broadcast %221 : vector<1x16xf32> to vector<16x16xf32>
    %223 = arith.addf %219, %222 : vector<16x16xf32>
    %c1_151 = arith.constant 1 : index
    %c0_152 = arith.constant 0 : index
    %c0_153 = arith.constant 0 : index
    %c0_154 = arith.constant 0 : index
    %224 = vector.load %arg11[%c1_151, %c0_152, %c0_153, %c0_154] : memref<2x2x32x16xf32, #tpu.memory_space<vmem>>, vector<1x1x32x16xf32>
    %225 = vector.shape_cast %224 : vector<1x1x32x16xf32> to vector<32x16xf32>
    %cst_155 = arith.constant dense<0.000000e+00> : vector<16x16xf32>
    %226 = tpu.matmul %209, %225, %cst_155 {dimension_numbers = #tpu.dot_dimension_numbers<[1], [0], [0], [1], [0, 0, 1, 1], [], []>} : vector<16x32xf32>, vector<32x16xf32>, vector<16x16xf32> -> vector<16x16xf32>
    %c1_156 = arith.constant 1 : index
    %c0_157 = arith.constant 0 : index
    %c0_158 = arith.constant 0 : index
    %c0_159 = arith.constant 0 : index
    %227 = vector.load %arg12[%c1_156, %c0_157, %c0_158, %c0_159] : memref<2x2x1x16xf32, #tpu.memory_space<vmem>>, vector<1x1x1x16xf32>
    %228 = vector.shape_cast %227 : vector<1x1x1x16xf32> to vector<1x16xf32>
    %229 = vector.broadcast %228 : vector<1x16xf32> to vector<16x16xf32>
    %230 = arith.addf %226, %229 : vector<16x16xf32>
    %231 = vector.shape_cast %216 : vector<16x16xf32> to vector<2x8x16xf32>
    %232 = vector.shape_cast %223 : vector<16x16xf32> to vector<2x8x16xf32>
    %233 = vector.shape_cast %230 : vector<16x16xf32> to vector<2x8x16xf32>
    "tpu.trace_start"() <{level = 10 : i32, message = "bqd,bkd->bqk"}> : () -> ()
    %cst_160 = arith.constant dense<0.000000e+00> : vector<2x8x8xf32>
    %234 = tpu.matmul %231, %232, %cst_160 {dimension_numbers = #tpu.dot_dimension_numbers<[2], [2], [1], [1], [0, 0, 0, 1, 1, 1], [0], [0]>} : vector<2x8x16xf32>, vector<2x8x16xf32>, vector<2x8x8xf32> -> vector<2x8x8xf32>
    "tpu.trace_stop"() : () -> ()
    %cst_161 = arith.constant 2.500000e-01 : f32
    %235 = vector.broadcast %cst_161 : f32 to vector<2x8x8xf32>
    %236 = arith.mulf %234, %235 : vector<2x8x8xf32>
    %cst_162 = arith.constant dense<0xFF800000> : vector<2x8xf32>
    %237 = vector.multi_reduction <maximumf>, %236, %cst_162 [2] : vector<2x8x8xf32> to vector<2x8xf32>
    %238 = vector.shape_cast %237 : vector<2x8xf32> to vector<2x8x1xf32>
    %239 = vector.broadcast %238 : vector<2x8x1xf32> to vector<2x8x8xf32>
    %240 = arith.subf %236, %239 : vector<2x8x8xf32>
    %241 = math.exp %240 : vector<2x8x8xf32>
    %cst_163 = arith.constant dense<0.000000e+00> : vector<2x8xf32>
    %242 = vector.multi_reduction <add>, %241, %cst_163 [2] : vector<2x8x8xf32> to vector<2x8xf32>
    %243 = vector.shape_cast %242 : vector<2x8xf32> to vector<2x8x1xf32>
    %244 = vector.broadcast %243 : vector<2x8x1xf32> to vector<2x8x8xf32>
    %245 = arith.divf %241, %244 : vector<2x8x8xf32>
    "tpu.trace_start"() <{level = 10 : i32, message = "bqk,bkd->bqd"}> : () -> ()
    %cst_164 = arith.constant dense<0.000000e+00> : vector<2x8x16xf32>
    %246 = tpu.matmul %245, %233, %cst_164 {dimension_numbers = #tpu.dot_dimension_numbers<[2], [1], [1], [2], [0, 0, 0, 1, 1, 2], [0], [0]>} : vector<2x8x8xf32>, vector<2x8x16xf32>, vector<2x8x16xf32> -> vector<2x8x16xf32>
    "tpu.trace_stop"() : () -> ()
    %247 = vector.shape_cast %246 : vector<2x8x16xf32> to vector<16x16xf32>
    %c1_165 = arith.constant 1 : index
    %c1_166 = arith.constant 1 : index
    %c0_167 = arith.constant 0 : index
    %c0_168 = arith.constant 0 : index
    %248 = vector.load %arg7[%c1_165, %c1_166, %c0_167, %c0_168] : memref<2x2x32x16xf32, #tpu.memory_space<vmem>>, vector<1x1x32x16xf32>
    %249 = vector.shape_cast %248 : vector<1x1x32x16xf32> to vector<32x16xf32>
    %cst_169 = arith.constant dense<0.000000e+00> : vector<16x16xf32>
    %250 = tpu.matmul %209, %249, %cst_169 {dimension_numbers = #tpu.dot_dimension_numbers<[1], [0], [0], [1], [0, 0, 1, 1], [], []>} : vector<16x32xf32>, vector<32x16xf32>, vector<16x16xf32> -> vector<16x16xf32>
    %c1_170 = arith.constant 1 : index
    %c1_171 = arith.constant 1 : index
    %c0_172 = arith.constant 0 : index
    %c0_173 = arith.constant 0 : index
    %251 = vector.load %arg8[%c1_170, %c1_171, %c0_172, %c0_173] : memref<2x2x1x16xf32, #tpu.memory_space<vmem>>, vector<1x1x1x16xf32>
    %252 = vector.shape_cast %251 : vector<1x1x1x16xf32> to vector<1x16xf32>
    %253 = vector.broadcast %252 : vector<1x16xf32> to vector<16x16xf32>
    %254 = arith.addf %250, %253 : vector<16x16xf32>
    %c1_174 = arith.constant 1 : index
    %c1_175 = arith.constant 1 : index
    %c0_176 = arith.constant 0 : index
    %c0_177 = arith.constant 0 : index
    %255 = vector.load %arg9[%c1_174, %c1_175, %c0_176, %c0_177] : memref<2x2x32x16xf32, #tpu.memory_space<vmem>>, vector<1x1x32x16xf32>
    %256 = vector.shape_cast %255 : vector<1x1x32x16xf32> to vector<32x16xf32>
    %cst_178 = arith.constant dense<0.000000e+00> : vector<16x16xf32>
    %257 = tpu.matmul %209, %256, %cst_178 {dimension_numbers = #tpu.dot_dimension_numbers<[1], [0], [0], [1], [0, 0, 1, 1], [], []>} : vector<16x32xf32>, vector<32x16xf32>, vector<16x16xf32> -> vector<16x16xf32>
    %c1_179 = arith.constant 1 : index
    %c1_180 = arith.constant 1 : index
    %c0_181 = arith.constant 0 : index
    %c0_182 = arith.constant 0 : index
    %258 = vector.load %arg10[%c1_179, %c1_180, %c0_181, %c0_182] : memref<2x2x1x16xf32, #tpu.memory_space<vmem>>, vector<1x1x1x16xf32>
    %259 = vector.shape_cast %258 : vector<1x1x1x16xf32> to vector<1x16xf32>
    %260 = vector.broadcast %259 : vector<1x16xf32> to vector<16x16xf32>
    %261 = arith.addf %257, %260 : vector<16x16xf32>
    %c1_183 = arith.constant 1 : index
    %c1_184 = arith.constant 1 : index
    %c0_185 = arith.constant 0 : index
    %c0_186 = arith.constant 0 : index
    %262 = vector.load %arg11[%c1_183, %c1_184, %c0_185, %c0_186] : memref<2x2x32x16xf32, #tpu.memory_space<vmem>>, vector<1x1x32x16xf32>
    %263 = vector.shape_cast %262 : vector<1x1x32x16xf32> to vector<32x16xf32>
    %cst_187 = arith.constant dense<0.000000e+00> : vector<16x16xf32>
    %264 = tpu.matmul %209, %263, %cst_187 {dimension_numbers = #tpu.dot_dimension_numbers<[1], [0], [0], [1], [0, 0, 1, 1], [], []>} : vector<16x32xf32>, vector<32x16xf32>, vector<16x16xf32> -> vector<16x16xf32>
    %c1_188 = arith.constant 1 : index
    %c1_189 = arith.constant 1 : index
    %c0_190 = arith.constant 0 : index
    %c0_191 = arith.constant 0 : index
    %265 = vector.load %arg12[%c1_188, %c1_189, %c0_190, %c0_191] : memref<2x2x1x16xf32, #tpu.memory_space<vmem>>, vector<1x1x1x16xf32>
    %266 = vector.shape_cast %265 : vector<1x1x1x16xf32> to vector<1x16xf32>
    %267 = vector.broadcast %266 : vector<1x16xf32> to vector<16x16xf32>
    %268 = arith.addf %264, %267 : vector<16x16xf32>
    %269 = vector.shape_cast %254 : vector<16x16xf32> to vector<2x8x16xf32>
    %270 = vector.shape_cast %261 : vector<16x16xf32> to vector<2x8x16xf32>
    %271 = vector.shape_cast %268 : vector<16x16xf32> to vector<2x8x16xf32>
    "tpu.trace_start"() <{level = 10 : i32, message = "bqd,bkd->bqk"}> : () -> ()
    %cst_192 = arith.constant dense<0.000000e+00> : vector<2x8x8xf32>
    %272 = tpu.matmul %269, %270, %cst_192 {dimension_numbers = #tpu.dot_dimension_numbers<[2], [2], [1], [1], [0, 0, 0, 1, 1, 1], [0], [0]>} : vector<2x8x16xf32>, vector<2x8x16xf32>, vector<2x8x8xf32> -> vector<2x8x8xf32>
    "tpu.trace_stop"() : () -> ()
    %cst_193 = arith.constant 2.500000e-01 : f32
    %273 = vector.broadcast %cst_193 : f32 to vector<2x8x8xf32>
    %274 = arith.mulf %272, %273 : vector<2x8x8xf32>
    %cst_194 = arith.constant dense<0xFF800000> : vector<2x8xf32>
    %275 = vector.multi_reduction <maximumf>, %274, %cst_194 [2] : vector<2x8x8xf32> to vector<2x8xf32>
    %276 = vector.shape_cast %275 : vector<2x8xf32> to vector<2x8x1xf32>
    %277 = vector.broadcast %276 : vector<2x8x1xf32> to vector<2x8x8xf32>
    %278 = arith.subf %274, %277 : vector<2x8x8xf32>
    %279 = math.exp %278 : vector<2x8x8xf32>
    %cst_195 = arith.constant dense<0.000000e+00> : vector<2x8xf32>
    %280 = vector.multi_reduction <add>, %279, %cst_195 [2] : vector<2x8x8xf32> to vector<2x8xf32>
    %281 = vector.shape_cast %280 : vector<2x8xf32> to vector<2x8x1xf32>
    %282 = vector.broadcast %281 : vector<2x8x1xf32> to vector<2x8x8xf32>
    %283 = arith.divf %279, %282 : vector<2x8x8xf32>
    "tpu.trace_start"() <{level = 10 : i32, message = "bqk,bkd->bqd"}> : () -> ()
    %cst_196 = arith.constant dense<0.000000e+00> : vector<2x8x16xf32>
    %284 = tpu.matmul %283, %271, %cst_196 {dimension_numbers = #tpu.dot_dimension_numbers<[2], [1], [1], [2], [0, 0, 0, 1, 1, 2], [0], [0]>} : vector<2x8x8xf32>, vector<2x8x16xf32>, vector<2x8x16xf32> -> vector<2x8x16xf32>
    "tpu.trace_stop"() : () -> ()
    %285 = vector.shape_cast %284 : vector<2x8x16xf32> to vector<16x16xf32>
    %286 = tpu.concatenate %247, %285 in 1 : vector<16x16xf32>, vector<16x16xf32> -> vector<16x32xf32>
    %c1_197 = arith.constant 1 : index
    %c0_198 = arith.constant 0 : index
    %c0_199 = arith.constant 0 : index
    %287 = vector.load %arg13[%c1_197, %c0_198, %c0_199] : memref<2x32x32xf32, #tpu.memory_space<vmem>>, vector<1x32x32xf32>
    %288 = vector.shape_cast %287 : vector<1x32x32xf32> to vector<32x32xf32>
    %cst_200 = arith.constant dense<0.000000e+00> : vector<16x32xf32>
    %289 = tpu.matmul %286, %288, %cst_200 {dimension_numbers = #tpu.dot_dimension_numbers<[1], [0], [0], [1], [0, 0, 1, 1], [], []>} : vector<16x32xf32>, vector<32x32xf32>, vector<16x32xf32> -> vector<16x32xf32>
    %c1_201 = arith.constant 1 : index
    %c0_202 = arith.constant 0 : index
    %c0_203 = arith.constant 0 : index
    %290 = vector.load %arg14[%c1_201, %c0_202, %c0_203] : memref<2x1x32xf32, #tpu.memory_space<vmem>>, vector<1x1x32xf32>
    %291 = vector.shape_cast %290 : vector<1x1x32xf32> to vector<1x32xf32>
    %292 = vector.broadcast %291 : vector<1x32xf32> to vector<16x32xf32>
    %293 = arith.addf %289, %292 : vector<16x32xf32>
    %294 = arith.addf %209, %293 : vector<16x32xf32>
    %c1_204 = arith.constant 1 : index
    %c0_205 = arith.constant 0 : index
    %c0_206 = arith.constant 0 : index
    %295 = vector.load %arg15[%c1_204, %c0_205, %c0_206] : memref<2x1x32xf32, #tpu.memory_space<vmem>>, vector<1x1x32xf32>
    %296 = vector.shape_cast %295 : vector<1x1x32xf32> to vector<1x32xf32>
    %c1_207 = arith.constant 1 : index
    %c0_208 = arith.constant 0 : index
    %c0_209 = arith.constant 0 : index
    %297 = vector.load %arg16[%c1_207, %c0_208, %c0_209] : memref<2x1x32xf32, #tpu.memory_space<vmem>>, vector<1x1x32xf32>
    %298 = vector.shape_cast %297 : vector<1x1x32xf32> to vector<1x32xf32>
    %cst_210 = arith.constant dense<0.000000e+00> : vector<16xf32>
    %299 = vector.multi_reduction <add>, %294, %cst_210 [1] : vector<16x32xf32> to vector<16xf32>
    %300 = vector.shape_cast %299 : vector<16xf32> to vector<16x1xf32>
    %cst_211 = arith.constant 3.200000e+01 : f32
    %301 = vector.broadcast %cst_211 : f32 to vector<16x1xf32>
    %302 = arith.divf %300, %301 : vector<16x1xf32>
    %303 = vector.broadcast %302 : vector<16x1xf32> to vector<16x32xf32>
    %304 = arith.subf %294, %303 : vector<16x32xf32>
    %305 = arith.mulf %304, %304 : vector<16x32xf32>
    %cst_212 = arith.constant dense<0.000000e+00> : vector<16xf32>
    %306 = vector.multi_reduction <add>, %305, %cst_212 [1] : vector<16x32xf32> to vector<16xf32>
    %307 = vector.shape_cast %306 : vector<16xf32> to vector<16x1xf32>
    %cst_213 = arith.constant 3.200000e+01 : f32
    %308 = vector.broadcast %cst_213 : f32 to vector<16x1xf32>
    %309 = arith.divf %307, %308 : vector<16x1xf32>
    %310 = vector.broadcast %302 : vector<16x1xf32> to vector<16x32xf32>
    %311 = arith.subf %294, %310 : vector<16x32xf32>
    %cst_214 = arith.constant 9.99999974E-6 : f32
    %312 = vector.broadcast %cst_214 : f32 to vector<16x1xf32>
    %313 = arith.addf %309, %312 : vector<16x1xf32>
    %314 = math.rsqrt %313 : vector<16x1xf32>
    %315 = vector.broadcast %314 : vector<16x1xf32> to vector<16x32xf32>
    %316 = arith.mulf %311, %315 : vector<16x32xf32>
    %317 = vector.broadcast %296 : vector<1x32xf32> to vector<16x32xf32>
    %318 = arith.mulf %316, %317 : vector<16x32xf32>
    %319 = vector.broadcast %298 : vector<1x32xf32> to vector<16x32xf32>
    %320 = arith.addf %318, %319 : vector<16x32xf32>
    %c1_215 = arith.constant 1 : index
    %c0_216 = arith.constant 0 : index
    %c0_217 = arith.constant 0 : index
    %321 = vector.load %arg17[%c1_215, %c0_216, %c0_217] : memref<2x32x64xf32, #tpu.memory_space<vmem>>, vector<1x32x64xf32>
    %322 = vector.shape_cast %321 : vector<1x32x64xf32> to vector<32x64xf32>
    %cst_218 = arith.constant dense<0.000000e+00> : vector<16x64xf32>
    %323 = tpu.matmul %320, %322, %cst_218 {dimension_numbers = #tpu.dot_dimension_numbers<[1], [0], [0], [1], [0, 0, 1, 1], [], []>} : vector<16x32xf32>, vector<32x64xf32>, vector<16x64xf32> -> vector<16x64xf32>
    %c1_219 = arith.constant 1 : index
    %c0_220 = arith.constant 0 : index
    %c0_221 = arith.constant 0 : index
    %324 = vector.load %arg18[%c1_219, %c0_220, %c0_221] : memref<2x1x64xf32, #tpu.memory_space<vmem>>, vector<1x1x64xf32>
    %325 = vector.shape_cast %324 : vector<1x1x64xf32> to vector<1x64xf32>
    %326 = vector.broadcast %325 : vector<1x64xf32> to vector<16x64xf32>
    %327 = arith.addf %323, %326 : vector<16x64xf32>
    %cst_222 = arith.constant 5.000000e-01 : f32
    %328 = vector.broadcast %cst_222 : f32 to vector<16x64xf32>
    %329 = arith.mulf %328, %327 : vector<16x64xf32>
    %cst_223 = arith.constant 0.707106769 : f32
    %330 = vector.broadcast %cst_223 : f32 to vector<16x64xf32>
    %331 = arith.mulf %327, %330 : vector<16x64xf32>
    %332 = math.absf %331 : vector<16x64xf32>
    %cst_224 = arith.constant 0.327591091 : f32
    %333 = vector.broadcast %cst_224 : f32 to vector<16x64xf32>
    %334 = arith.mulf %333, %332 : vector<16x64xf32>
    %cst_225 = arith.constant 1.000000e+00 : f32
    %335 = vector.broadcast %cst_225 : f32 to vector<16x64xf32>
    %336 = arith.addf %335, %334 : vector<16x64xf32>
    %cst_226 = arith.constant 1.000000e+00 : f32
    %337 = vector.broadcast %cst_226 : f32 to vector<16x64xf32>
    %338 = arith.divf %337, %336 : vector<16x64xf32>
    %cst_227 = arith.constant 1.06140542 : f32
    %339 = vector.broadcast %cst_227 : f32 to vector<16x64xf32>
    %340 = arith.mulf %339, %338 : vector<16x64xf32>
    %cst_228 = arith.constant -1.45315206 : f32
    %341 = vector.broadcast %cst_228 : f32 to vector<16x64xf32>
    %342 = arith.addf %340, %341 : vector<16x64xf32>
    %343 = arith.mulf %342, %338 : vector<16x64xf32>
    %cst_229 = arith.constant 1.42141378 : f32
    %344 = vector.broadcast %cst_229 : f32 to vector<16x64xf32>
    %345 = arith.addf %343, %344 : vector<16x64xf32>
    %346 = arith.mulf %345, %338 : vector<16x64xf32>
    %cst_230 = arith.constant -0.284496725 : f32
    %347 = vector.broadcast %cst_230 : f32 to vector<16x64xf32>
    %348 = arith.addf %346, %347 : vector<16x64xf32>
    %349 = arith.mulf %348, %338 : vector<16x64xf32>
    %cst_231 = arith.constant 0.254829586 : f32
    %350 = vector.broadcast %cst_231 : f32 to vector<16x64xf32>
    %351 = arith.addf %349, %350 : vector<16x64xf32>
    %352 = arith.mulf %351, %338 : vector<16x64xf32>
    %cst_232 = arith.constant 0.000000e+00 : f32
    %353 = vector.broadcast %cst_232 : f32 to vector<16x64xf32>
    %354 = arith.subf %353, %332 : vector<16x64xf32>
    %355 = arith.mulf %354, %332 : vector<16x64xf32>
    %356 = math.exp %355 : vector<16x64xf32>
    %357 = arith.mulf %352, %356 : vector<16x64xf32>
    %cst_233 = arith.constant 1.000000e+00 : f32
    %358 = vector.broadcast %cst_233 : f32 to vector<16x64xf32>
    %359 = arith.subf %358, %357 : vector<16x64xf32>
    %cst_234 = arith.constant 0.000000e+00 : f32
    %360 = vector.broadcast %cst_234 : f32 to vector<16x64xf32>
    %361 = arith.cmpf oge, %331, %360 : vector<16x64xf32>
    %cst_235 = arith.constant 0.000000e+00 : f32
    %362 = vector.broadcast %cst_235 : f32 to vector<16x64xf32>
    %363 = arith.subf %362, %359 : vector<16x64xf32>
    %364 = arith.select %361, %359, %363 : vector<16x64xi1>, vector<16x64xf32>
    %cst_236 = arith.constant 1.000000e+00 : f32
    %365 = vector.broadcast %cst_236 : f32 to vector<16x64xf32>
    %366 = arith.addf %365, %364 : vector<16x64xf32>
    %367 = arith.mulf %329, %366 : vector<16x64xf32>
    %c1_237 = arith.constant 1 : index
    %c0_238 = arith.constant 0 : index
    %c0_239 = arith.constant 0 : index
    %368 = vector.load %arg19[%c1_237, %c0_238, %c0_239] : memref<2x64x32xf32, #tpu.memory_space<vmem>>, vector<1x64x32xf32>
    %369 = vector.shape_cast %368 : vector<1x64x32xf32> to vector<64x32xf32>
    %cst_240 = arith.constant dense<0.000000e+00> : vector<16x32xf32>
    %370 = tpu.matmul %367, %369, %cst_240 {dimension_numbers = #tpu.dot_dimension_numbers<[1], [0], [0], [1], [0, 0, 1, 1], [], []>} : vector<16x64xf32>, vector<64x32xf32>, vector<16x32xf32> -> vector<16x32xf32>
    %c1_241 = arith.constant 1 : index
    %c0_242 = arith.constant 0 : index
    %c0_243 = arith.constant 0 : index
    %371 = vector.load %arg20[%c1_241, %c0_242, %c0_243] : memref<2x1x32xf32, #tpu.memory_space<vmem>>, vector<1x1x32xf32>
    %372 = vector.shape_cast %371 : vector<1x1x32xf32> to vector<1x32xf32>
    %373 = vector.broadcast %372 : vector<1x32xf32> to vector<16x32xf32>
    %374 = arith.addf %370, %373 : vector<16x32xf32>
    %375 = arith.addf %320, %374 : vector<16x32xf32>
    %c1_244 = arith.constant 1 : index
    %c0_245 = arith.constant 0 : index
    %c0_246 = arith.constant 0 : index
    %376 = vector.load %arg21[%c1_244, %c0_245, %c0_246] : memref<2x1x32xf32, #tpu.memory_space<vmem>>, vector<1x1x32xf32>
    %377 = vector.shape_cast %376 : vector<1x1x32xf32> to vector<1x32xf32>
    %c1_247 = arith.constant 1 : index
    %c0_248 = arith.constant 0 : index
    %c0_249 = arith.constant 0 : index
    %378 = vector.load %arg22[%c1_247, %c0_248, %c0_249] : memref<2x1x32xf32, #tpu.memory_space<vmem>>, vector<1x1x32xf32>
    %379 = vector.shape_cast %378 : vector<1x1x32xf32> to vector<1x32xf32>
    %cst_250 = arith.constant dense<0.000000e+00> : vector<16xf32>
    %380 = vector.multi_reduction <add>, %375, %cst_250 [1] : vector<16x32xf32> to vector<16xf32>
    %381 = vector.shape_cast %380 : vector<16xf32> to vector<16x1xf32>
    %cst_251 = arith.constant 3.200000e+01 : f32
    %382 = vector.broadcast %cst_251 : f32 to vector<16x1xf32>
    %383 = arith.divf %381, %382 : vector<16x1xf32>
    %384 = vector.broadcast %383 : vector<16x1xf32> to vector<16x32xf32>
    %385 = arith.subf %375, %384 : vector<16x32xf32>
    %386 = arith.mulf %385, %385 : vector<16x32xf32>
    %cst_252 = arith.constant dense<0.000000e+00> : vector<16xf32>
    %387 = vector.multi_reduction <add>, %386, %cst_252 [1] : vector<16x32xf32> to vector<16xf32>
    %388 = vector.shape_cast %387 : vector<16xf32> to vector<16x1xf32>
    %cst_253 = arith.constant 3.200000e+01 : f32
    %389 = vector.broadcast %cst_253 : f32 to vector<16x1xf32>
    %390 = arith.divf %388, %389 : vector<16x1xf32>
    %391 = vector.broadcast %383 : vector<16x1xf32> to vector<16x32xf32>
    %392 = arith.subf %375, %391 : vector<16x32xf32>
    %cst_254 = arith.constant 9.99999974E-6 : f32
    %393 = vector.broadcast %cst_254 : f32 to vector<16x1xf32>
    %394 = arith.addf %390, %393 : vector<16x1xf32>
    %395 = math.rsqrt %394 : vector<16x1xf32>
    %396 = vector.broadcast %395 : vector<16x1xf32> to vector<16x32xf32>
    %397 = arith.mulf %392, %396 : vector<16x32xf32>
    %398 = vector.broadcast %377 : vector<1x32xf32> to vector<16x32xf32>
    %399 = arith.mulf %397, %398 : vector<16x32xf32>
    %400 = vector.broadcast %379 : vector<1x32xf32> to vector<16x32xf32>
    %401 = arith.addf %399, %400 : vector<16x32xf32>
    %c0_255 = arith.constant 0 : index
    %c0_256 = arith.constant 0 : index
    %402 = vector.load %arg24[%c0_255, %c0_256] : memref<32x64xf32, #tpu.memory_space<vmem>>, vector<32x64xf32>
    %cst_257 = arith.constant dense<0.000000e+00> : vector<16x64xf32>
    %403 = tpu.matmul %401, %402, %cst_257 {dimension_numbers = #tpu.dot_dimension_numbers<[1], [0], [0], [1], [0, 0, 1, 1], [], []>} : vector<16x32xf32>, vector<32x64xf32>, vector<16x64xf32> -> vector<16x64xf32>
    %404 = vector.shape_cast %403 : vector<16x64xf32> to vector<2x8x64xf32>
    %c0_258 = arith.constant 0 : index
    %c0_259 = arith.constant 0 : index
    %405 = vector.load %arg25[%c0_258, %c0_259] : memref<32x64xf32, #tpu.memory_space<vmem>>, vector<32x64xf32>
    %cst_260 = arith.constant dense<0.000000e+00> : vector<16x64xf32>
    %406 = tpu.matmul %401, %405, %cst_260 {dimension_numbers = #tpu.dot_dimension_numbers<[1], [0], [0], [1], [0, 0, 1, 1], [], []>} : vector<16x32xf32>, vector<32x64xf32>, vector<16x64xf32> -> vector<16x64xf32>
    %407 = vector.shape_cast %406 : vector<16x64xf32> to vector<2x8x64xf32>
    %c0_261 = arith.constant 0 : index
    %c0_262 = arith.constant 0 : index
    %408 = vector.load %arg23[%c0_261, %c0_262] : memref<1x64xf32, #tpu.memory_space<vmem>>, vector<1x64xf32>
    %409 = vector.shape_cast %408 : vector<1x64xf32> to vector<1x1x64xf32>
    %410 = vector.broadcast %409 : vector<1x1x64xf32> to vector<2x8x64xf32>
    %411 = arith.mulf %404, %410 : vector<2x8x64xf32>
    %cst_263 = arith.constant dense<0.000000e+00> : vector<2x8xf32>
    %412 = vector.multi_reduction <add>, %411, %cst_263 [2] : vector<2x8x64xf32> to vector<2x8xf32>
    %413 = vector.shape_cast %412 : vector<2x8xf32> to vector<2x8x1xf32>
    %cst_264 = arith.constant 1.250000e-01 : f32
    %414 = vector.broadcast %cst_264 : f32 to vector<2x8x1xf32>
    %415 = arith.mulf %413, %414 : vector<2x8x1xf32>
    %cst_265 = arith.constant dense<0xFF800000> : vector<2x1xf32>
    %416 = vector.multi_reduction <maximumf>, %415, %cst_265 [1] : vector<2x8x1xf32> to vector<2x1xf32>
    %417 = vector.shape_cast %416 : vector<2x1xf32> to vector<2x1x1xf32>
    %418 = vector.broadcast %417 : vector<2x1x1xf32> to vector<2x8x1xf32>
    %419 = arith.subf %415, %418 : vector<2x8x1xf32>
    %420 = math.exp %419 : vector<2x8x1xf32>
    %cst_266 = arith.constant dense<0.000000e+00> : vector<2x1xf32>
    %421 = vector.multi_reduction <add>, %420, %cst_266 [1] : vector<2x8x1xf32> to vector<2x1xf32>
    %422 = vector.shape_cast %421 : vector<2x1xf32> to vector<2x1x1xf32>
    %423 = vector.broadcast %422 : vector<2x1x1xf32> to vector<2x8x1xf32>
    %424 = arith.divf %420, %423 : vector<2x8x1xf32>
    %425 = vector.broadcast %424 : vector<2x8x1xf32> to vector<2x8x64xf32>
    %426 = arith.mulf %425, %407 : vector<2x8x64xf32>
    %cst_267 = arith.constant dense<0.000000e+00> : vector<2x64xf32>
    %427 = vector.multi_reduction <add>, %426, %cst_267 [1] : vector<2x8x64xf32> to vector<2x64xf32>
    %c0_268 = arith.constant 0 : index
    %c0_269 = arith.constant 0 : index
    %428 = vector.load %arg26[%c0_268, %c0_269] : memref<64x64xf32, #tpu.memory_space<vmem>>, vector<64x64xf32>
    %cst_270 = arith.constant dense<0.000000e+00> : vector<2x64xf32>
    %429 = tpu.matmul %427, %428, %cst_270 {dimension_numbers = #tpu.dot_dimension_numbers<[1], [0], [0], [1], [0, 0, 1, 1], [], []>} : vector<2x64xf32>, vector<64x64xf32>, vector<2x64xf32> -> vector<2x64xf32>
    %c0_271 = arith.constant 0 : index
    %c0_272 = arith.constant 0 : index
    %430 = vector.load %arg27[%c0_271, %c0_272] : memref<1x64xf32, #tpu.memory_space<vmem>>, vector<1x64xf32>
    %431 = vector.broadcast %430 : vector<1x64xf32> to vector<2x64xf32>
    %432 = arith.addf %429, %431 : vector<2x64xf32>
    %cst_273 = arith.constant 0.000000e+00 : f32
    %433 = vector.broadcast %cst_273 : f32 to vector<2x64xf32>
    %434 = arith.maximumf %432, %433 : vector<2x64xf32>
    %c0_274 = arith.constant 0 : index
    %c0_275 = arith.constant 0 : index
    %435 = vector.load %arg28[%c0_274, %c0_275] : memref<64x289xf32, #tpu.memory_space<vmem>>, vector<64x289xf32>
    %cst_276 = arith.constant dense<0.000000e+00> : vector<2x289xf32>
    %436 = tpu.matmul %434, %435, %cst_276 {dimension_numbers = #tpu.dot_dimension_numbers<[1], [0], [0], [1], [0, 0, 1, 1], [], []>} : vector<2x64xf32>, vector<64x289xf32>, vector<2x289xf32> -> vector<2x289xf32>
    %c0_277 = arith.constant 0 : index
    %c0_278 = arith.constant 0 : index
    %437 = vector.load %arg29[%c0_277, %c0_278] : memref<1x289xf32, #tpu.memory_space<vmem>>, vector<1x289xf32>
    %438 = vector.broadcast %437 : vector<1x289xf32> to vector<2x289xf32>
    %439 = arith.addf %436, %438 : vector<2x289xf32>
    %c0_279 = arith.constant 0 : index
    %c0_280 = arith.constant 0 : index
    %c0_281 = arith.constant 0 : index
    %440 = vector.load %arg2[%c0_279, %c0_280, %c0_281] : memref<2x4x16xf32, #tpu.memory_space<vmem>>, vector<2x4x16xf32>
    %441 = arith.cmpf one, %440, %440 : vector<2x4x16xf32>
    %cst_282 = arith.constant 0.000000e+00 : f32
    %442 = vector.broadcast %cst_282 : f32 to vector<2x4x16xf32>
    %443 = arith.select %441, %442, %440 : vector<2x4x16xi1>, vector<2x4x16xf32>
    %cst_283 = arith.constant 0.000000e+00 : f32
    %444 = vector.broadcast %cst_283 : f32 to vector<2x4x16xf32>
    %445 = vector.extract_strided_slice %439 {offsets = [0, 0], sizes = [2, 16], strides = [1, 1]} : vector<2x289xf32> to vector<2x16xf32>
    %446 = vector.extract_strided_slice %443 {offsets = [0, 0, 0], sizes = [2, 4, 1], strides = [1, 1, 1]} : vector<2x4x16xf32> to vector<2x4x1xf32>
    %447 = vector.shape_cast %445 : vector<2x16xf32> to vector<2x1x16xf32>
    %448 = vector.broadcast %446 : vector<2x4x1xf32> to vector<2x4x16xf32>
    %449 = vector.broadcast %447 : vector<2x1x16xf32> to vector<2x4x16xf32>
    %450 = arith.mulf %448, %449 : vector<2x4x16xf32>
    %451 = arith.addf %444, %450 : vector<2x4x16xf32>
    %452 = vector.extract_strided_slice %439 {offsets = [0, 16], sizes = [2, 16], strides = [1, 1]} : vector<2x289xf32> to vector<2x16xf32>
    %453 = vector.extract_strided_slice %443 {offsets = [0, 0, 1], sizes = [2, 4, 1], strides = [1, 1, 1]} : vector<2x4x16xf32> to vector<2x4x1xf32>
    %454 = vector.shape_cast %452 : vector<2x16xf32> to vector<2x1x16xf32>
    %455 = vector.broadcast %453 : vector<2x4x1xf32> to vector<2x4x16xf32>
    %456 = vector.broadcast %454 : vector<2x1x16xf32> to vector<2x4x16xf32>
    %457 = arith.mulf %455, %456 : vector<2x4x16xf32>
    %458 = arith.addf %451, %457 : vector<2x4x16xf32>
    %459 = vector.extract_strided_slice %439 {offsets = [0, 32], sizes = [2, 16], strides = [1, 1]} : vector<2x289xf32> to vector<2x16xf32>
    %460 = vector.extract_strided_slice %443 {offsets = [0, 0, 2], sizes = [2, 4, 1], strides = [1, 1, 1]} : vector<2x4x16xf32> to vector<2x4x1xf32>
    %461 = vector.shape_cast %459 : vector<2x16xf32> to vector<2x1x16xf32>
    %462 = vector.broadcast %460 : vector<2x4x1xf32> to vector<2x4x16xf32>
    %463 = vector.broadcast %461 : vector<2x1x16xf32> to vector<2x4x16xf32>
    %464 = arith.mulf %462, %463 : vector<2x4x16xf32>
    %465 = arith.addf %458, %464 : vector<2x4x16xf32>
    %466 = vector.extract_strided_slice %439 {offsets = [0, 48], sizes = [2, 16], strides = [1, 1]} : vector<2x289xf32> to vector<2x16xf32>
    %467 = vector.extract_strided_slice %443 {offsets = [0, 0, 3], sizes = [2, 4, 1], strides = [1, 1, 1]} : vector<2x4x16xf32> to vector<2x4x1xf32>
    %468 = vector.shape_cast %466 : vector<2x16xf32> to vector<2x1x16xf32>
    %469 = vector.broadcast %467 : vector<2x4x1xf32> to vector<2x4x16xf32>
    %470 = vector.broadcast %468 : vector<2x1x16xf32> to vector<2x4x16xf32>
    %471 = arith.mulf %469, %470 : vector<2x4x16xf32>
    %472 = arith.addf %465, %471 : vector<2x4x16xf32>
    %473 = vector.extract_strided_slice %439 {offsets = [0, 64], sizes = [2, 16], strides = [1, 1]} : vector<2x289xf32> to vector<2x16xf32>
    %474 = vector.extract_strided_slice %443 {offsets = [0, 0, 4], sizes = [2, 4, 1], strides = [1, 1, 1]} : vector<2x4x16xf32> to vector<2x4x1xf32>
    %475 = vector.shape_cast %473 : vector<2x16xf32> to vector<2x1x16xf32>
    %476 = vector.broadcast %474 : vector<2x4x1xf32> to vector<2x4x16xf32>
    %477 = vector.broadcast %475 : vector<2x1x16xf32> to vector<2x4x16xf32>
    %478 = arith.mulf %476, %477 : vector<2x4x16xf32>
    %479 = arith.addf %472, %478 : vector<2x4x16xf32>
    %480 = vector.extract_strided_slice %439 {offsets = [0, 80], sizes = [2, 16], strides = [1, 1]} : vector<2x289xf32> to vector<2x16xf32>
    %481 = vector.extract_strided_slice %443 {offsets = [0, 0, 5], sizes = [2, 4, 1], strides = [1, 1, 1]} : vector<2x4x16xf32> to vector<2x4x1xf32>
    %482 = vector.shape_cast %480 : vector<2x16xf32> to vector<2x1x16xf32>
    %483 = vector.broadcast %481 : vector<2x4x1xf32> to vector<2x4x16xf32>
    %484 = vector.broadcast %482 : vector<2x1x16xf32> to vector<2x4x16xf32>
    %485 = arith.mulf %483, %484 : vector<2x4x16xf32>
    %486 = arith.addf %479, %485 : vector<2x4x16xf32>
    %487 = vector.extract_strided_slice %439 {offsets = [0, 96], sizes = [2, 16], strides = [1, 1]} : vector<2x289xf32> to vector<2x16xf32>
    %488 = vector.extract_strided_slice %443 {offsets = [0, 0, 6], sizes = [2, 4, 1], strides = [1, 1, 1]} : vector<2x4x16xf32> to vector<2x4x1xf32>
    %489 = vector.shape_cast %487 : vector<2x16xf32> to vector<2x1x16xf32>
    %490 = vector.broadcast %488 : vector<2x4x1xf32> to vector<2x4x16xf32>
    %491 = vector.broadcast %489 : vector<2x1x16xf32> to vector<2x4x16xf32>
    %492 = arith.mulf %490, %491 : vector<2x4x16xf32>
    %493 = arith.addf %486, %492 : vector<2x4x16xf32>
    %494 = vector.extract_strided_slice %439 {offsets = [0, 112], sizes = [2, 16], strides = [1, 1]} : vector<2x289xf32> to vector<2x16xf32>
    %495 = vector.extract_strided_slice %443 {offsets = [0, 0, 7], sizes = [2, 4, 1], strides = [1, 1, 1]} : vector<2x4x16xf32> to vector<2x4x1xf32>
    %496 = vector.shape_cast %494 : vector<2x16xf32> to vector<2x1x16xf32>
    %497 = vector.broadcast %495 : vector<2x4x1xf32> to vector<2x4x16xf32>
    %498 = vector.broadcast %496 : vector<2x1x16xf32> to vector<2x4x16xf32>
    %499 = arith.mulf %497, %498 : vector<2x4x16xf32>
    %500 = arith.addf %493, %499 : vector<2x4x16xf32>
    %501 = vector.extract_strided_slice %439 {offsets = [0, 128], sizes = [2, 16], strides = [1, 1]} : vector<2x289xf32> to vector<2x16xf32>
    %502 = vector.extract_strided_slice %443 {offsets = [0, 0, 8], sizes = [2, 4, 1], strides = [1, 1, 1]} : vector<2x4x16xf32> to vector<2x4x1xf32>
    %503 = vector.shape_cast %501 : vector<2x16xf32> to vector<2x1x16xf32>
    %504 = vector.broadcast %502 : vector<2x4x1xf32> to vector<2x4x16xf32>
    %505 = vector.broadcast %503 : vector<2x1x16xf32> to vector<2x4x16xf32>
    %506 = arith.mulf %504, %505 : vector<2x4x16xf32>
    %507 = arith.addf %500, %506 : vector<2x4x16xf32>
    %508 = vector.extract_strided_slice %439 {offsets = [0, 144], sizes = [2, 16], strides = [1, 1]} : vector<2x289xf32> to vector<2x16xf32>
    %509 = vector.extract_strided_slice %443 {offsets = [0, 0, 9], sizes = [2, 4, 1], strides = [1, 1, 1]} : vector<2x4x16xf32> to vector<2x4x1xf32>
    %510 = vector.shape_cast %508 : vector<2x16xf32> to vector<2x1x16xf32>
    %511 = vector.broadcast %509 : vector<2x4x1xf32> to vector<2x4x16xf32>
    %512 = vector.broadcast %510 : vector<2x1x16xf32> to vector<2x4x16xf32>
    %513 = arith.mulf %511, %512 : vector<2x4x16xf32>
    %514 = arith.addf %507, %513 : vector<2x4x16xf32>
    %515 = vector.extract_strided_slice %439 {offsets = [0, 160], sizes = [2, 16], strides = [1, 1]} : vector<2x289xf32> to vector<2x16xf32>
    %516 = vector.extract_strided_slice %443 {offsets = [0, 0, 10], sizes = [2, 4, 1], strides = [1, 1, 1]} : vector<2x4x16xf32> to vector<2x4x1xf32>
    %517 = vector.shape_cast %515 : vector<2x16xf32> to vector<2x1x16xf32>
    %518 = vector.broadcast %516 : vector<2x4x1xf32> to vector<2x4x16xf32>
    %519 = vector.broadcast %517 : vector<2x1x16xf32> to vector<2x4x16xf32>
    %520 = arith.mulf %518, %519 : vector<2x4x16xf32>
    %521 = arith.addf %514, %520 : vector<2x4x16xf32>
    %522 = vector.extract_strided_slice %439 {offsets = [0, 176], sizes = [2, 16], strides = [1, 1]} : vector<2x289xf32> to vector<2x16xf32>
    %523 = vector.extract_strided_slice %443 {offsets = [0, 0, 11], sizes = [2, 4, 1], strides = [1, 1, 1]} : vector<2x4x16xf32> to vector<2x4x1xf32>
    %524 = vector.shape_cast %522 : vector<2x16xf32> to vector<2x1x16xf32>
    %525 = vector.broadcast %523 : vector<2x4x1xf32> to vector<2x4x16xf32>
    %526 = vector.broadcast %524 : vector<2x1x16xf32> to vector<2x4x16xf32>
    %527 = arith.mulf %525, %526 : vector<2x4x16xf32>
    %528 = arith.addf %521, %527 : vector<2x4x16xf32>
    %529 = vector.extract_strided_slice %439 {offsets = [0, 192], sizes = [2, 16], strides = [1, 1]} : vector<2x289xf32> to vector<2x16xf32>
    %530 = vector.extract_strided_slice %443 {offsets = [0, 0, 12], sizes = [2, 4, 1], strides = [1, 1, 1]} : vector<2x4x16xf32> to vector<2x4x1xf32>
    %531 = vector.shape_cast %529 : vector<2x16xf32> to vector<2x1x16xf32>
    %532 = vector.broadcast %530 : vector<2x4x1xf32> to vector<2x4x16xf32>
    %533 = vector.broadcast %531 : vector<2x1x16xf32> to vector<2x4x16xf32>
    %534 = arith.mulf %532, %533 : vector<2x4x16xf32>
    %535 = arith.addf %528, %534 : vector<2x4x16xf32>
    %536 = vector.extract_strided_slice %439 {offsets = [0, 208], sizes = [2, 16], strides = [1, 1]} : vector<2x289xf32> to vector<2x16xf32>
    %537 = vector.extract_strided_slice %443 {offsets = [0, 0, 13], sizes = [2, 4, 1], strides = [1, 1, 1]} : vector<2x4x16xf32> to vector<2x4x1xf32>
    %538 = vector.shape_cast %536 : vector<2x16xf32> to vector<2x1x16xf32>
    %539 = vector.broadcast %537 : vector<2x4x1xf32> to vector<2x4x16xf32>
    %540 = vector.broadcast %538 : vector<2x1x16xf32> to vector<2x4x16xf32>
    %541 = arith.mulf %539, %540 : vector<2x4x16xf32>
    %542 = arith.addf %535, %541 : vector<2x4x16xf32>
    %543 = vector.extract_strided_slice %439 {offsets = [0, 224], sizes = [2, 16], strides = [1, 1]} : vector<2x289xf32> to vector<2x16xf32>
    %544 = vector.extract_strided_slice %443 {offsets = [0, 0, 14], sizes = [2, 4, 1], strides = [1, 1, 1]} : vector<2x4x16xf32> to vector<2x4x1xf32>
    %545 = vector.shape_cast %543 : vector<2x16xf32> to vector<2x1x16xf32>
    %546 = vector.broadcast %544 : vector<2x4x1xf32> to vector<2x4x16xf32>
    %547 = vector.broadcast %545 : vector<2x1x16xf32> to vector<2x4x16xf32>
    %548 = arith.mulf %546, %547 : vector<2x4x16xf32>
    %549 = arith.addf %542, %548 : vector<2x4x16xf32>
    %550 = vector.extract_strided_slice %439 {offsets = [0, 240], sizes = [2, 16], strides = [1, 1]} : vector<2x289xf32> to vector<2x16xf32>
    %551 = vector.extract_strided_slice %443 {offsets = [0, 0, 15], sizes = [2, 4, 1], strides = [1, 1, 1]} : vector<2x4x16xf32> to vector<2x4x1xf32>
    %552 = vector.shape_cast %550 : vector<2x16xf32> to vector<2x1x16xf32>
    %553 = vector.broadcast %551 : vector<2x4x1xf32> to vector<2x4x16xf32>
    %554 = vector.broadcast %552 : vector<2x1x16xf32> to vector<2x4x16xf32>
    %555 = arith.mulf %553, %554 : vector<2x4x16xf32>
    %556 = arith.addf %549, %555 : vector<2x4x16xf32>
    %557 = vector.extract_strided_slice %439 {offsets = [0, 256], sizes = [2, 16], strides = [1, 1]} : vector<2x289xf32> to vector<2x16xf32>
    %558 = vector.shape_cast %557 : vector<2x16xf32> to vector<2x1x16xf32>
    %559 = vector.broadcast %558 : vector<2x1x16xf32> to vector<2x4x16xf32>
    %560 = arith.addf %556, %559 : vector<2x4x16xf32>
    %cst_284 = arith.constant 0.000000e+00 : f32
    %561 = vector.broadcast %cst_284 : f32 to vector<2x4x16xf32>
    %562 = arith.maximumf %560, %561 : vector<2x4x16xf32>
    %563 = vector.extract_strided_slice %439 {offsets = [0, 272], sizes = [2, 16], strides = [1, 1]} : vector<2x289xf32> to vector<2x16xf32>
    %564 = vector.extract_strided_slice %439 {offsets = [0, 288], sizes = [2, 1], strides = [1, 1]} : vector<2x289xf32> to vector<2x1xf32>
    %565 = vector.shape_cast %563 : vector<2x16xf32> to vector<2x1x16xf32>
    %566 = vector.broadcast %565 : vector<2x1x16xf32> to vector<2x4x16xf32>
    %567 = arith.mulf %562, %566 : vector<2x4x16xf32>
    %cst_285 = arith.constant dense<0.000000e+00> : vector<2x4xf32>
    %568 = vector.multi_reduction <add>, %567, %cst_285 [2] : vector<2x4x16xf32> to vector<2x4xf32>
    %569 = vector.broadcast %564 : vector<2x1xf32> to vector<2x4xf32>
    %570 = arith.addf %568, %569 : vector<2x4xf32>
    %c0_286 = arith.constant 0 : index
    %c0_287 = arith.constant 0 : index
    %571 = vector.load %arg30[%c0_286, %c0_287] : memref<2x4xf32, #tpu.memory_space<vmem>>, vector<2x4xf32>
    tpu.vector_store %arg30[%c0_286, %c0_287], %570 {strides = array<i32>} : memref<2x4xf32, #tpu.memory_space<vmem>>, vector<2x4xf32>,
    return
  }
}

</mosaic_0001>

<bundles_post_ra>
// kernel: _mothernet_forward_impl.1
= control target key start
LH: loop header
LB: loop body
LE: loop exit
PB: predicated region body
PF: predicated region fallthrough
CT: control target
= control target key end

     0   :  { %s5403_s6 = smov 1   ;;  %s5404_s10 = smov 2   ;;  %s6198_s0 = inlined_call_operand.smem [shape: u32[31], index: -1, kind: input, shape index: {}] }
   0x1   :  { %s5469_s5 = sld [smem:[%s6198_s0]]   ;;  %s5405_s14 = smov 3  }
   0x2   :  { %s5474_s9 = sld [smem:[%s6198_s0 + %s5403_s6]]   ;;  %s5406_s18 = smov 4  }
   0x3   :  { %s5479_s13 = sld [smem:[%s6198_s0 + %s5404_s10]]   ;;  %s5407_s22 = smov 5  }
   0x4   :  { %s5484_s17 = sld [smem:[%s6198_s0 + %s5405_s14]]   ;;  %s5408_s26 = smov 6  }
   0x5   :  { %s5489_s21 = sld [smem:[%s6198_s0 + %s5406_s18]]   ;;  %s5409_s30 = smov 7  }
   0x6   :  { %s5494_s25 = sld [smem:[%s6198_s0 + %s5407_s22]]   ;;  %s5410_s4 = smov 8  }
   0x7   :  { %s5499_s29 = sld [smem:[%s6198_s0 + %s5408_s26]]   ;;  %s5411_s10 = smov 9  }
   0x8   :  { %s5504_s3 = sld [smem:[%s6198_s0 + %s5409_s30]]   ;;  %s5412_s15 = smov 10  }
   0x9   :  { %6211 = sst [smem:[#allocation5_spill]] %s5479_s13  ;;  %s5413_s20 = smov 11  }
   0xa   :  { %s5509_s8 = sld [smem:[%s6198_s0 + %s5410_s4]]   ;;  %s5414_s26 = smov 12  }
   0xb   :  { %s5514_s14 = sld [smem:[%s6198_s0 + %s5411_s10]]   ;;  %s5415_s1 = smov 13  }
   0xc   :  { %s5519_s19 = sld [smem:[%s6198_s0 + %s5412_s15]]   ;;  %s5416_s7 = smov 14  }
   0xd   :  { %s5524_s24 = sld [smem:[%s6198_s0 + %s5413_s20]]   ;;  %s5417_s15 = smov 15  }
   0xe   :  { %s5529_s30 = sld [smem:[%s6198_s0 + %s5414_s26]]   ;;  %s5418_s22 = smov 16  }
   0xf   :  { %s5534_s6 = sld [smem:[%s6198_s0 + %s5415_s1]]   ;;  %s5419_s28 = smov 17  }
  0x10   :  { %s5539_s12 = sld [smem:[%s6198_s0 + %s5416_s7]]   ;;  %s5420_s7 = smov 18  }
  0x11   :  { %s5544_s20 = sld [smem:[%s6198_s0 + %s5417_s15]]   ;;  %s5421_s15 = smov 19  }
  0x12   :  { %s5549_s27 = sld [smem:[%s6198_s0 + %s5418_s22]]   ;;  %s5422_s22 = smov 20  }
  0x13   :  { %s5554_s4 = sld [smem:[%s6198_s0 + %s5419_s28]]   ;;  %s5423_s28 = smov 21  }
  0x14   :  { %s5559_s13 = sld [smem:[%s6198_s0 + %s5420_s7]]   ;;  %s5424_s7 = smov 22  }
  0x17   :  { %6212 = sst [smem:[#allocation6_spill]] %s5544_s20 }
  0x18   :  { %6213 = sst [smem:[#allocation7_spill]] %s5549_s27 }
  0x19   :  { %6214 = sst [smem:[#allocation8_spill]] %s5554_s4 }
  0x1a   :  { %6215 = sst [smem:[#allocation9_spill]] %s5559_s13 }
  0x1b   :  { %s5564_s20 = sld [smem:[%s6198_s0 + %s5421_s15]]   ;;  %s5425_s15 = smov 23  }
  0x1c   :  { %s5569_s27 = sld [smem:[%s6198_s0 + %s5422_s22]]   ;;  %s5426_s22 = smov 24  }
  0x1d   :  { %s5574_s4 = sld [smem:[%s6198_s0 + %s5423_s28]]   ;;  %s5427_s28 = smov 25  }
  0x1e   :  { %s5579_s13 = sld [smem:[%s6198_s0 + %s5424_s7]]   ;;  %s5428_s7 = smov 26  }
  0x21   :  { %6216 = sst [smem:[#allocation10_spill]] %s5564_s20 }
  0x22   :  { %6217 = sst [smem:[#allocation11_spill]] %s5569_s27 }
  0x23   :  { %6218 = sst [smem:[#allocation12_spill]] %s5574_s4 }
  0x24   :  { %6219 = sst [smem:[#allocation13_spill]] %s5579_s13 }
  0x25   :  { %s5584_s20 = sld [smem:[%s6198_s0 + %s5425_s15]]   ;;  %s5429_s15 = smov 27  }
  0x26   :  { %s5589_s27 = sld [smem:[%s6198_s0 + %s5426_s22]]   ;;  %s5430_s22 = smov 28  }
  0x27   :  { %s5594_s4 = sld [smem:[%s6198_s0 + %s5427_s28]]   ;;  %s5431_s28 = smov 29  }
  0x28   :  { %s5599_s13 = sld [smem:[%s6198_s0 + %s5428_s7]]   ;;  %s5432_s7 = smov 30  }
  0x2b   :  { %6220 = sst [smem:[#allocation14_spill]] %s5584_s20 }
  0x2c   :  { %6221 = sst [smem:[#allocation15_spill]] %s5589_s27 }
  0x2d   :  { %6222 = sst [smem:[#allocation16_spill]] %s5594_s4 }
  0x2e   :  { %6223 = sst [smem:[#allocation17_spill]] %s5599_s13 }
  0x2f   :  { %s5604_s20 = sld [smem:[%s6198_s0 + %s5429_s15]]  }
  0x30   :  { %s5609_s27 = sld [smem:[%s6198_s0 + %s5430_s22]]  }
  0x31   :  { %s5614_s4 = sld [smem:[%s6198_s0 + %s5431_s28]]  }
  0x32   :  { %s5619_s13 = sld [smem:[%s6198_s0 + %s5432_s7]]  }
  0x33   :  { %v134_v0 = vld [vmem:[%s5484_s17 + $0x8] sm:$0xff]  ;;  %v133_v1 = vld [vmem:[%s5484_s17] sm:$0xff]  ;;  %vm142_vm0 = vcmask 130048   ;;  %v5433_v4 = vmov 0  }
  0x34   :  { %v127_v2 = vld [vmem:[%s5469_s5] sm:$0xff]  ;;  %4861 = vmatprep.subr.mxu0 %v134_v0  ;;  %v128_v3 = vld [vmem:[%s5469_s5 + $0x8] sm:$0xff]  ;;  %5280 = vset.pattern.permute.xlu0 %v5433_v4 }
  0x35   :  { %vm129_vm1 = vcmp.ne.f32.partialorder %v127_v2, %v127_v2  ;;  %v224_v5 = vld [vmem:[%s5474_s9] sm:$0xff]  ;;  %4862 = vmatpush3.msra.mxu0 %v134_v0  ;;  %vm130_vm2 = vcmp.ne.f32.partialorder %v128_v3, %v128_v3 }
  0x36   :  { %v131_v6 = vsel %vm129_vm1, 0.0, %v127_v2  ;;  %229 = vperm.xlu0 %5280, %v224_v5  }
  0x37   :  { %66 = vsyncpa [#allocation3], 0  ;;  %4863 = vmatprep.subr.mxu0 %v133_v1  ;;  %4865 = vmatprep.mubr.msk.f32.mxu0 %vm142_vm0, %v131_v6  ;;  %v132_v7 = vsel %vm130_vm2, 0.0, %v128_v3  ;;  %v225_v8 = vld [vmem:[%s5474_s9 + $0x8] sm:$0xff]  ;;  %v259_v9 = vld [vmem:[%s5504_s3 + $0x18] sm:$0xff]  ;;  %vm267_vm3 = vcmask 261120  }
  0x38   :  { %4864 = vmatpush3.msra.mxu0 %v133_v1  ;;  %v438_v10 = vld [vmem:[%s5524_s24 + $0x18] sm:$0xff]  ;;  %v258_v11 = vld [vmem:[%s5504_s3 + $0x10] sm:$0xff]  ;;  %v257_v13 = vld [vmem:[%s5504_s3 + $0x8] sm:$0xff]  ;;  %v5434_v36 = vmov 0.0   ;;  %vm5435_vm4 = vmmov 0   ;;  %vm675_vm5 = vcmask 64512  }
  0x39   :  { %4866 = vmatmul.mubr.msk.f32.vlgmr.msra.gmra.mxu0 %vm142_vm0, %v132_v7  ;;  %4868 = vmatprep.subr.mxu0 %v259_v9  ;;  %v437_v12 = vld [vmem:[%s5524_s24 + $0x10] sm:$0xff]  ;;  %v436_v14 = vld [vmem:[%s5524_s24 + $0x8] sm:$0xff]  ;;  %v256_v15 = vld [vmem:[%s5504_s3] sm:$0xff]  ;;  %s5436_s0 = smov 16   ;;  %s6224_s5 = sld [smem:[#allocation8_spill]]  ;;  %vm1740_vm8 = vcmask 523264  }
  0x3a   :  { %234 = vperm.xlu0 %5280, %v225_v8   ;;  %4869 = vmatpush3.msra.mxu0 %v259_v9  ;;  %v435_v16 = vld [vmem:[%s5524_s24] sm:$0xff]  ;;  %v352_v17 = vld [vmem:[%s5514_s14 + $0x18] sm:$0xff]  ;;  %v351_v33 = vld [vmem:[%s5514_s14 + $0x10] sm:$0xff]  ;;  %s6225_s9 = sld [smem:[#allocation6_spill]]  ;;  %vm3740_vm13 = vcmask 1041409   ;;  %vm4423_vm14 = vcmask 125952  }
  0x3b   :  { %4890 = vmatprep.subr.mxu1 %v438_v10  ;;  %4870 = vmatprep.subr.mxu0 %v258_v11  ;;  %v4514_v19 = vld [vmem:[%s5494_s25] ss:$0 sm:$0xff]  ;;  %v350_v34 = vld [vmem:[%s5514_s14 + $0x8] sm:$0xff]  ;;  %v4542_v7 = vld [vmem:[%s5514_s14 + $0x38] sm:$0xff]  ;;  %s6226_s17 = sld [smem:[#allocation7_spill]]  ;;  %s5460_s18 = smov [#allocation2]  }
  0x3c   :  { %4891 = vmatpush3.msra.mxu1 %v438_v10  ;;  %4871 = vmatpush3.msra.mxu0 %v258_v11  ;;  %v4511_v21 = vld [vmem:[%s5489_s21] ss:$0 sm:$0xff]  ;;  %v4534_v8 = vld [vmem:[%s5504_s3 + $0x38] sm:$0xff]  ;;  %s6227_s21 = sld [smem:[#allocation10_spill]]  ;;  %s4473_s22 = sshll.u32 %s5460_s18, 4  ;;  %vm4465_vm15 = vcmask 25600   ;;  %s4474_s22 = int_to_ptr.vmem [resolvable:$true] %s4473_s22 }
  0x3d   :  { %4892 = vmatprep.subr.mxu1 %v437_v12  ;;  %4872 = vmatprep.subr.mxu0 %v257_v13  ;;  %v4515_v29 = vld [vmem:[%s5499_s29] ss:$0 sm:$0xff]  ;;  %s6228_s25 = sld [smem:[#allocation9_spill]]  ;;  %s5381_s23 = scalar_lea.vmem %s4474_s22, 32 }
  0x3e   :  { %4893 = vmatpush3.msra.mxu1 %v437_v12  ;;  %4873 = vmatpush3.msra.mxu0 %v257_v13  ;;  %v349_v35 = vld [vmem:[%s5514_s14] sm:$0xff]  ;;  %v4541_v13 = vld [vmem:[%s5514_s14 + $0x30] sm:$0xff]  ;;  %s6229_s29 = sld [smem:[#allocation11_spill]]  ;;  %p5382_p0 = scmp.ne.s32.totalorder %s4474_s22, %s5381_s23 }
  0x3f   :  { %4894 = vmatprep.subr.mxu1 %v436_v14  ;;  %4874 = vmatprep.subr.mxu0 %v256_v15  ;;  %v4522_v39 = vld [vmem:[%s5529_s30] ss:$0 sm:$0xff]  ;;  %s6230_s15 = sld [smem:[#allocation12_spill]]  ;;  %p5386_p1 = scmp.lt.s32.totalorder %s4474_s22, %s4474_s22 }
  0x40   :  { %4895 = vmatpush3.msra.mxu1 %v436_v14  ;;  %4875 = vmatpush3.msra.mxu0 %v256_v15  ;;  %v4519_v44 = vld [vmem:[%s5519_s19] ss:$0 sm:$0xff]  ;;  %v4540_v15 = vld [vmem:[%s5514_s14 + $0x28] sm:$0xff]  ;;  %s6231_s16 = sld [smem:[#allocation13_spill]]  ;;  %p5387_p2 = scmp.lt.s32.totalorder %s5381_s23, %s5381_s23 }
  0x41   :  { %4896 = vmatprep.subr.mxu1 %v435_v16  ;;  %4879 = vmatprep.subr.mxu0 %v352_v17  ;;  %v4516_v47 = vld [vmem:[%s5509_s8] ss:$0 sm:$0xff] }
  0x42   :  { %4897 = vmatpush3.msra.mxu1 %v435_v16  ;;  %p5388_p3 = por %p5387_p2, %p5386_p1 }
  0x43   :  { %4911 = vmatprep.subr.mxu1 %v5434_v36 }
  0x44   :  { %p5389_p4 = pnand %p5388_p3, %p5382_p0 }
  0xb1   :  { %v230_v18 = vpop.permute.xlu0 %229 }
  0xb2   :  { %v243_v26 = vmul.f32 %v4514_v19, %v230_v18  ;;  %v4539_v18 = vld [vmem:[%s5514_s14 + $0x20] sm:$0xff] }
  0xb5   :  { %v235_v20 = vpop.permute.xlu0 %234 }
  0xb6   :  { %v244_v22 = vmul.f32 %v4514_v19, %v235_v20  ;;  %v4532_v19 = vld [vmem:[%s5504_s3 + $0x28] sm:$0xff]  ;;  %v4531_v20 = vld [vmem:[%s5504_s3 + $0x20] sm:$0xff] }
  0xf9   :  { %v4867_v23 = vpop.f32.mrf.mxu0 }
  0xfa   :  { %v221_v24 = vadd.f32 %v4867_v23, %v4511_v21  ;;  %v4548_v23 = vld [vmem:[%s5524_s24 + $0x28] sm:$0xff] }
  0xfb   :  { %v215_v25 = vpop.f32.mrf.mxu0 }
  0xfc   :  { %v216_v27 = vadd.f32 %v4511_v21, %v215_v25  ;;  %v246_v28 = vadd.f32 %v244_v22, %v221_v24  ;;  %v4550_v21 = vld [vmem:[%s5524_s24 + $0x38] sm:$0xff]  ;;  %v4549_v22 = vld [vmem:[%s5524_s24 + $0x30] sm:$0xff]  ;;  %v4547_v24 = vld [vmem:[%s5524_s24 + $0x20] sm:$0xff] }
  0xfe   :  { %v245_v30 = vadd.f32 %v243_v26, %v216_v27  ;;  %v5644_v32 = vadd.f32 %v4515_v29, %v246_v28 }
 0x100   :  { %v5642_v31 = vadd.f32 %v4515_v29, %v245_v30  ;;  %v4544_v30 = vld [vmem:[%s5519_s19 + $0x1] ss:$0 sm:$0xff] }
 0x102   :  { %4876 = vmatprep.mubr.msk.f32.mxu0 %vm267_vm3, %v5642_v31  ;;  %4898 = vmatprep.mubr.msk.f32.mxu1 %vm267_vm3, %v5642_v31 }
 0x103   :  { %4877 = vmatmul.mubr.msk.f32.vlgmr.msra.gmra.mxu0 %vm267_vm3, %v5644_v32  ;;  %4899 = vmatmul.mubr.msk.f32.vlgmr.msra.gmra.mxu1 %vm267_vm3, %v5644_v32 }
 0x104   :  { %4880 = vmatpush3.msra.mxu0 %v352_v17  ;;  %4887 = vmatprep.mubr.msk.f32.mxu0 %vm267_vm3, %v5642_v31  ;;  %v4533_v17 = vld [vmem:[%s5504_s3 + $0x30] sm:$0xff] }
 0x105   :  { %4881 = vmatprep.subr.mxu0 %v351_v33  ;;  %4913 = vmatprep.mubr.msk.f32.mxu1 %vm5435_vm4, %v5434_v36 }
 0x106   :  { %4882 = vmatpush3.msra.mxu0 %v351_v33 }
 0x107   :  { %4883 = vmatprep.subr.mxu0 %v350_v34 }
 0x108   :  { %4884 = vmatpush3.msra.mxu0 %v350_v34 }
 0x109   :  { %4885 = vmatprep.subr.mxu0 %v349_v35 }
 0x10a   :  { %4886 = vmatpush3.msra.mxu0 %v349_v35 }
 0x10b   :  { %4888 = vmatmul.mubr.msk.f32.vlgmr.msra.gmra.mxu0 %vm267_vm3, %v5644_v32  ;;  %4901 = vmatprep.subr.mxu0 %v5434_v36 }
 0x10c   :  { %4903 = vmatprep.mubr.msk.f32.mxu0 %vm5435_vm4, %v5434_v36 }
 0x1c3   :  { %v4900_v37 = vpop.f32.mrf.mxu1  ;;  %v4878_v38 = vpop.f32.mrf.mxu0 }
 0x1c4   :  { %v346_v50 = vadd.f32 %v4878_v38, %v4516_v47  ;;  %v518_v51 = vadd.f32 %v4900_v37, %v4522_v39  ;;  %v4536_v37 = vld [vmem:[%s5509_s8 + $0x1] ss:$0 sm:$0xff] }
 0x1c5   :  { %v512_v40 = vpop.f32.mrf.mxu1  ;;  %v340_v42 = vpop.f32.mrf.mxu0 }
 0x1c6   :  { %v513_v41 = vadd.f32 %v4522_v39, %v512_v40  ;;  %v341_v48 = vadd.f32 %v4516_v47, %v340_v42 }
 0x1c8   :  { %4912 = vmatpush3.msra.mxu1 %v513_v41  ;;  %v4552_v41 = vld [vmem:[%s5529_s30 + $0x1] ss:$0 sm:$0xff] }
 0x1c9   :  { %4921 = vmatprep.subr.mxu1 %v4534_v8 }
 0x1cb   :  { %v4889_v43 = vpop.f32.mrf.mxu0 }
 0x1cc   :  { %v432_v49 = vadd.f32 %v4889_v43, %v4519_v44 }
 0x1cd   :  { %v426_v45 = vpop.f32.mrf.mxu0 }
 0x1ce   :  { %v427_v46 = vadd.f32 %v4519_v44, %v426_v45 }
 0x1d0   :  { %4902 = vmatpush3.xpose.msk.msra.mxu0 %vm142_vm0, %v427_v46 }
 0x1d1   :  { %4906 = vmatprep.subr.mxu0 %v5434_v36 }
 0x1d3   :  { %4904 = vmatmul.mubr.msk.f32.vlgmr.msra.gmra.mxu0 %vm142_vm0, %v341_v48 }
 0x1d4   :  { %4907 = vmatpush3.xpose.msk.msra.mxu0 %vm142_vm0, %v432_v49  ;;  %4908 = vmatprep.mubr.msk.f32.mxu0 %vm5435_vm4, %v5434_v36 }
 0x1d5   :  { %4916 = vmatprep.subr.mxu0 %v5434_v36 }
 0x1d7   :  { %4909 = vmatmul.mubr.msk.f32.vlgmr.msra.gmra.mxu0 %vm142_vm0, %v346_v50 }
 0x1d8   :  { %4917 = vmatpush3.msra.mxu0 %v518_v51  ;;  %4918 = vmatprep.mubr.msk.f32.mxu0 %vm5435_vm4, %v5434_v36 }
 0x1d9   :  { %4932 = vmatprep.subr.mxu0 %v4542_v7 }
 0x293   :  { %v593_v52 = vpop.f32.mrf.mxu0 }
 0x294   :  { %v673_v57 = vmul.f32 0.25, %v593_v52 }
 0x295   :  { %v4905_v53 = vpop.f32.mrf.mxu0 }
 0x296   :  { %v676_v59 = vsel %vm675_vm5, %v673_v57, -inf }
 0x297   :  { %v669_v54 = vpop.f32.mrf.mxu0 }
 0x298   :  { %v674_v55 = vmul.f32 0.25, %v669_v54 }
 0x299   :  { %v4910_v56 = vpop.f32.mrf.mxu0 }
 0x29a   :  { %v679_v58 = vsel %vm675_vm5, %v674_v55, -inf }
 0x29b   :  { %680 = vmax.xlane.f32.xlu1 %v679_v58 }
 0x29f   :  { %677 = vmax.xlane.f32.xlu1 %v676_v59 }
 0x324   :  { %v681_v60 = vpop.xlane.xlu1 %680 }
 0x325   :  { %v683_v61 = vsub.f32 %v674_v55, %v681_v60 }
 0x327   :  { %v686_v62 = vmul.f32 1.442695, %v683_v61 }
 0x328   :  { %v678_v63 = vpop.xlane.xlu1 %677 }
 0x329   :  { %5309 = vpow2.f32 %v686_v62  ;;  %v682_v0 = vsub.f32 %v673_v57, %v678_v63 }
 0x32b   :  { %v684_v1 = vmul.f32 1.442695, %v682_v0 }
 0x32d   :  { %5311 = vpow2.f32 %v684_v1 }
 0x336   :  { %v5310_v2 = vpop.eup %5309 }
 0x337   :  { %v691_v3 = vsel %vm675_vm5, %v5310_v2, 0.0 }
 0x338   :  { %692 = vadd.xlane.f32.xlu0 %v691_v3 }
 0x33a   :  { %v5312_v5 = vpop.eup %5311 }
 0x33b   :  { %v688_v6 = vsel %vm675_vm5, %v5312_v5, 0.0 }
 0x33c   :  { %689 = vadd.xlane.f32.xlu1 %v688_v6 }
 0x3c1   :  { %v693_v9 = vpop.xlane.xlu0 %692 }
 0x3c2   :  { %5313 = vrcp.f32 %v693_v9  ;;  %v1442_v9 = vld [vmem:[%s5534_s6 + $0x10] sm:$0xff] }
 0x3c5   :  { %v690_v10 = vpop.xlane.xlu1 %689 }
 0x3c6   :  { %5315 = vrcp.f32 %v690_v10  ;;  %v1441_v10 = vld [vmem:[%s5534_s6 + $0x8] sm:$0xff] }
 0x3cf   :  { %v5314_v11 = vpop.eup %5313 }
 0x3d0   :  { %v697_v12 = vmul.f32 %v5314_v11, %v5310_v2  ;;  %v1440_v11 = vld [vmem:[%s5534_s6] sm:$0xff] }
 0x3d2   :  { %4919 = vmatmul.mubr.msk.f32.vlgmr.msra.gmra.mxu0 %vm675_vm5, %v697_v12 }
 0x3d3   :  { %v5316_v14 = vpop.eup %5315  ;;  %4933 = vmatpush3.msra.mxu0 %v4542_v7  ;;  %4940 = vmatprep.mubr.msk.f32.mxu0 %vm267_vm3, %v5642_v31 }
 0x3d4   :  { %4934 = vmatprep.subr.mxu0 %v4541_v13  ;;  %v695_v16 = vmul.f32 %v5316_v14, %v5312_v5 }
 0x3d5   :  { %4935 = vmatpush3.msra.mxu0 %v4541_v13 }
 0x3d6   :  { %4936 = vmatprep.subr.mxu0 %v4540_v15  ;;  %4914 = vmatmul.mubr.msk.f32.vlgmr.msra.gmra.mxu1 %vm675_vm5, %v695_v16 }
 0x3d7   :  { %4922 = vmatpush3.msra.mxu1 %v4534_v8  ;;  %4937 = vmatpush3.msra.mxu0 %v4540_v15  ;;  %v1443_v8 = vld [vmem:[%s5534_s6 + $0x18] sm:$0xff] }
 0x3d8   :  { %4923 = vmatprep.subr.mxu1 %v4533_v17  ;;  %4929 = vmatprep.mubr.msk.f32.mxu1 %vm267_vm3, %v5642_v31 }
 0x3d9   :  { %4938 = vmatprep.subr.mxu0 %v4539_v18  ;;  %4924 = vmatpush3.msra.mxu1 %v4533_v17 }
 0x3da   :  { %4939 = vmatpush3.msra.mxu0 %v4539_v18  ;;  %4925 = vmatprep.subr.mxu1 %v4532_v19 }
 0x3db   :  { %4941 = vmatmul.mubr.msk.f32.vlgmr.msra.gmra.mxu0 %vm267_vm3, %v5644_v32  ;;  %4926 = vmatpush3.msra.mxu1 %v4532_v19 }
 0x3dc   :  { %4927 = vmatprep.subr.mxu1 %v4531_v20  ;;  %4954 = vmatprep.subr.mxu0 %v5434_v36 }
 0x3dd   :  { %4928 = vmatpush3.msra.mxu1 %v4531_v20  ;;  %4956 = vmatprep.mubr.msk.f32.mxu0 %vm5435_vm4, %v5434_v36  ;;  %v4561_v20 = vld [vmem:[%s5539_s12] ss:$0 sm:$0xff] }
 0x3de   :  { %4930 = vmatmul.mubr.msk.f32.vlgmr.msra.gmra.mxu1 %vm267_vm3, %v5644_v32  ;;  %4943 = vmatprep.subr.mxu1 %v4550_v21 }
 0x3df   :  { %4944 = vmatpush3.msra.mxu1 %v4550_v21  ;;  %4951 = vmatprep.mubr.msk.f32.mxu1 %vm267_vm3, %v5642_v31 }
 0x3e0   :  { %4945 = vmatprep.subr.mxu1 %v4549_v22 }
 0x3e1   :  { %4946 = vmatpush3.msra.mxu1 %v4549_v22 }
 0x3e2   :  { %4947 = vmatprep.subr.mxu1 %v4548_v23 }
 0x3e3   :  { %4948 = vmatpush3.msra.mxu1 %v4548_v23 }
 0x3e4   :  { %4949 = vmatprep.subr.mxu1 %v4547_v24 }
 0x3e5   :  { %4950 = vmatpush3.msra.mxu1 %v4547_v24 }
 0x3e6   :  { %4952 = vmatmul.mubr.msk.f32.vlgmr.msra.gmra.mxu1 %vm267_vm3, %v5644_v32  ;;  %4964 = vmatprep.subr.mxu1 %v5434_v36 }
 0x3e7   :  { %4966 = vmatprep.mubr.msk.f32.mxu1 %vm5435_vm4, %v5434_v36 }
 0x492   :  { %v5716_v25 = vpop.f32.mrf.mxu0 }
 0x494   :  { %v4920_v26 = vpop.f32.mrf.mxu0 }
 0x496   :  { %v5718_v27 = vpop.f32.mrf.mxu1 }
 0x498   :  { %v4915_v28 = vpop.f32.mrf.mxu1 }
 0x49b   :  { %v4942_v29 = vpop.f32.mrf.mxu0 }
 0x49c   :  { %v1017_v40 = vadd.f32 %v4942_v29, %v4544_v30 }
 0x49d   :  { %v1011_v33 = vpop.f32.mrf.mxu0 }
 0x49e   :  { %v1012_v34 = vadd.f32 %v4544_v30, %v1011_v33  ;;  %v4931_v35 = vpop.f32.mrf.mxu1 }
 0x49f   :  { %v929_v42 = vadd.f32 %v4931_v35, %v4536_v37 }
 0x4a0   :  { %4955 = vmatpush3.xpose.msk.msra.mxu0 %vm142_vm0, %v1012_v34  ;;  %v923_v38 = vpop.f32.mrf.mxu1 }
 0x4a1   :  { %v924_v39 = vadd.f32 %v4536_v37, %v923_v38  ;;  %4959 = vmatprep.subr.mxu0 %v5434_v36 }
 0x4a3   :  { %4957 = vmatmul.mubr.msk.f32.vlgmr.msra.gmra.mxu0 %vm142_vm0, %v924_v39 }
 0x4a4   :  { %4960 = vmatpush3.xpose.msk.msra.mxu0 %vm142_vm0, %v1017_v40  ;;  %4961 = vmatprep.mubr.msk.f32.mxu0 %vm5435_vm4, %v5434_v36  ;;  %v1582_v40 = vld [vmem:[%s6224_s5 + $0x18] sm:$0xff] }
 0x4a5   :  { %4969 = vmatprep.subr.mxu0 %v5434_v36 }
 0x4a6   :  { %v4953_v43 = vpop.f32.mrf.mxu1 }
 0x4a7   :  { %v1105_v44 = vadd.f32 %v4953_v43, %v4552_v41  ;;  %4962 = vmatmul.mubr.msk.f32.vlgmr.msra.gmra.mxu0 %vm142_vm0, %v929_v42  ;;  %v1580_v42 = vld [vmem:[%s6224_s5 + $0x8] sm:$0xff]  ;;  %v1579_v43 = vld [vmem:[%s6224_s5] sm:$0xff] }
 0x4a8   :  { %v1099_v45 = vpop.f32.mrf.mxu1  ;;  %4971 = vmatprep.mubr.msk.f32.mxu0 %vm5435_vm4, %v5434_v36 }
 0x4a9   :  { %v1100_v46 = vadd.f32 %v4552_v41, %v1099_v45  ;;  %4970 = vmatpush3.msra.mxu0 %v1105_v44  ;;  %v1581_v41 = vld [vmem:[%s6224_s5 + $0x10] sm:$0xff] }
 0x4aa   :  { %4985 = vmatprep.subr.mxu0 %v1582_v40 }
 0x4ab   :  { %4965 = vmatpush3.msra.mxu1 %v1100_v46 }
 0x4ac   :  { %4974 = vmatprep.subr.mxu1 %v1443_v8 }
 0x563   :  { %v1180_v47 = vpop.f32.mrf.mxu0 }
 0x564   :  { %v1260_v48 = vmul.f32 0.25, %v1180_v47 }
 0x565   :  { %v4958_v49 = vpop.f32.mrf.mxu0 }
 0x566   :  { %v1262_v50 = vsel %vm675_vm5, %v1260_v48, -inf }
 0x567   :  { %1263 = vmax.xlane.f32.xlu1 %v1262_v50  ;;  %v1256_v51 = vpop.f32.mrf.mxu0 }
 0x568   :  { %v1261_v52 = vmul.f32 0.25, %v1256_v51  ;;  %v4564_v51 = vld [vmem:[%s6225_s9] ss:$0 sm:$0xff] }
 0x569   :  { %v4963_v53 = vpop.f32.mrf.mxu0 }
 0x56a   :  { %v1265_v54 = vsel %vm675_vm5, %v1261_v52, -inf  ;;  %v4565_v53 = vld [vmem:[%s6226_s17] ss:$0 sm:$0xff] }
 0x56b   :  { %1266 = vmax.xlane.f32.xlu1 %v1265_v54 }
 0x5f0   :  { %v1264_v55 = vpop.xlane.xlu1 %1263 }
 0x5f1   :  { %v1268_v56 = vsub.f32 %v1260_v48, %v1264_v55 }
 0x5f3   :  { %v1270_v57 = vmul.f32 1.442695, %v1268_v56 }
 0x5f4   :  { %v1267_v58 = vpop.xlane.xlu1 %1266 }
 0x5f5   :  { %5317 = vpow2.f32 %v1270_v57  ;;  %v1269_v59 = vsub.f32 %v1261_v52, %v1267_v58 }
 0x5f7   :  { %v1272_v60 = vmul.f32 1.442695, %v1269_v59 }
 0x5f9   :  { %5319 = vpow2.f32 %v1272_v60  ;;  %v1732_v60 = vld [vmem:[%s6227_s21 + $0x38] sm:$0xff] }
 0x602   :  { %v5318_v61 = vpop.eup %5317 }
 0x603   :  { %v1274_v62 = vsel %vm675_vm5, %v5318_v61, 0.0 }
 0x604   :  { %1275 = vadd.xlane.f32.xlu1 %v1274_v62  ;;  %v1730_v62 = vld [vmem:[%s6227_s21 + $0x28] sm:$0xff] }
 0x606   :  { %v5320_v63 = vpop.eup %5319 }
 0x607   :  { %v1277_v0 = vsel %vm675_vm5, %v5320_v63, 0.0 }
 0x608   :  { %1278 = vadd.xlane.f32.xlu1 %v1277_v0  ;;  %v1728_v0 = vld [vmem:[%s6227_s21 + $0x18] sm:$0xff] }
 0x68d   :  { %v1276_v1 = vpop.xlane.xlu1 %1275 }
 0x68e   :  { %5321 = vrcp.f32 %v1276_v1  ;;  %v1727_v1 = vld [vmem:[%s6227_s21 + $0x10] sm:$0xff] }
 0x691   :  { %v1279_v2 = vpop.xlane.xlu1 %1278 }
 0x692   :  { %5323 = vrcp.f32 %v1279_v2  ;;  %v1726_v2 = vld [vmem:[%s6227_s21 + $0x8] sm:$0xff] }
 0x69b   :  { %v5322_v3 = vpop.eup %5321 }
 0x69c   :  { %v1281_v5 = vmul.f32 %v5322_v3, %v5318_v61  ;;  %v1731_v61 = vld [vmem:[%s6227_s21 + $0x30] sm:$0xff]  ;;  %v1725_v3 = vld [vmem:[%s6227_s21] sm:$0xff] }
 0x69e   :  { %4967 = vmatmul.mubr.msk.f32.vlgmr.msra.gmra.mxu1 %vm675_vm5, %v1281_v5  ;;  %v4566_v5 = vld [vmem:[%s6228_s25] ss:$0 sm:$0xff] }
 0x69f   :  { %v5324_v6 = vpop.eup %5323  ;;  %4975 = vmatpush3.msra.mxu1 %v1443_v8 }
 0x6a0   :  { %v1283_v7 = vmul.f32 %v5324_v6, %v5320_v63  ;;  %4976 = vmatprep.subr.mxu1 %v1442_v9  ;;  %v1729_v63 = vld [vmem:[%s6227_s21 + $0x20] sm:$0xff] }
 0x6a1   :  { %4977 = vmatpush3.msra.mxu1 %v1442_v9 }
 0x6a2   :  { %4972 = vmatmul.mubr.msk.f32.vlgmr.msra.gmra.mxu0 %vm675_vm5, %v1283_v7  ;;  %4978 = vmatprep.subr.mxu1 %v1441_v10 }
 0x6a3   :  { %4979 = vmatpush3.msra.mxu1 %v1441_v10  ;;  %4986 = vmatpush3.msra.mxu0 %v1582_v40 }
 0x6a4   :  { %4980 = vmatprep.subr.mxu1 %v1440_v11  ;;  %4987 = vmatprep.subr.mxu0 %v1581_v41 }
 0x6a5   :  { %4981 = vmatpush3.msra.mxu1 %v1440_v11  ;;  %4988 = vmatpush3.msra.mxu0 %v1581_v41 }
 0x6a6   :  { %4989 = vmatprep.subr.mxu0 %v1580_v42  ;;  %4996 = vmatprep.subr.mxu1 %v1732_v60 }
 0x6a7   :  { %4990 = vmatpush3.msra.mxu0 %v1580_v42 }
 0x6a8   :  { %4991 = vmatprep.subr.mxu0 %v1579_v43 }
 0x6a9   :  { %4992 = vmatpush3.msra.mxu0 %v1579_v43 }
 0x75e   :  { %v1353_v12 = vpop.f32.mrf.mxu1 }
 0x75f   :  { %1432 = vrot.lane.b32.xlu1 %v1353_v12, %s5436_s0 }
 0x760   :  { %v4968_v13 = vpop.f32.mrf.mxu1 }
 0x762   :  { %v1426_v14 = vpop.f32.mrf.mxu0 }
 0x763   :  { %1434 = vrot.lane.b32.xlu0 %v1426_v14, %s5436_s0 }
 0x764   :  { %v4973_v15 = vpop.f32.mrf.mxu0 }
 0x7d1   :  { %v1433_v16 = vpop.permute.xlu1 %1432 }
 0x7d2   :  { %v1438_v17 = vsel %vm142_vm0, %v5718_v27, %v1433_v16 }
 0x7d3   :  { %4982 = vmatprep.mubr.msk.f32.mxu1 %vm267_vm3, %v1438_v17 }
 0x7d5   :  { %v1435_v18 = vpop.permute.xlu0 %1434 }
 0x7d6   :  { %v1439_v19 = vsel %vm142_vm0, %v5716_v25, %v1435_v18 }
 0x7d7   :  { %4983 = vmatmul.mubr.msk.f32.vlgmr.msra.gmra.mxu1 %vm267_vm3, %v1439_v19 }
 0x7d8   :  { %4997 = vmatpush3.msra.mxu1 %v1732_v60 }
 0x7d9   :  { %4998 = vmatprep.subr.mxu1 %v1731_v61 }
 0x7da   :  { %4999 = vmatpush3.msra.mxu1 %v1731_v61 }
 0x7db   :  { %5000 = vmatprep.subr.mxu1 %v1730_v62 }
 0x7dc   :  { %5001 = vmatpush3.msra.mxu1 %v1730_v62 }
 0x7dd   :  { %5002 = vmatprep.subr.mxu1 %v1729_v63 }
 0x7de   :  { %5003 = vmatpush3.msra.mxu1 %v1729_v63  ;;  %v4569_v63 = vld [vmem:[%s6229_s29] ss:$0 sm:$0xff] }
 0x7df   :  { %5004 = vmatprep.subr.mxu1 %v1728_v0 }
 0x7e0   :  { %5005 = vmatpush3.msra.mxu1 %v1728_v0 }
 0x7e1   :  { %5006 = vmatprep.subr.mxu1 %v1727_v1 }
 0x7e2   :  { %5007 = vmatpush3.msra.mxu1 %v1727_v1 }
 0x7e3   :  { %5008 = vmatprep.subr.mxu1 %v1726_v2 }
 0x7e4   :  { %5009 = vmatpush3.msra.mxu1 %v1726_v2 }
 0x7e5   :  { %5010 = vmatprep.subr.mxu1 %v1725_v3 }
 0x7e6   :  { %5011 = vmatpush3.msra.mxu1 %v1725_v3 }
 0x897   :  { %v4984_v21 = vpop.f32.mrf.mxu1 }
 0x898   :  { %v1529_v22 = vadd.f32 %v4984_v21, %v4561_v20 }
 0x899   :  { %v1523_v23 = vpop.f32.mrf.mxu1 }
 0x89a   :  { %v1524_v24 = vadd.f32 %v4561_v20, %v1523_v23  ;;  %v1533_v26 = vadd.f32 %v1529_v22, %v5644_v32 }
 0x89c   :  { %v1539_v28 = vsel %vm267_vm3, %v1533_v26, 0.0  ;;  %v1532_v29 = vadd.f32 %v1524_v24, %v5642_v31 }
 0x89d   :  { %1540 = vadd.xlane.f32.xlu0 %v1539_v28 }
 0x89e   :  { %v1536_v27 = vsel %vm267_vm3, %v1532_v29, 0.0 }
 0x89f   :  { %1537 = vadd.xlane.f32.xlu1 %v1536_v27 }
 0x926   :  { %v1541_v25 = vpop.xlane.xlu0 %1540 }
 0x927   :  { %v1544_v30 = vmul.f32 0.03125, %v1541_v25 }
 0x928   :  { %v1538_v33 = vpop.xlane.xlu1 %1537 }
 0x929   :  { %v1543_v34 = vmul.f32 0.03125, %v1538_v33  ;;  %v1546_v35 = vsub.f32 %v1533_v26, %v1544_v30 }
 0x92b   :  { %v1545_v37 = vsub.f32 %v1532_v29, %v1543_v34  ;;  %v1548_v39 = vmul.f32 %v1546_v35, %v1546_v35 }
 0x92d   :  { %v1547_v38 = vmul.f32 %v1545_v37, %v1545_v37  ;;  %v1552_v31 = vsel %vm267_vm3, %v1548_v39, 0.0 }
 0x92f   :  { %v1549_v32 = vsel %vm267_vm3, %v1547_v38, 0.0 }
 0x930   :  { %1550 = vadd.xlane.f32.xlu1 %v1549_v32 }
 0x934   :  { %1553 = vadd.xlane.f32.xlu1 %v1552_v31 }
 0x9b9   :  { %v1551_v44 = vpop.xlane.xlu1 %1550 }
 0x9ba   :  { %v1555_v45 = vmul.f32 0.03125, %v1551_v44 }
 0x9bc   :  { %v1557_v46 = vadd.f32 1e-05, %v1555_v45 }
 0x9bd   :  { %v1554_v47 = vpop.xlane.xlu1 %1553 }
 0x9be   :  { %5325 = vrsqrt.f32 %v1557_v46  ;;  %v1556_v48 = vmul.f32 0.03125, %v1554_v47 }
 0x9c0   :  { %v1558_v49 = vadd.f32 1e-05, %v1556_v48 }
 0x9c2   :  { %5327 = vrsqrt.f32 %v1558_v49 }
 0x9cb   :  { %v5326_v50 = vpop.eup %5325 }
 0x9cc   :  { %v1561_v52 = vmul.f32 %v5326_v50, %v1545_v37 }
 0x9ce   :  { %v1569_v54 = vmul.f32 %v4564_v51, %v1561_v52 }
 0x9cf   :  { %v5328_v55 = vpop.eup %5327 }
 0x9d0   :  { %v1562_v56 = vmul.f32 %v5328_v55, %v1546_v35  ;;  %v5764_v57 = vadd.f32 %v4565_v53, %v1569_v54 }
 0x9d2   :  { %v1570_v58 = vmul.f32 %v4564_v51, %v1562_v56  ;;  %4993 = vmatprep.mubr.msk.f32.mxu0 %vm267_vm3, %v5764_v57 }
 0x9d4   :  { %v5768_v59 = vadd.f32 %v4565_v53, %v1570_v58 }
 0x9d6   :  { %4994 = vmatmul.mubr.msk.f32.vlgmr.msra.gmra.mxu0 %vm267_vm3, %v5768_v59 }
 0xa96   :  { %v4995_v6 = vpop.f32.mrf.mxu0 }
 0xa97   :  { %v1668_v7 = vadd.f32 %v4995_v6, %v4566_v5 }
 0xa98   :  { %v1662_v8 = vpop.f32.mrf.mxu0 }
 0xa99   :  { %v1674_v9 = vmul.f32 0.70710677, %v1668_v7  ;;  %v1663_v10 = vadd.f32 %v4566_v5, %v1662_v8  ;;  %v1672_v60 = vmul.f32 0.5, %v1668_v7 }
 0xa9b   :  { %v1676_v11 = vand.u32 2147483647, %v1674_v9  ;;  %v1673_v12 = vmul.f32 0.70710677, %v1663_v10  ;;  %vm1716_vm6 = vcmp.ge.f32.partialorder %v1674_v9, 0.0  ;;  %v1671_v56 = vmul.f32 0.5, %v1663_v10 }
 0xa9d   :  { %v1678_v13 = vmul.f32 0.3275911, %v1676_v11  ;;  %v1675_v14 = vand.u32 2147483647, %v1673_v12  ;;  %v1704_v18 = vsub.f32 0.0, %v1676_v11  ;;  %vm1715_vm7 = vcmp.ge.f32.partialorder %v1673_v12, 0.0 }
 0xa9f   :  { %v1680_v15 = vadd.f32 1.0, %v1678_v13  ;;  %v1677_v16 = vmul.f32 0.3275911, %v1675_v14  ;;  %v1703_v19 = vsub.f32 0.0, %v1675_v14  ;;  %v1706_v20 = vmul.f32 %v1704_v18, %v1676_v11  ;;  %v4593_v18 = vld [vmem:[%s5524_s24 + $0x58] sm:$0xff] }
 0xaa0   :  { %5037 = vmatprep.subr.mxu1 %v4593_v18 }
 0xaa1   :  { %5329 = vrcp.f32 %v1680_v15  ;;  %v1679_v17 = vadd.f32 1.0, %v1677_v16  ;;  %v1705_v22 = vmul.f32 %v1703_v19, %v1675_v14  ;;  %v1709_v24 = vmul.f32 1.442695, %v1706_v20  ;;  %v4576_v19 = vld [vmem:[%s5504_s3 + $0x50] sm:$0xff] }
 0xaa2   :  { %v4592_v20 = vld [vmem:[%s5524_s24 + $0x50] sm:$0xff] }
 0xaa3   :  { %5331 = vrcp.f32 %v1679_v17  ;;  %v1707_v27 = vmul.f32 1.442695, %v1705_v22  ;;  %v4577_v17 = vld [vmem:[%s5504_s3 + $0x58] sm:$0xff]  ;;  %v4591_v22 = vld [vmem:[%s5524_s24 + $0x48] sm:$0xff] }
 0xaa4   :  { %5333 = vpow2.f32 %v1709_v24  ;;  %5015 = vmatprep.subr.mxu0 %v4577_v17  ;;  %v4590_v24 = vld [vmem:[%s5524_s24 + $0x40] sm:$0xff] }
 0xaa5   :  { %5335 = vpow2.f32 %v1707_v27  ;;  %5016 = vmatpush3.msra.mxu0 %v4577_v17  ;;  %v4615_v17 = vld [vmem:[%s5514_s14 + $0x78] sm:$0xff] }
 0xaa6   :  { %5017 = vmatprep.subr.mxu0 %v4576_v19 }
 0xaa7   :  { %5018 = vmatpush3.msra.mxu0 %v4576_v19 }
 0xaae   :  { %v5330_v21 = vpop.eup %5329 }
 0xaaf   :  { %v1686_v23 = vmul.f32 1.0614054, %v5330_v21 }
 0xab0   :  { %v5332_v26 = vpop.eup %5331 }
 0xab1   :  { %v1688_v28 = vadd.f32 -1.4531521, %v1686_v23  ;;  %v1685_v29 = vmul.f32 1.0614054, %v5332_v26  ;;  %v5334_v43 = vpop.eup %5333  ;;  %v4574_v23 = vld [vmem:[%s5504_s3 + $0x40] sm:$0xff] }
 0xab2   :  { %v5336_v47 = vpop.eup %5335 }
 0xab3   :  { %v1690_v25 = vmul.f32 %v5330_v21, %v1688_v28  ;;  %v1687_v30 = vadd.f32 -1.4531521, %v1685_v29 }
 0xab5   :  { %v1692_v33 = vadd.f32 1.4214138, %v1690_v25  ;;  %v1689_v34 = vmul.f32 %v5332_v26, %v1687_v30 }
 0xab7   :  { %v1694_v35 = vmul.f32 %v5330_v21, %v1692_v33  ;;  %v1691_v37 = vadd.f32 1.4214138, %v1689_v34 }
 0xab9   :  { %v1696_v38 = vadd.f32 -0.28449672, %v1694_v35  ;;  %v1693_v32 = vmul.f32 %v5332_v26, %v1691_v37  ;;  %v4572_v35 = vld [vmem:[%s6230_s15] ss:$0 sm:$0xff] }
 0xabb   :  { %v1698_v39 = vmul.f32 %v5330_v21, %v1696_v38  ;;  %v1695_v31 = vadd.f32 -0.28449672, %v1693_v32 }
 0xabd   :  { %v1700_v40 = vadd.f32 0.2548296, %v1698_v39  ;;  %v1697_v41 = vmul.f32 %v5332_v26, %v1695_v31  ;;  %v4573_v31 = vld [vmem:[%s6231_s16] ss:$0 sm:$0xff] }
 0xabf   :  { %v1702_v42 = vmul.f32 %v5330_v21, %v1700_v40  ;;  %v1699_v44 = vadd.f32 0.2548296, %v1697_v41  ;;  %v4575_v21 = vld [vmem:[%s5504_s3 + $0x48] sm:$0xff] }
 0xac0   :  { %5019 = vmatprep.subr.mxu0 %v4575_v21 }
 0xac1   :  { %v1712_v45 = vmul.f32 %v5334_v43, %v1702_v42  ;;  %v1701_v46 = vmul.f32 %v5332_v26, %v1699_v44  ;;  %5020 = vmatpush3.msra.mxu0 %v4575_v21  ;;  %v4585_v26 = vld [vmem:[%s5514_s14 + $0x58] sm:$0xff]  ;;  %v4584_v43 = vld [vmem:[%s5514_s14 + $0x50] sm:$0xff]  ;;  %v4583_v44 = vld [vmem:[%s5514_s14 + $0x48] sm:$0xff] }
 0xac2   :  { %5021 = vmatprep.subr.mxu0 %v4574_v23 }
 0xac3   :  { %v1714_v48 = vsub.f32 1.0, %v1712_v45  ;;  %v1711_v49 = vmul.f32 %v5336_v47, %v1701_v46  ;;  %5022 = vmatpush3.msra.mxu0 %v4574_v23  ;;  %v4582_v45 = vld [vmem:[%s5514_s14 + $0x40] sm:$0xff] }
 0xac4   :  { %5026 = vmatprep.subr.mxu0 %v4585_v26 }
 0xac5   :  { %v1718_v50 = vsub.f32 0.0, %v1714_v48  ;;  %v1713_v51 = vsub.f32 1.0, %v1711_v49 }
 0xac7   :  { %v1720_v52 = vsel %vm1716_vm6, %v1714_v48, %v1718_v50  ;;  %v1717_v53 = vsub.f32 0.0, %v1713_v51  ;;  %v4595_v48 = vld [vmem:[%s5529_s30 + $0x2] ss:$0 sm:$0xff] }
 0xac8   :  { %v1722_v54 = vadd.f32 1.0, %v1720_v52 }
 0xac9   :  { %v1719_v55 = vsel %vm1715_vm7, %v1713_v51, %v1717_v53  ;;  %v4587_v53 = vld [vmem:[%s5519_s19 + $0x2] ss:$0 sm:$0xff] }
 0xaca   :  { %v1721_v58 = vadd.f32 1.0, %v1719_v55  ;;  %v1724_v62 = vmul.f32 %v1722_v54, %v1672_v60 }
 0xacc   :  { %v1723_v61 = vmul.f32 %v1721_v58, %v1671_v56  ;;  %v4579_v56 = vld [vmem:[%s5509_s8 + $0x2] ss:$0 sm:$0xff] }
 0xace   :  { %5012 = vmatprep.mubr.msk.f32.mxu1 %vm1740_vm8, %v1723_v61 }
 0xacf   :  { %5013 = vmatmul.mubr.msk.f32.vlgmr.msra.gmra.mxu1 %vm1740_vm8, %v1724_v62 }
 0xad0   :  { %5038 = vmatpush3.msra.mxu1 %v4593_v18 }
 0xad1   :  { %5039 = vmatprep.subr.mxu1 %v4592_v20 }
 0xad2   :  { %5040 = vmatpush3.msra.mxu1 %v4592_v20 }
 0xad3   :  { %5041 = vmatprep.subr.mxu1 %v4591_v22 }
 0xad4   :  { %5042 = vmatpush3.msra.mxu1 %v4591_v22  ;;  %v4606_v22 = vld [vmem:[%s5504_s3 + $0x70] sm:$0xff] }
 0xad5   :  { %5043 = vmatprep.subr.mxu1 %v4590_v24 }
 0xad6   :  { %5044 = vmatpush3.msra.mxu1 %v4590_v24  ;;  %v4605_v24 = vld [vmem:[%s5504_s3 + $0x68] sm:$0xff] }
 0xad7   :  { %5058 = vmatprep.subr.mxu1 %v5434_v36 }
 0xb8f   :  { %v5014_v0 = vpop.f32.mrf.mxu1 }
 0xb90   :  { %v1819_v1 = vadd.f32 %v5014_v0, %v4569_v63 }
 0xb91   :  { %v1813_v2 = vpop.f32.mrf.mxu1 }
 0xb92   :  { %v1814_v3 = vadd.f32 %v4569_v63, %v1813_v2  ;;  %v1823_v5 = vadd.f32 %v1819_v1, %v5768_v59 }
 0xb94   :  { %v1829_v6 = vsel %vm267_vm3, %v1823_v5, 0.0  ;;  %v1822_v8 = vadd.f32 %v1814_v3, %v5764_v57 }
 0xb95   :  { %1830 = vadd.xlane.f32.xlu0 %v1829_v6 }
 0xb96   :  { %v1826_v7 = vsel %vm267_vm3, %v1822_v8, 0.0 }
 0xb97   :  { %1827 = vadd.xlane.f32.xlu1 %v1826_v7 }
 0xc1e   :  { %v1831_v9 = vpop.xlane.xlu0 %1830 }
 0xc1f   :  { %v1833_v10 = vmul.f32 0.03125, %v1831_v9 }
 0xc20   :  { %v1828_v11 = vpop.xlane.xlu1 %1827 }
 0xc21   :  { %v1835_v12 = vsub.f32 %v1823_v5, %v1833_v10  ;;  %v1832_v13 = vmul.f32 0.03125, %v1828_v11 }
 0xc23   :  { %v1834_v14 = vsub.f32 %v1822_v8, %v1832_v13  ;;  %v1837_v15 = vmul.f32 %v1835_v12, %v1835_v12 }
 0xc25   :  { %v1841_v59 = vsel %vm267_vm3, %v1837_v15, 0.0  ;;  %v1836_v16 = vmul.f32 %v1834_v14, %v1834_v14 }
 0xc26   :  { %1842 = vadd.xlane.f32.xlu0 %v1841_v59 }
 0xc27   :  { %v1838_v57 = vsel %vm267_vm3, %v1836_v16, 0.0 }
 0xc28   :  { %1839 = vadd.xlane.f32.xlu1 %v1838_v57  ;;  %v4607_v57 = vld [vmem:[%s5504_s3 + $0x78] sm:$0xff] }
 0xcaf   :  { %v1843_v28 = vpop.xlane.xlu0 %1842 }
 0xcb0   :  { %v1845_v29 = vmul.f32 0.03125, %v1843_v28  ;;  %v4604_v28 = vld [vmem:[%s5504_s3 + $0x60] sm:$0xff]  ;;  %s6232_s3 = sld [smem:[#allocation15_spill]] }
 0xcb1   :  { %v1840_v27 = vpop.xlane.xlu1 %1839 }
 0xcb2   :  { %v1847_v25 = vadd.f32 1e-05, %v1845_v29  ;;  %v1844_v30 = vmul.f32 0.03125, %v1840_v27  ;;  %v4614_v29 = vld [vmem:[%s5514_s14 + $0x70] sm:$0xff]  ;;  %v4613_v27 = vld [vmem:[%s5514_s14 + $0x68] sm:$0xff] }
 0xcb4   :  { %5337 = vrsqrt.f32 %v1847_v25  ;;  %v1846_v33 = vadd.f32 1e-05, %v1844_v30  ;;  %v4623_v25 = vld [vmem:[%s5524_s24 + $0x78] sm:$0xff]  ;;  %v4612_v30 = vld [vmem:[%s5514_s14 + $0x60] sm:$0xff]  ;;  %s6234_s14 = sld [smem:[#allocation14_spill]] }
 0xcb6   :  { %5339 = vrsqrt.f32 %v1846_v33  ;;  %v4622_v33 = vld [vmem:[%s5524_s24 + $0x70] sm:$0xff] }
 0xcc1   :  { %v5338_v34 = vpop.eup %5337 }
 0xcc2   :  { %v1851_v37 = vmul.f32 %v5338_v34, %v1835_v12  ;;  %v4621_v34 = vld [vmem:[%s5524_s24 + $0x68] sm:$0xff] }
 0xcc3   :  { %v5340_v38 = vpop.eup %5339 }
 0xcc4   :  { %v1850_v32 = vmul.f32 %v5340_v38, %v1834_v14  ;;  %v1859_v39 = vmul.f32 %v4572_v35, %v1851_v37 }
 0xcc6   :  { %v1858_v40 = vmul.f32 %v4572_v35, %v1850_v32  ;;  %v5804_v42 = vadd.f32 %v4573_v31, %v1859_v39  ;;  %v4620_v35 = vld [vmem:[%s5524_s24 + $0x60] sm:$0xff]  ;;  %s6236_s24 = sld [smem:[#allocation5_spill]] }
 0xcc8   :  { %v5802_v41 = vadd.f32 %v4573_v31, %v1858_v40 }
 0xcca   :  { %5023 = vmatprep.mubr.msk.f32.mxu0 %vm267_vm3, %v5802_v41  ;;  %5045 = vmatprep.mubr.msk.f32.mxu1 %vm267_vm3, %v5802_v41 }
 0xccb   :  { %5024 = vmatmul.mubr.msk.f32.vlgmr.msra.gmra.mxu0 %vm267_vm3, %v5804_v42  ;;  %5046 = vmatmul.mubr.msk.f32.vlgmr.msra.gmra.mxu1 %vm267_vm3, %v5804_v42 }
 0xccc   :  { %5027 = vmatpush3.msra.mxu0 %v4585_v26  ;;  %5034 = vmatprep.mubr.msk.f32.mxu0 %vm267_vm3, %v5802_v41 }
 0xccd   :  { %5028 = vmatprep.subr.mxu0 %v4584_v43  ;;  %5060 = vmatprep.mubr.msk.f32.mxu1 %vm5435_vm4, %v5434_v36 }
 0xcce   :  { %5029 = vmatpush3.msra.mxu0 %v4584_v43  ;;  %v4617_v43 = vld [vmem:[%s5519_s19 + $0x3] ss:$0 sm:$0xff]  ;;  %s6235_s19 = sld [smem:[#allocation17_spill]] }
 0xccf   :  { %5030 = vmatprep.subr.mxu0 %v4583_v44 }
 0xcd0   :  { %5031 = vmatpush3.msra.mxu0 %v4583_v44 }
 0xcd1   :  { %5032 = vmatprep.subr.mxu0 %v4582_v45 }
 0xcd2   :  { %5033 = vmatpush3.msra.mxu0 %v4582_v45 }
 0xcd3   :  { %5035 = vmatmul.mubr.msk.f32.vlgmr.msra.gmra.mxu0 %vm267_vm3, %v5804_v42  ;;  %5048 = vmatprep.subr.mxu0 %v5434_v36 }
 0xcd4   :  { %5050 = vmatprep.mubr.msk.f32.mxu0 %vm5435_vm4, %v5434_v36 }
 0xd8b   :  { %v5047_v46 = vpop.f32.mrf.mxu1  ;;  %v5025_v47 = vpop.f32.mrf.mxu0 }
 0xd8c   :  { %v1959_v61 = vadd.f32 %v5025_v47, %v4579_v56  ;;  %v2135_v62 = vadd.f32 %v5047_v46, %v4595_v48  ;;  %v4609_v47 = vld [vmem:[%s5509_s8 + $0x3] ss:$0 sm:$0xff]  ;;  %s6233_s8 = sld [smem:[#allocation16_spill]] }
 0xd8d   :  { %v2129_v49 = vpop.f32.mrf.mxu1  ;;  %v1953_v51 = vpop.f32.mrf.mxu0 }
 0xd8e   :  { %v2130_v50 = vadd.f32 %v4595_v48, %v2129_v49  ;;  %v1954_v58 = vadd.f32 %v4579_v56, %v1953_v51  ;;  %v4625_v51 = vld [vmem:[%s5529_s30 + $0x3] ss:$0 sm:$0xff]  ;;  %s5453_s30 = smov 32  }
 0xd90   :  { %5059 = vmatpush3.msra.mxu1 %v2130_v50 }
 0xd91   :  { %5068 = vmatprep.subr.mxu1 %v4607_v57 }
 0xd93   :  { %v5036_v52 = vpop.f32.mrf.mxu0 }
 0xd94   :  { %v2047_v60 = vadd.f32 %v5036_v52, %v4587_v53 }
 0xd95   :  { %v2041_v54 = vpop.f32.mrf.mxu0 }
 0xd96   :  { %v2042_v55 = vadd.f32 %v4587_v53, %v2041_v54 }
 0xd98   :  { %5049 = vmatpush3.xpose.msk.msra.mxu0 %vm142_vm0, %v2042_v55 }
 0xd99   :  { %5053 = vmatprep.subr.mxu0 %v5434_v36 }
 0xd9b   :  { %5051 = vmatmul.mubr.msk.f32.vlgmr.msra.gmra.mxu0 %vm142_vm0, %v1954_v58 }
 0xd9c   :  { %5054 = vmatpush3.xpose.msk.msra.mxu0 %vm142_vm0, %v2047_v60  ;;  %5055 = vmatprep.mubr.msk.f32.mxu0 %vm5435_vm4, %v5434_v36 }
 0xd9d   :  { %5063 = vmatprep.subr.mxu0 %v5434_v36 }
 0xd9f   :  { %5056 = vmatmul.mubr.msk.f32.vlgmr.msra.gmra.mxu0 %vm142_vm0, %v1959_v61 }
 0xda0   :  { %5064 = vmatpush3.msra.mxu0 %v2135_v62  ;;  %5065 = vmatprep.mubr.msk.f32.mxu0 %vm5435_vm4, %v5434_v36 }
 0xda1   :  { %5079 = vmatprep.subr.mxu0 %v4615_v17 }
 0xe5b   :  { %v2210_v63 = vpop.f32.mrf.mxu0 }
 0xe5c   :  { %v2290_v0 = vmul.f32 0.25, %v2210_v63 }
 0xe5d   :  { %v5052_v1 = vpop.f32.mrf.mxu0 }
 0xe5e   :  { %v2292_v2 = vsel %vm675_vm5, %v2290_v0, -inf }
 0xe5f   :  { %2293 = vmax.xlane.f32.xlu0 %v2292_v2  ;;  %v2286_v3 = vpop.f32.mrf.mxu0 }
 0xe60   :  { %v2291_v5 = vmul.f32 0.25, %v2286_v3 }
 0xe61   :  { %v5057_v6 = vpop.f32.mrf.mxu0 }
 0xe62   :  { %v2295_v8 = vsel %vm675_vm5, %v2291_v5, -inf }
 0xe63   :  { %2296 = vmax.xlane.f32.xlu1 %v2295_v8 }
 0xee8   :  { %v2294_v7 = vpop.xlane.xlu0 %2293 }
 0xee9   :  { %v2298_v9 = vsub.f32 %v2290_v0, %v2294_v7 }
 0xeeb   :  { %v2300_v10 = vmul.f32 1.442695, %v2298_v9 }
 0xeec   :  { %v2297_v11 = vpop.xlane.xlu1 %2296 }
 0xeed   :  { %5341 = vpow2.f32 %v2300_v10  ;;  %v2299_v12 = vsub.f32 %v2291_v5, %v2297_v11 }
 0xeef   :  { %v2302_v13 = vmul.f32 1.442695, %v2299_v12 }
 0xef1   :  { %5343 = vpow2.f32 %v2302_v13 }
 0xefa   :  { %v5342_v14 = vpop.eup %5341 }
 0xefb   :  { %v2304_v15 = vsel %vm675_vm5, %v5342_v14, 0.0 }
 0xefc   :  { %2305 = vadd.xlane.f32.xlu0 %v2304_v15 }
 0xefe   :  { %v5344_v59 = vpop.eup %5343 }
 0xeff   :  { %v2307_v16 = vsel %vm675_vm5, %v5344_v59, 0.0 }
 0xf00   :  { %2308 = vadd.xlane.f32.xlu1 %v2307_v16 }
 0xf85   :  { %v2306_v18 = vpop.xlane.xlu0 %2305 }
 0xf86   :  { %5345 = vrcp.f32 %v2306_v18  ;;  %v4636_v18 = vld [vmem:[%s5534_s6 + $0x30] sm:$0xff] }
 0xf89   :  { %v2309_v19 = vpop.xlane.xlu1 %2308 }
 0xf8a   :  { %5347 = vrcp.f32 %v2309_v19  ;;  %v4635_v19 = vld [vmem:[%s5534_s6 + $0x28] sm:$0xff] }
 0xf93   :  { %v5346_v20 = vpop.eup %5345 }
 0xf94   :  { %v2311_v21 = vmul.f32 %v5346_v20, %v5342_v14  ;;  %v4634_v20 = vld [vmem:[%s5534_s6 + $0x20] sm:$0xff] }
 0xf96   :  { %5061 = vmatmul.mubr.msk.f32.vlgmr.msra.gmra.mxu1 %vm675_vm5, %v2311_v21 }
 0xf97   :  { %v5348_v23 = vpop.eup %5347  ;;  %5069 = vmatpush3.msra.mxu1 %v4607_v57  ;;  %5076 = vmatprep.mubr.msk.f32.mxu1 %vm267_vm3, %v5802_v41 }
 0xf98   :  { %5070 = vmatprep.subr.mxu1 %v4606_v22  ;;  %v2313_v26 = vmul.f32 %v5348_v23, %v5344_v59 }
 0xf99   :  { %5071 = vmatpush3.msra.mxu1 %v4606_v22 }
 0xf9a   :  { %5072 = vmatprep.subr.mxu1 %v4605_v24  ;;  %5066 = vmatmul.mubr.msk.f32.vlgmr.msra.gmra.mxu0 %vm675_vm5, %v2313_v26 }
 0xf9b   :  { %5073 = vmatpush3.msra.mxu1 %v4605_v24  ;;  %5080 = vmatpush3.msra.mxu0 %v4615_v17  ;;  %v4637_v17 = vld [vmem:[%s5534_s6 + $0x38] sm:$0xff]  ;;  %s5454_s6 = smov 112  }
 0xf9c   :  { %5074 = vmatprep.subr.mxu1 %v4604_v28  ;;  %5081 = vmatprep.subr.mxu0 %v4614_v29 }
 0xf9d   :  { %5087 = vmatprep.mubr.msk.f32.mxu0 %vm267_vm3, %v5802_v41  ;;  %5075 = vmatpush3.msra.mxu1 %v4604_v28 }
 0xf9e   :  { %5082 = vmatpush3.msra.mxu0 %v4614_v29  ;;  %5077 = vmatmul.mubr.msk.f32.vlgmr.msra.gmra.mxu1 %vm267_vm3, %v5804_v42 }
 0xf9f   :  { %5083 = vmatprep.subr.mxu0 %v4613_v27  ;;  %5090 = vmatprep.subr.mxu1 %v4623_v25 }
 0xfa0   :  { %5084 = vmatpush3.msra.mxu0 %v4613_v27  ;;  %5091 = vmatpush3.msra.mxu1 %v4623_v25  ;;  %v4639_v25 = vld [vmem:[%s5539_s12 + $0x1] ss:$0 sm:$0xff]  ;;  %s5455_s12 = smov 96  }
 0xfa1   :  { %5098 = vmatprep.mubr.msk.f32.mxu1 %vm267_vm3, %v5802_v41  ;;  %5085 = vmatprep.subr.mxu0 %v4612_v30 }
 0xfa2   :  { %5092 = vmatprep.subr.mxu1 %v4622_v33  ;;  %5086 = vmatpush3.msra.mxu0 %v4612_v30 }
 0xfa3   :  { %5093 = vmatpush3.msra.mxu1 %v4622_v33  ;;  %5088 = vmatmul.mubr.msk.f32.vlgmr.msra.gmra.mxu0 %vm267_vm3, %v5804_v42 }
 0xfa4   :  { %5094 = vmatprep.subr.mxu1 %v4621_v34  ;;  %5101 = vmatprep.subr.mxu0 %v5434_v36 }
 0xfa5   :  { %5095 = vmatpush3.msra.mxu1 %v4621_v34  ;;  %5103 = vmatprep.mubr.msk.f32.mxu0 %vm5435_vm4, %v5434_v36 }
 0xfa6   :  { %5096 = vmatprep.subr.mxu1 %v4620_v35 }
 0xfa7   :  { %5097 = vmatpush3.msra.mxu1 %v4620_v35 }
 0xfa8   :  { %5099 = vmatmul.mubr.msk.f32.vlgmr.msra.gmra.mxu1 %vm267_vm3, %v5804_v42  ;;  %5111 = vmatprep.subr.mxu1 %v5434_v36 }
 0xfa9   :  { %5113 = vmatprep.mubr.msk.f32.mxu1 %vm5435_vm4, %v5434_v36 }
0x1056   :  { %v5875_v37 = vpop.f32.mrf.mxu1 }
0x1058   :  { %v5062_v38 = vpop.f32.mrf.mxu1 }
0x105a   :  { %v5877_v32 = vpop.f32.mrf.mxu0 }
0x105c   :  { %v5067_v39 = vpop.f32.mrf.mxu0 }
0x105e   :  { %v5078_v31 = vpop.f32.mrf.mxu1 }
0x105f   :  { %v2545_v54 = vadd.f32 %v5078_v31, %v4609_v47 }
0x1060   :  { %v2539_v45 = vpop.f32.mrf.mxu1 }
0x1061   :  { %v2540_v49 = vadd.f32 %v4609_v47, %v2539_v45 }
0x1063   :  { %v5089_v40 = vpop.f32.mrf.mxu0 }
0x1064   :  { %v2633_v50 = vadd.f32 %v5089_v40, %v4617_v43 }
0x1065   :  { %v2627_v44 = vpop.f32.mrf.mxu0 }
0x1066   :  { %v2628_v46 = vadd.f32 %v4617_v43, %v2627_v44 }
0x1068   :  { %v5100_v48 = vpop.f32.mrf.mxu1  ;;  %5102 = vmatpush3.xpose.msk.msra.mxu0 %vm142_vm0, %v2628_v46 }
0x1069   :  { %5106 = vmatprep.subr.mxu0 %v5434_v36  ;;  %v2721_v55 = vadd.f32 %v5100_v48, %v4625_v51 }
0x106a   :  { %v2715_v52 = vpop.f32.mrf.mxu1 }
0x106b   :  { %v2716_v53 = vadd.f32 %v4625_v51, %v2715_v52  ;;  %5104 = vmatmul.mubr.msk.f32.vlgmr.msra.gmra.mxu0 %vm142_vm0, %v2540_v49  ;;  %v4649_v49 = vld [vmem:[%s6224_s5 + $0x38] sm:$0xff]  ;;  %v4647_v51 = vld [vmem:[%s6224_s5 + $0x28] sm:$0xff]  ;;  %v4646_v52 = vld [vmem:[%s6224_s5 + $0x20] sm:$0xff] }
0x106c   :  { %5107 = vmatpush3.xpose.msk.msra.mxu0 %vm142_vm0, %v2633_v50  ;;  %5108 = vmatprep.mubr.msk.f32.mxu0 %vm5435_vm4, %v5434_v36  ;;  %v4648_v50 = vld [vmem:[%s6224_s5 + $0x30] sm:$0xff] }
0x106d   :  { %5112 = vmatpush3.msra.mxu1 %v2716_v53  ;;  %5116 = vmatprep.subr.mxu0 %v5434_v36 }
0x106e   :  { %5121 = vmatprep.subr.mxu1 %v4637_v17 }
0x106f   :  { %5109 = vmatmul.mubr.msk.f32.vlgmr.msra.gmra.mxu0 %vm142_vm0, %v2545_v54 }
0x1070   :  { %5117 = vmatpush3.msra.mxu0 %v2721_v55  ;;  %5118 = vmatprep.mubr.msk.f32.mxu0 %vm5435_vm4, %v5434_v36 }
0x1071   :  { %5132 = vmatprep.subr.mxu0 %v4649_v49 }
0x112b   :  { %v2796_v56 = vpop.f32.mrf.mxu0 }
0x112c   :  { %v2876_v58 = vmul.f32 0.25, %v2796_v56 }
0x112d   :  { %v5105_v60 = vpop.f32.mrf.mxu0 }
0x112e   :  { %v2878_v61 = vsel %vm675_vm5, %v2876_v58, -inf }
0x112f   :  { %2879 = vmax.xlane.f32.xlu1 %v2878_v61  ;;  %v2872_v62 = vpop.f32.mrf.mxu0 }
0x1130   :  { %v2877_v63 = vmul.f32 0.25, %v2872_v62  ;;  %v4644_v62 = vld [vmem:[%s6225_s9 + $0x1] ss:$0 sm:$0xff] }
0x1131   :  { %v5110_v0 = vpop.f32.mrf.mxu0 }
0x1132   :  { %v2881_v1 = vsel %vm675_vm5, %v2877_v63, -inf }
0x1133   :  { %2882 = vmax.xlane.f32.xlu0 %v2881_v1 }
0x11b8   :  { %v2880_v2 = vpop.xlane.xlu1 %2879 }
0x11b9   :  { %v2884_v3 = vsub.f32 %v2876_v58, %v2880_v2 }
0x11bb   :  { %v2886_v5 = vmul.f32 1.442695, %v2884_v3  ;;  %v4645_v3 = vld [vmem:[%s6226_s17 + $0x1] ss:$0 sm:$0xff] }
0x11bc   :  { %v2883_v6 = vpop.xlane.xlu0 %2882 }
0x11bd   :  { %5349 = vpow2.f32 %v2886_v5  ;;  %v2885_v8 = vsub.f32 %v2877_v63, %v2883_v6 }
0x11bf   :  { %v2888_v7 = vmul.f32 1.442695, %v2885_v8 }
0x11c1   :  { %5351 = vpow2.f32 %v2888_v7  ;;  %v4661_v7 = vld [vmem:[%s6227_s21 + $0x78] sm:$0xff] }
0x11ca   :  { %v5350_v9 = vpop.eup %5349 }
0x11cb   :  { %v2890_v10 = vsel %vm675_vm5, %v5350_v9, 0.0 }
0x11cc   :  { %2891 = vadd.xlane.f32.xlu1 %v2890_v10  ;;  %v4659_v10 = vld [vmem:[%s6227_s21 + $0x68] sm:$0xff] }
0x11ce   :  { %v5352_v11 = vpop.eup %5351 }
0x11cf   :  { %v2893_v12 = vsel %vm675_vm5, %v5352_v11, 0.0 }
0x11d0   :  { %2894 = vadd.xlane.f32.xlu0 %v2893_v12  ;;  %v4657_v12 = vld [vmem:[%s6227_s21 + $0x58] sm:$0xff] }
0x1255   :  { %v2892_v13 = vpop.xlane.xlu1 %2891 }
0x1256   :  { %5353 = vrcp.f32 %v2892_v13  ;;  %v4656_v13 = vld [vmem:[%s6227_s21 + $0x50] sm:$0xff] }
0x1259   :  { %v2895_v14 = vpop.xlane.xlu0 %2894 }
0x125a   :  { %5355 = vrcp.f32 %v2895_v14  ;;  %v4655_v14 = vld [vmem:[%s6227_s21 + $0x48] sm:$0xff] }
0x1263   :  { %v5354_v15 = vpop.eup %5353 }
0x1264   :  { %v2897_v59 = vmul.f32 %v5354_v15, %v5350_v9  ;;  %v4660_v9 = vld [vmem:[%s6227_s21 + $0x70] sm:$0xff]  ;;  %v4654_v15 = vld [vmem:[%s6227_s21 + $0x40] sm:$0xff] }
0x1266   :  { %5114 = vmatmul.mubr.msk.f32.vlgmr.msra.gmra.mxu1 %vm675_vm5, %v2897_v59  ;;  %v4651_v59 = vld [vmem:[%s6228_s25 + $0x1] ss:$0 sm:$0xff] }
0x1267   :  { %v5356_v16 = vpop.eup %5355  ;;  %5122 = vmatpush3.msra.mxu1 %v4637_v17 }
0x1268   :  { %v2899_v57 = vmul.f32 %v5356_v16, %v5352_v11  ;;  %5123 = vmatprep.subr.mxu1 %v4636_v18  ;;  %v4658_v11 = vld [vmem:[%s6227_s21 + $0x60] sm:$0xff] }
0x1269   :  { %5124 = vmatpush3.msra.mxu1 %v4636_v18 }
0x126a   :  { %5119 = vmatmul.mubr.msk.f32.vlgmr.msra.gmra.mxu0 %vm675_vm5, %v2899_v57  ;;  %5125 = vmatprep.subr.mxu1 %v4635_v19 }
0x126b   :  { %5126 = vmatpush3.msra.mxu1 %v4635_v19  ;;  %5133 = vmatpush3.msra.mxu0 %v4649_v49 }
0x126c   :  { %5127 = vmatprep.subr.mxu1 %v4634_v20  ;;  %5134 = vmatprep.subr.mxu0 %v4648_v50 }
0x126d   :  { %5128 = vmatpush3.msra.mxu1 %v4634_v20  ;;  %5135 = vmatpush3.msra.mxu0 %v4648_v50 }
0x126e   :  { %5136 = vmatprep.subr.mxu0 %v4647_v51  ;;  %5143 = vmatprep.subr.mxu1 %v4661_v7 }
0x126f   :  { %5137 = vmatpush3.msra.mxu0 %v4647_v51 }
0x1270   :  { %5138 = vmatprep.subr.mxu0 %v4646_v52 }
0x1271   :  { %5139 = vmatpush3.msra.mxu0 %v4646_v52 }
0x1326   :  { %v2969_v21 = vpop.f32.mrf.mxu1 }
0x1327   :  { %3048 = vrot.lane.b32.xlu1 %v2969_v21, %s5436_s0 }
0x1328   :  { %v5115_v22 = vpop.f32.mrf.mxu1 }
0x132a   :  { %v3042_v23 = vpop.f32.mrf.mxu0 }
0x132b   :  { %3050 = vrot.lane.b32.xlu0 %v3042_v23, %s5436_s0 }
0x132c   :  { %v5120_v24 = vpop.f32.mrf.mxu0 }
0x1399   :  { %v3049_v26 = vpop.permute.xlu1 %3048 }
0x139a   :  { %v3054_v28 = vsel %vm142_vm0, %v5875_v37, %v3049_v26 }
0x139b   :  { %5129 = vmatprep.mubr.msk.f32.mxu1 %vm267_vm3, %v3054_v28 }
0x139d   :  { %v3051_v29 = vpop.permute.xlu0 %3050 }
0x139e   :  { %v3055_v27 = vsel %vm142_vm0, %v5877_v32, %v3051_v29 }
0x139f   :  { %5130 = vmatmul.mubr.msk.f32.vlgmr.msra.gmra.mxu1 %vm267_vm3, %v3055_v27 }
0x13a0   :  { %5144 = vmatpush3.msra.mxu1 %v4661_v7 }
0x13a1   :  { %5145 = vmatprep.subr.mxu1 %v4660_v9 }
0x13a2   :  { %5146 = vmatpush3.msra.mxu1 %v4660_v9 }
0x13a3   :  { %5147 = vmatprep.subr.mxu1 %v4659_v10 }
0x13a4   :  { %5148 = vmatpush3.msra.mxu1 %v4659_v10 }
0x13a5   :  { %5149 = vmatprep.subr.mxu1 %v4658_v11 }
0x13a6   :  { %5150 = vmatpush3.msra.mxu1 %v4658_v11  ;;  %v4663_v11 = vld [vmem:[%s6229_s29 + $0x1] ss:$0 sm:$0xff] }
0x13a7   :  { %5151 = vmatprep.subr.mxu1 %v4657_v12 }
0x13a8   :  { %5152 = vmatpush3.msra.mxu1 %v4657_v12 }
0x13a9   :  { %5153 = vmatprep.subr.mxu1 %v4656_v13 }
0x13aa   :  { %5154 = vmatpush3.msra.mxu1 %v4656_v13 }
0x13ab   :  { %5155 = vmatprep.subr.mxu1 %v4655_v14 }
0x13ac   :  { %5156 = vmatpush3.msra.mxu1 %v4655_v14 }
0x13ad   :  { %5157 = vmatprep.subr.mxu1 %v4654_v15 }
0x13ae   :  { %5158 = vmatpush3.msra.mxu1 %v4654_v15 }
0x13af   :  { %5184 = vmatprep.subr.mxu1 %v5434_v36 }
0x145f   :  { %v5131_v30 = vpop.f32.mrf.mxu1 }
0x1460   :  { %v3147_v33 = vadd.f32 %v5131_v30, %v4639_v25 }
0x1461   :  { %v3141_v34 = vpop.f32.mrf.mxu1 }
0x1462   :  { %v3142_v35 = vadd.f32 %v4639_v25, %v3141_v34  ;;  %v3151_v38 = vadd.f32 %v3147_v33, %v5804_v42 }
0x1464   :  { %v3159_v39 = vsel %vm267_vm3, %v3151_v38, 0.0  ;;  %v3150_v31 = vadd.f32 %v3142_v35, %v5802_v41 }
0x1465   :  { %3160 = vadd.xlane.f32.xlu0 %v3159_v39 }
0x1466   :  { %v3156_v37 = vsel %vm267_vm3, %v3150_v31, 0.0 }
0x1467   :  { %3157 = vadd.xlane.f32.xlu1 %v3156_v37 }
0x14ee   :  { %v3161_v32 = vpop.xlane.xlu0 %3160 }
0x14ef   :  { %v3163_v40 = vmul.f32 0.03125, %v3161_v32 }
0x14f0   :  { %v3158_v43 = vpop.xlane.xlu1 %3157 }
0x14f1   :  { %v3165_v44 = vsub.f32 %v3151_v38, %v3163_v40  ;;  %v3162_v45 = vmul.f32 0.03125, %v3158_v43 }
0x14f3   :  { %v3164_v46 = vsub.f32 %v3150_v31, %v3162_v45  ;;  %v3167_v47 = vmul.f32 %v3165_v44, %v3165_v44 }
0x14f5   :  { %v3171_v42 = vsel %vm267_vm3, %v3167_v47, 0.0  ;;  %v3166_v48 = vmul.f32 %v3164_v46, %v3164_v46 }
0x14f6   :  { %3172 = vadd.xlane.f32.xlu0 %v3171_v42 }
0x14f7   :  { %v3168_v41 = vsel %vm267_vm3, %v3166_v48, 0.0 }
0x14f8   :  { %3169 = vadd.xlane.f32.xlu1 %v3168_v41 }
0x157f   :  { %v3173_v53 = vpop.xlane.xlu0 %3172 }
0x1580   :  { %v3175_v54 = vmul.f32 0.03125, %v3173_v53 }
0x1581   :  { %v3170_v55 = vpop.xlane.xlu1 %3169 }
0x1582   :  { %v3177_v56 = vadd.f32 1e-05, %v3175_v54  ;;  %v3174_v58 = vmul.f32 0.03125, %v3170_v55 }
0x1584   :  { %5357 = vrsqrt.f32 %v3177_v56  ;;  %v3176_v60 = vadd.f32 1e-05, %v3174_v58 }
0x1586   :  { %5359 = vrsqrt.f32 %v3176_v60 }
0x1591   :  { %v5358_v61 = vpop.eup %5357 }
0x1592   :  { %v3181_v63 = vmul.f32 %v5358_v61, %v3165_v44 }
0x1593   :  { %v5360_v0 = vpop.eup %5359 }
0x1594   :  { %v3180_v1 = vmul.f32 %v5360_v0, %v3164_v46  ;;  %v3189_v2 = vmul.f32 %v4644_v62, %v3181_v63 }
0x1596   :  { %v3188_v5 = vmul.f32 %v4644_v62, %v3180_v1  ;;  %v5925_v8 = vadd.f32 %v4645_v3, %v3189_v2 }
0x1598   :  { %v5923_v6 = vadd.f32 %v4645_v3, %v3188_v5 }
0x159a   :  { %5140 = vmatprep.mubr.msk.f32.mxu0 %vm267_vm3, %v5923_v6 }
0x159b   :  { %5141 = vmatmul.mubr.msk.f32.vlgmr.msra.gmra.mxu0 %vm267_vm3, %v5925_v8 }
0x165b   :  { %v5142_v16 = vpop.f32.mrf.mxu0 }
0x165c   :  { %v3289_v57 = vadd.f32 %v5142_v16, %v4651_v59 }
0x165d   :  { %v3283_v17 = vpop.f32.mrf.mxu0 }
0x165e   :  { %v3295_v18 = vmul.f32 0.70710677, %v3289_v57  ;;  %v3284_v19 = vadd.f32 %v4651_v59, %v3283_v17  ;;  %v3293_v7 = vmul.f32 0.5, %v3289_v57 }
0x1660   :  { %v3297_v20 = vand.u32 2147483647, %v3295_v18  ;;  %v3294_v21 = vmul.f32 0.70710677, %v3284_v19  ;;  %vm3337_vm9 = vcmp.ge.f32.partialorder %v3295_v18, 0.0  ;;  %v3292_v3 = vmul.f32 0.5, %v3284_v19 }
0x1662   :  { %v3299_v22 = vmul.f32 0.3275911, %v3297_v20  ;;  %v3296_v23 = vand.u32 2147483647, %v3294_v21  ;;  %v3325_v29 = vsub.f32 0.0, %v3297_v20  ;;  %vm3336_vm10 = vcmp.ge.f32.partialorder %v3294_v21, 0.0 }
0x1664   :  { %v3301_v24 = vadd.f32 1.0, %v3299_v22  ;;  %v3298_v26 = vmul.f32 0.3275911, %v3296_v23  ;;  %v3324_v27 = vsub.f32 0.0, %v3296_v23  ;;  %v3327_v25 = vmul.f32 %v3325_v29, %v3297_v20  ;;  %v3494_v29 = vld [vmem:[%s6232_s3 + $0x10] sm:$0xff] }
0x1666   :  { %5361 = vrcp.f32 %v3301_v24  ;;  %v3300_v28 = vadd.f32 1.0, %v3298_v26  ;;  %v3326_v33 = vmul.f32 %v3324_v27, %v3296_v23  ;;  %v3330_v35 = vmul.f32 1.442695, %v3327_v25  ;;  %v3493_v27 = vld [vmem:[%s6232_s3 + $0x8] sm:$0xff]  ;;  %v3492_v25 = vld [vmem:[%s6232_s3] sm:$0xff] }
0x1668   :  { %5363 = vrcp.f32 %v3300_v28  ;;  %v3328_v37 = vmul.f32 1.442695, %v3326_v33  ;;  %v3495_v28 = vld [vmem:[%s6232_s3 + $0x18] sm:$0xff] }
0x1669   :  { %5365 = vpow2.f32 %v3330_v35  ;;  %5162 = vmatprep.subr.mxu0 %v3495_v28 }
0x166a   :  { %5367 = vpow2.f32 %v3328_v37  ;;  %5163 = vmatpush3.msra.mxu0 %v3495_v28 }
0x166b   :  { %5164 = vmatprep.subr.mxu0 %v3494_v29 }
0x166c   :  { %5165 = vmatpush3.msra.mxu0 %v3494_v29 }
0x166d   :  { %5166 = vmatprep.subr.mxu0 %v3493_v27 }
0x166e   :  { %5167 = vmatpush3.msra.mxu0 %v3493_v27 }
0x166f   :  { %5168 = vmatprep.subr.mxu0 %v3492_v25 }
0x1670   :  { %5169 = vmatpush3.msra.mxu0 %v3492_v25 }
0x1673   :  { %v5362_v30 = vpop.eup %5361 }
0x1674   :  { %v3307_v34 = vmul.f32 1.0614054, %v5362_v30 }
0x1675   :  { %v5364_v38 = vpop.eup %5363 }
0x1676   :  { %v3309_v39 = vadd.f32 -1.4531521, %v3307_v34  ;;  %v3306_v31 = vmul.f32 1.0614054, %v5364_v38  ;;  %v5366_v52 = vpop.eup %5365 }
0x1677   :  { %v5368_v56 = vpop.eup %5367 }
0x1678   :  { %v3311_v32 = vmul.f32 %v5362_v30, %v3309_v39  ;;  %v3308_v40 = vadd.f32 -1.4531521, %v3306_v31 }
0x167a   :  { %v3313_v43 = vadd.f32 1.4214138, %v3311_v32  ;;  %v3310_v44 = vmul.f32 %v5364_v38, %v3308_v40  ;;  %v4668_v32 = vld [vmem:[%s6230_s15 + $0x1] ss:$0 sm:$0xff] }
0x167c   :  { %v3315_v45 = vmul.f32 %v5362_v30, %v3313_v43  ;;  %v3312_v46 = vadd.f32 1.4214138, %v3310_v44 }
0x167e   :  { %v3317_v47 = vadd.f32 -0.28449672, %v3315_v45  ;;  %v3314_v42 = vmul.f32 %v5364_v38, %v3312_v46  ;;  %v4669_v46 = vld [vmem:[%s6231_s16 + $0x1] ss:$0 sm:$0xff] }
0x1680   :  { %v3319_v48 = vmul.f32 %v5362_v30, %v3317_v47  ;;  %v3316_v41 = vadd.f32 -0.28449672, %v3314_v42 }
0x1682   :  { %v3321_v49 = vadd.f32 0.2548296, %v3319_v48  ;;  %v3318_v50 = vmul.f32 %v5364_v38, %v3316_v41  ;;  %v3579_v41 = vld [vmem:[%s6233_s8 + $0x10] sm:$0xff] }
0x1684   :  { %v3323_v51 = vmul.f32 %v5362_v30, %v3321_v49  ;;  %v3320_v53 = vadd.f32 0.2548296, %v3318_v50  ;;  %v3580_v30 = vld [vmem:[%s6233_s8 + $0x18] sm:$0xff]  ;;  %v3578_v49 = vld [vmem:[%s6233_s8 + $0x8] sm:$0xff]  ;;  %v3577_v50 = vld [vmem:[%s6233_s8] sm:$0xff] }
0x1685   :  { %5173 = vmatprep.subr.mxu0 %v3580_v30 }
0x1686   :  { %v3333_v54 = vmul.f32 %v5366_v52, %v3323_v51  ;;  %v3322_v55 = vmul.f32 %v5364_v38, %v3320_v53  ;;  %v4674_v51 = vld [vmem:[%s6234_s14] ss:$0 sm:$0xff] }
0x1688   :  { %v3335_v58 = vsub.f32 1.0, %v3333_v54  ;;  %v3332_v60 = vmul.f32 %v5368_v56, %v3322_v55 }
0x168a   :  { %v3339_v61 = vsub.f32 0.0, %v3335_v58  ;;  %v3334_v62 = vsub.f32 1.0, %v3332_v60  ;;  %v3730_v60 = vld [vmem:[%s6235_s19 + $0x38] sm:$0xff] }
0x168c   :  { %v3341_v63 = vsel %vm3337_vm9, %v3335_v58, %v3339_v61  ;;  %v3338_v0 = vsub.f32 0.0, %v3334_v62  ;;  %v3729_v61 = vld [vmem:[%s6235_s19 + $0x30] sm:$0xff] }
0x168d   :  { %v3343_v1 = vadd.f32 1.0, %v3341_v63  ;;  %v3727_v63 = vld [vmem:[%s6235_s19 + $0x20] sm:$0xff] }
0x168e   :  { %v3340_v2 = vsel %vm3336_vm10, %v3334_v62, %v3338_v0  ;;  %v3728_v62 = vld [vmem:[%s6235_s19 + $0x28] sm:$0xff]  ;;  %v3726_v0 = vld [vmem:[%s6235_s19 + $0x18] sm:$0xff] }
0x168f   :  { %v3342_v5 = vadd.f32 1.0, %v3340_v2  ;;  %v3345_v10 = vmul.f32 %v3343_v1, %v3293_v7  ;;  %v3725_v1 = vld [vmem:[%s6235_s19 + $0x10] sm:$0xff]  ;;  %v3724_v2 = vld [vmem:[%s6235_s19 + $0x8] sm:$0xff] }
0x1690   :  { %v3837_v7 = vld [vmem:[%s5609_s27 + $0xb0] sm:$0xff] }
0x1691   :  { %v3344_v9 = vmul.f32 %v3342_v5, %v3292_v3  ;;  %v3723_v3 = vld [vmem:[%s6235_s19] sm:$0xff] }
0x1692   :  { %v4000_v5 = vld [vmem:[%s6236_s24] sm:$0xf] }
0x1693   :  { %5159 = vmatprep.mubr.msk.f32.mxu1 %vm1740_vm8, %v3344_v9  ;;  %v3836_v9 = vld [vmem:[%s5609_s27 + $0xa8] sm:$0xff]  ;;  %vm4002_vm11 = vcmp.ne.f32.partialorder %v4000_v5, %v4000_v5 }
0x1694   :  { %5160 = vmatmul.mubr.msk.f32.vlgmr.msra.gmra.mxu1 %vm1740_vm8, %v3345_v10  ;;  %v5437_v10 = vmov 1  }
0x1695   :  { %5200 = vmatprep.mubr.msk.f32.mxu1 %vm5435_vm4, %v5434_v36  ;;  %5185 = vmatpush3.msra.mxu1 %v3730_v60 }
0x1696   :  { %5186 = vmatprep.subr.mxu1 %v5434_v36  ;;  %5281 = vset.pattern.permute.xlu1 %v5437_v10 }
0x1697   :  { %5187 = vmatpush3.msra.mxu1 %v3729_v61  ;;  %5282 = vset.pattern.permute.xlu0 %v5437_v10 }
0x1698   :  { %5188 = vmatprep.subr.mxu1 %v5434_v36 }
0x1699   :  { %5189 = vmatpush3.msra.mxu1 %v3728_v62 }
0x169a   :  { %5190 = vmatprep.subr.mxu1 %v5434_v36 }
0x169b   :  { %5191 = vmatpush3.msra.mxu1 %v3727_v63 }
0x169c   :  { %5192 = vmatprep.subr.mxu1 %v5434_v36 }
0x169d   :  { %5193 = vmatpush3.msra.mxu1 %v3726_v0 }
0x169e   :  { %5194 = vmatprep.subr.mxu1 %v5434_v36 }
0x169f   :  { %5195 = vmatpush3.msra.mxu1 %v3725_v1 }
0x16a0   :  { %5196 = vmatprep.subr.mxu1 %v5434_v36 }
0x16a1   :  { %5197 = vmatpush3.msra.mxu1 %v3724_v2 }
0x16a2   :  { %5198 = vmatprep.subr.mxu1 %v5434_v36 }
0x16a3   :  { %5199 = vmatpush3.msra.mxu1 %v3723_v3 }
0x16a4   :  { %5203 = vmatprep.subr.mxu1 %v5434_v36 }
0x1754   :  { %v5161_v12 = vpop.f32.mrf.mxu1 }
0x1755   :  { %v3441_v13 = vadd.f32 %v5161_v12, %v4663_v11  ;;  %v3834_v12 = vld [vmem:[%s5609_s27 + $0x98] sm:$0xff] }
0x1756   :  { %v3435_v14 = vpop.f32.mrf.mxu1 }
0x1757   :  { %v3436_v15 = vadd.f32 %v4663_v11, %v3435_v14  ;;  %v3445_v59 = vadd.f32 %v3441_v13, %v5925_v8  ;;  %v4001_v11 = vld [vmem:[%s6236_s24 + $0x4] sm:$0xf]  ;;  %v5991_v13 = vsel %vm4002_vm11, 0.0, %v4000_v5  ;;  %v3833_v14 = vld [vmem:[%s5609_s27 + $0x90] sm:$0xff] }
0x1758   :  { %vm4003_vm12 = vcmp.ne.f32.partialorder %v4001_v11, %v4001_v11 }
0x1759   :  { %v3453_v16 = vsel %vm267_vm3, %v3445_v59, 0.0  ;;  %v3444_v57 = vadd.f32 %v3436_v15, %v5923_v6  ;;  %v5995_v15 = vsel %vm4003_vm12, 0.0, %v4001_v11 }
0x175a   :  { %3454 = vadd.xlane.f32.xlu0 %v3453_v16  ;;  %v3830_v16 = vld [vmem:[%s5609_s27 + $0x78] sm:$0xff] }
0x175b   :  { %v3450_v17 = vsel %vm267_vm3, %v3444_v57, 0.0 }
0x175c   :  { %3451 = vadd.xlane.f32.xlu1 %v3450_v17  ;;  %v3827_v17 = vld [vmem:[%s5609_s27 + $0x60] sm:$0xff] }
0x17e3   :  { %v3455_v18 = vpop.xlane.xlu0 %3454 }
0x17e4   :  { %v3457_v19 = vmul.f32 0.03125, %v3455_v18  ;;  %v5438_v18 = vmov 2  }
0x17e5   :  { %v3452_v20 = vpop.xlane.xlu1 %3451 }
0x17e6   :  { %v3459_v21 = vsub.f32 %v3445_v59, %v3457_v19  ;;  %v3456_v22 = vmul.f32 0.03125, %v3452_v20  ;;  %v3831_v59 = vld [vmem:[%s5609_s27 + $0x80] sm:$0xff]  ;;  %v3825_v19 = vld [vmem:[%s5609_s27 + $0x50] sm:$0xff]  ;;  %v3824_v20 = vld [vmem:[%s5609_s27 + $0x48] sm:$0xff] }
0x17e8   :  { %v3458_v23 = vsub.f32 %v3444_v57, %v3456_v22  ;;  %v3461_v24 = vmul.f32 %v3459_v21, %v3459_v21  ;;  %v3828_v57 = vld [vmem:[%s5609_s27 + $0x68] sm:$0xff]  ;;  %v5439_v22 = vmov 3  }
0x17ea   :  { %v3465_v8 = vsel %vm267_vm3, %v3461_v24, 0.0  ;;  %v3460_v26 = vmul.f32 %v3458_v23, %v3458_v23 }
0x17eb   :  { %3466 = vadd.xlane.f32.xlu0 %v3465_v8 }
0x17ec   :  { %v3462_v6 = vsel %vm267_vm3, %v3460_v26, 0.0 }
0x17ed   :  { %3463 = vadd.xlane.f32.xlu1 %v3462_v6 }
0x1874   :  { %v3467_v33 = vpop.xlane.xlu0 %3466 }
0x1875   :  { %v3469_v34 = vmul.f32 0.03125, %v3467_v33 }
0x1876   :  { %v3464_v35 = vpop.xlane.xlu1 %3463 }
0x1877   :  { %v3471_v38 = vadd.f32 1e-05, %v3469_v34  ;;  %v3468_v39 = vmul.f32 0.03125, %v3464_v35 }
0x1879   :  { %5369 = vrsqrt.f32 %v3471_v38  ;;  %v3470_v31 = vadd.f32 1e-05, %v3468_v39 }
0x187b   :  { %5371 = vrsqrt.f32 %v3470_v31 }
0x1886   :  { %v5370_v37 = vpop.eup %5369 }
0x1887   :  { %v3475_v40 = vmul.f32 %v5370_v37, %v3459_v21  ;;  %v3822_v21 = vld [vmem:[%s5609_s27 + $0x38] sm:$0xff] }
0x1888   :  { %v5372_v43 = vpop.eup %5371 }
0x1889   :  { %v3474_v44 = vmul.f32 %v5372_v43, %v3458_v23  ;;  %v3483_v45 = vmul.f32 %v4668_v32, %v3475_v40 }
0x188b   :  { %v3482_v47 = vmul.f32 %v4668_v32, %v3474_v44  ;;  %v3491_v48 = vadd.f32 %v4669_v46, %v3483_v45 }
0x188d   :  { %v3490_v42 = vadd.f32 %v4669_v46, %v3482_v47 }
0x188f   :  { %5170 = vmatprep.mubr.msk.f32.mxu0 %vm267_vm3, %v3490_v42 }
0x1890   :  { %5171 = vmatmul.mubr.msk.f32.vlgmr.msra.gmra.mxu0 %vm267_vm3, %v3491_v48 }
0x1891   :  { %5174 = vmatpush3.msra.mxu0 %v3580_v30  ;;  %5181 = vmatprep.mubr.msk.f32.mxu0 %vm267_vm3, %v3490_v42 }
0x1892   :  { %5175 = vmatprep.subr.mxu0 %v3579_v41 }
0x1893   :  { %5176 = vmatpush3.msra.mxu0 %v3579_v41 }
0x1894   :  { %5177 = vmatprep.subr.mxu0 %v3578_v49 }
0x1895   :  { %5178 = vmatpush3.msra.mxu0 %v3578_v49 }
0x1896   :  { %5179 = vmatprep.subr.mxu0 %v3577_v50 }
0x1897   :  { %5180 = vmatpush3.msra.mxu0 %v3577_v50 }
0x1898   :  { %5182 = vmatmul.mubr.msk.f32.vlgmr.msra.gmra.mxu0 %vm267_vm3, %v3491_v48  ;;  %3875 = vmatprep.subr.mxu0 %v3837_v7 }
0x1899   :  { %3923 = vmatprep.mubr.f32.mxu0 %v5434_v36  ;;  %3876 = vmatpush1.msra.mxu0 %v3836_v9 }
0x189a   :  { %3877 = vmatprep.subr.mxu0 %v3834_v12 }
0x189b   :  { %3878 = vmatpush1.msra.mxu0 %v3833_v14 }
0x189c   :  { %3879 = vmatprep.subr.mxu0 %v3831_v59 }
0x189d   :  { %3880 = vmatpush1.msra.mxu0 %v3830_v16 }
0x189e   :  { %3881 = vmatprep.subr.mxu0 %v3828_v57 }
0x189f   :  { %3882 = vmatpush1.msra.mxu0 %v3827_v17 }
0x18a0   :  { %3883 = vmatprep.subr.mxu0 %v3825_v19  ;;  %v3838_v19 = vld [vmem:[%s5609_s27 + $0xb8] sm:$0xff] }
0x18a1   :  { %3884 = vmatpush1.msra.mxu0 %v3824_v20 }
0x18a2   :  { %3885 = vmatprep.subr.mxu0 %v3822_v21  ;;  %v3835_v21 = vld [vmem:[%s5609_s27 + $0xa0] sm:$0xff] }
0x1950   :  { %v5172_v52 = vpop.f32.mrf.mxu0 }
0x1951   :  { %v3664_v53 = vmul.f32 %v5172_v52, %v4674_v51 }
0x1952   :  { %v3568_v54 = vpop.f32.mrf.mxu0 }
0x1953   :  { %v3663_v55 = vmul.f32 %v4674_v51, %v3568_v54  ;;  %v3668_v56 = vsel %vm1740_vm8, %v3664_v53, 0.0 }
0x1954   :  { %3669 = vadd.xlane.f32.xlu0 %v3668_v56 }
0x1955   :  { %v3665_v58 = vsel %vm1740_vm8, %v3663_v55, 0.0 }
0x1956   :  { %3666 = vadd.xlane.f32.xlu1 %v3665_v58 }
0x1958   :  { %v5183_v58 = vpop.f32.mrf.mxu0 }
0x195a   :  { %v3647_v0 = vpop.f32.mrf.mxu0 }
0x1967   :  { %4054 = vperm.xlu1 %5281, %v5991_v13  }
0x196a   :  { %4058 = vperm.xlu0 %5282, %v5995_v15  }
0x196b   :  { %5283 = vset.pattern.permute.xlu1 %v5438_v18 }
0x196c   :  { %4074 = vperm.xlu1 %5283, %v5991_v13  }
0x1970   :  { %4078 = vperm.xlu1 %5283, %v5995_v15  }
0x1974   :  { %5284 = vset.pattern.permute.xlu1 %v5439_v22  ;;  %v3832_v22 = vld [vmem:[%s5609_s27 + $0x88] sm:$0xff] }
0x1975   :  { %4094 = vperm.xlu1 %5284, %v5991_v13  }
0x1979   :  { %4098 = vperm.xlu1 %5284, %v5995_v15  }
0x19dd   :  { %v3670_v23 = vpop.xlane.xlu0 %3669 }
0x19de   :  { %v3672_v24 = vmul.f32 0.125, %v3670_v23  ;;  %v3829_v23 = vld [vmem:[%s5609_s27 + $0x70] sm:$0xff] }
0x19df   :  { %v3667_v8 = vpop.xlane.xlu1 %3666 }
0x19e0   :  { %v3679_v26 = vrot.slane %v3672_v24, 4  ;;  %v3671_v6 = vmul.f32 0.125, %v3667_v8  ;;  %v3821_v8 = vld [vmem:[%s5609_s27 + $0x30] sm:$0xff] }
0x19e1   :  { %3886 = vmatpush1.msra.mxu0 %v3821_v8 }
0x19e2   :  { %v3680_v28 = vmax.f32 %v3672_v24, %v3679_v26  ;;  %v3673_v29 = vrot.slane %v3671_v6, 4  ;;  %v3823_v26 = vld [vmem:[%s5609_s27 + $0x40] sm:$0xff] }
0x19e4   :  { %v3681_v27 = vrot.slane %v3680_v28, 2  ;;  %v3674_v25 = vmax.f32 %v3671_v6, %v3673_v29  ;;  %v3820_v29 = vld [vmem:[%s5609_s27 + $0x28] sm:$0xff] }
0x19e6   :  { %v3682_v30 = vmax.f32 %v3680_v28, %v3681_v27  ;;  %v3675_v33 = vrot.slane %v3674_v25, 2  ;;  %v3818_v28 = vld [vmem:[%s5609_s27 + $0x18] sm:$0xff]  ;;  %v3816_v27 = vld [vmem:[%s5609_s27 + $0x8] sm:$0xff] }
0x19e8   :  { %v3683_v34 = vrot.slane %v3682_v30, 1  ;;  %v3676_v35 = vmax.f32 %v3674_v25, %v3675_v33  ;;  %v3815_v25 = vld [vmem:[%s5609_s27] sm:$0xff]  ;;  %v5440_v33 = vmov 4  }
0x19e9   :  { %5285 = vset.pattern.permute.xlu1 %v5440_v33 }
0x19ea   :  { %v3684_v38 = vmax.f32 %v3682_v30, %v3683_v34  ;;  %v3677_v39 = vrot.slane %v3676_v35, 1  ;;  %v3817_v30 = vld [vmem:[%s5609_s27 + $0x10] sm:$0xff]  ;;  %4114 = vperm.xlu1 %5285, %v5991_v13   ;;  %v5441_v34 = vmov 6  }
0x19eb   :  { %5287 = vset.pattern.permute.xlu0 %v5441_v34 }
0x19ec   :  { %v3686_v31 = vsub.f32 %v3672_v24, %v3684_v38  ;;  %v3678_v37 = vmax.f32 %v3676_v35, %v3677_v39  ;;  %v3826_v24 = vld [vmem:[%s5609_s27 + $0x58] sm:$0xff]  ;;  %4154 = vperm.xlu0 %5287, %v5991_v13   ;;  %v5442_v35 = vmov 7   ;;  %v5443_v38 = vmov 5  }
0x19ed   :  { %v5444_v39 = vmov 10  }
0x19ee   :  { %v3689_v32 = vmul.f32 1.442695, %v3686_v31  ;;  %v3685_v40 = vsub.f32 %v3671_v6, %v3678_v37  ;;  %v3819_v6 = vld [vmem:[%s5609_s27 + $0x20] sm:$0xff]  ;;  %4118 = vperm.xlu1 %5285, %v5995_v15   ;;  %v5446_v31 = vmov 13   ;;  %v5447_v37 = vmov 14   ;;  %s5457_s27 = smov 64  }
0x19ef   :  { %3887 = vmatprep.subr.mxu0 %v3819_v6 }
0x19f0   :  { %5373 = vpow2.f32 %v3689_v32  ;;  %v3687_v43 = vmul.f32 1.442695, %v3685_v40  ;;  %3888 = vmatpush1.msra.mxu0 %v3818_v28  ;;  %5290 = vset.pattern.permute.xlu0 %v5442_v35  ;;  %v5448_v32 = vmov 9   ;;  %v5449_v40 = vmov 8  }
0x19f1   :  { %3889 = vmatprep.subr.mxu0 %v3816_v27  ;;  %4178 = vperm.xlu0 %5290, %v5995_v15  }
0x19f2   :  { %5375 = vpow2.f32 %v3687_v43  ;;  %3890 = vmatpush1.msra.mxu0 %v3815_v25  ;;  %5286 = vset.pattern.permute.xlu1 %v5443_v38  ;;  %v5450_v43 = vmov 12  }
0x19f3   :  { %4134 = vperm.xlu1 %5286, %v5991_v13  }
0x19f5   :  { %5292 = vset.pattern.permute.xlu0 %v5444_v39 }
0x19f6   :  { %4259 = vperm.xlu0 %5292, %v5991_v13  }
0x19f7   :  { %4138 = vperm.xlu1 %5286, %v5995_v15  }
0x19fb   :  { %5288 = vset.pattern.permute.xlu1 %v5441_v34 }
0x19fc   :  { %4158 = vperm.xlu1 %5288, %v5995_v15  }
0x19fd   :  { %v5374_v44 = vpop.eup %5373 }
0x19fe   :  { %v3697_v45 = vrot.slane %v5374_v44, 4 }
0x19ff   :  { %v5376_v46 = vpop.eup %5375 }
0x1a00   :  { %v3698_v47 = vadd.f32 %v5374_v44, %v3697_v45  ;;  %v3691_v42 = vrot.slane %v5376_v46, 4  ;;  %5289 = vset.pattern.permute.xlu1 %v5442_v35  ;;  %v4675_v45 = vld [vmem:[%s5604_s20] ss:$0 sm:$0xff]  ;;  %s5456_s20 = smov 80  }
0x1a01   :  { %4174 = vperm.xlu1 %5289, %v5991_v13  }
0x1a02   :  { %v3692_v48 = vadd.f32 %v5376_v46, %v3691_v42  ;;  %v3699_v41 = vrot.slane %v3698_v47, 2 }
0x1a04   :  { %v3693_v49 = vrot.slane %v3692_v48, 2  ;;  %v3700_v50 = vadd.f32 %v3699_v41, %v3698_v47  ;;  %v4055_v41 = vpop.permute.xlu1 %4054 }
0x1a05   :  { %5291 = vset.pattern.permute.xlu1 %v5448_v32 }
0x1a06   :  { %v3694_v51 = vadd.f32 %v3693_v49, %v3692_v48  ;;  %v3701_v52 = vrot.slane %v3700_v50, 1  ;;  %4239 = vperm.xlu1 %5291, %v5991_v13  }
0x1a08   :  { %v3695_v53 = vrot.slane %v3694_v51, 1  ;;  %v3702_v54 = vadd.f32 %v3701_v52, %v3700_v50  ;;  %v4075_v49 = vpop.permute.xlu1 %4074 }
0x1a0a   :  { %v3696_v55 = vadd.f32 %v3695_v53, %v3694_v51  ;;  %5377 = vrcp.f32 %v3702_v54  ;;  %4243 = vperm.xlu1 %5291, %v5995_v15   ;;  %v3841_v54 = vlaneseq }
0x1a0c   :  { %5379 = vrcp.f32 %v3696_v55  ;;  %v4079_v50 = vpop.permute.xlu1 %4078  ;;  %v6070_v55 = vshrl.u32 %v3841_v54, 7 }
0x1a0e   :  { %5293 = vset.pattern.permute.xlu1 %v5444_v39 }
0x1a0f   :  { %4263 = vperm.xlu1 %5293, %v5995_v15  }
0x1a10   :  { %v4095_v51 = vpop.permute.xlu1 %4094 }
0x1a17   :  { %v5378_v56 = vpop.eup %5377 }
0x1a18   :  { %v3706_v60 = vmul.f32 %v5378_v56, %v5374_v44  ;;  %v5451_v44 = vmov 15  }
0x1a19   :  { %v5380_v61 = vpop.eup %5379 }
0x1a1a   :  { %v3704_v62 = vmul.f32 %v5380_v61, %v5376_v46  ;;  %v3708_v63 = vmul.f32 %v5183_v58, %v3706_v60  ;;  %v5452_v58 = vmov 1966171168   ;;  %v6073_v61 = vsub.s32 0, %v6070_v55 }
0x1a1b   :  { %v4008_v60 = vunpack.c.l.s4 %v5452_v58 }
0x1a1c   :  { %v3707_v1 = vmul.f32 %v3704_v62, %v3647_v0  ;;  %v3716_v2 = vsel %vm1740_vm8, %v3708_v63, 0.0  ;;  %v6076_v62 = vld [vmem:[%s5614_s4] sm:$0x7]  ;;  %s5458_s4 = smov 48  }
0x1a1d   :  { %v3717_v3 = vrot.slane %v3716_v2, 4  ;;  %v4009_v63 = vunpack.c.0.s8 %v4008_v60 }
0x1a1e   :  { %v3709_v5 = vsel %vm1740_vm8, %v3707_v1, 0.0  ;;  %v3844_v1 = vrot.slane %v6076_v62, %v6073_v61 }
0x1a1f   :  { %v3710_v7 = vrot.slane %v3709_v5, 4  ;;  %v3718_v9 = vadd.f32 %v3717_v3, %v3716_v2  ;;  %v6081_v2 = vsub.s32 %v4009_v63, %v6070_v55 }
0x1a21   :  { %v3711_v10 = vadd.f32 %v3710_v7, %v3709_v5  ;;  %v3719_v11 = vrot.slane %v3718_v9, 2  ;;  %v4059_v7 = vpop.permute.xlu0 %4058 }
0x1a23   :  { %v3712_v12 = vrot.slane %v3711_v10, 2  ;;  %v3720_v14 = vadd.f32 %v3719_v11, %v3718_v9 }
0x1a25   :  { %v3713_v59 = vadd.f32 %v3712_v12, %v3711_v10  ;;  %v3721_v16 = vrot.slane %v3720_v14, 1 }
0x1a27   :  { %v3714_v57 = vrot.slane %v3713_v59, 1  ;;  %v3722_v18 = vadd.f32 %v3721_v16, %v3720_v14 }
0x1a29   :  { %v3715_v17 = vadd.f32 %v3714_v57, %v3713_v59 }
0x1a2b   :  { %v3741_v20 = vsel %vm3740_vm13, %v3722_v18, %v3715_v17 }
0x1a2c   :  { %5201 = vmatmul.mubr.msk.f32.vlgmr.msra.gmra.mxu1 %vm1740_vm8, %v3741_v20 }
0x1a2d   :  { %5204 = vmatpush3.msra.mxu1 %v3838_v19  ;;  %5219 = vmatprep.mubr.msk.f32.mxu1 %vm5435_vm4, %v5434_v36  ;;  %v3847_v19 = vsub.s32 1, %v6070_v55 }
0x1a2e   :  { %5205 = vmatprep.subr.mxu1 %v5434_v36 }
0x1a2f   :  { %5206 = vmatpush3.msra.mxu1 %v3835_v21 }
0x1a30   :  { %5207 = vmatprep.subr.mxu1 %v5434_v36 }
0x1a31   :  { %5208 = vmatpush3.msra.mxu1 %v3832_v22 }
0x1a32   :  { %5209 = vmatprep.subr.mxu1 %v5434_v36 }
0x1a33   :  { %5210 = vmatpush3.msra.mxu1 %v3829_v23  ;;  %v3848_v23 = vrot.slane %v6076_v62, %v3847_v19 }
0x1a34   :  { %5211 = vmatprep.subr.mxu1 %v5434_v36 }
0x1a35   :  { %5212 = vmatpush3.msra.mxu1 %v3826_v24 }
0x1a36   :  { %5213 = vmatprep.subr.mxu1 %v5434_v36 }
0x1a37   :  { %5214 = vmatpush3.msra.mxu1 %v3823_v26 }
0x1a38   :  { %5215 = vmatprep.subr.mxu1 %v5434_v36 }
0x1a39   :  { %5216 = vmatpush3.msra.mxu1 %v3820_v29 }
0x1a3a   :  { %5217 = vmatprep.subr.mxu1 %v5434_v36  ;;  %v5445_v36 = vmov 11  }
0x1a3b   :  { %5218 = vmatpush3.msra.mxu1 %v3817_v30  ;;  %5295 = vset.pattern.permute.xlu0 %v5445_v36 }
0x1a3c   :  { %4283 = vperm.xlu0 %5295, %v5995_v15   ;;  %5294 = vset.pattern.permute.xlu1 %v5445_v36 }
0x1a3d   :  { %4279 = vperm.xlu1 %5294, %v5991_v13  }
0x1a40   :  { %5297 = vset.pattern.permute.xlu0 %v5446_v31 }
0x1a41   :  { %4319 = vperm.xlu0 %5297, %v5991_v13   ;;  %5296 = vset.pattern.permute.xlu1 %v5450_v43 }
0x1a42   :  { %4299 = vperm.xlu1 %5296, %v5991_v13  }
0x1a45   :  { %5300 = vset.pattern.permute.xlu0 %v5447_v37 }
0x1a46   :  { %4343 = vperm.xlu0 %5300, %v5995_v15   ;;  %4303 = vperm.xlu1 %5296, %v5995_v15  }
0x1a4a   :  { %5302 = vset.pattern.permute.xlu0 %v5433_v4  ;;  %5298 = vset.pattern.permute.xlu1 %v5446_v31 }
0x1a4b   :  { %4031 = vperm.xlu0 %5302, %v5991_v13   ;;  %4323 = vperm.xlu1 %5298, %v5995_v15  }
0x1a4f   :  { %5305 = vset.pattern.permute.xlu0 %v5449_v40  ;;  %5299 = vset.pattern.permute.xlu1 %v5447_v37 }
0x1a50   :  { %4221 = vperm.xlu0 %5305, %v5995_v15   ;;  %4339 = vperm.xlu1 %5299, %v5991_v13  }
0x1a54   :  { %5301 = vset.pattern.permute.xlu1 %v5451_v44 }
0x1a55   :  { %4359 = vperm.xlu1 %5301, %v5991_v13  }
0x1a59   :  { %4363 = vperm.xlu1 %5301, %v5995_v15  }
0x1a5d   :  { %5303 = vset.pattern.permute.xlu1 %v5433_v4 }
0x1a5e   :  { %4036 = vperm.xlu1 %5303, %v5995_v15   ;;  %v4099_v15 = vpop.permute.xlu1 %4098 }
0x1a62   :  { %5304 = vset.pattern.permute.xlu1 %v5449_v40 }
0x1a63   :  { %4217 = vperm.xlu1 %5304, %v5991_v13  }
0x1a65   :  { %v4115_v52 = vpop.permute.xlu1 %4114 }
0x1a67   :  { %5307 = vset.pattern.permute.xlu1 %v5433_v4  ;;  %v4155_v17 = vpop.permute.xlu0 %4154 }
0x1a69   :  { %v6067_v53 = vpop.permute.xlu1 %4118 }
0x1a6c   :  { %v4179_v43 = vpop.permute.xlu0 %4178 }
0x1a6e   :  { %v4135_v13 = vpop.permute.xlu1 %4134 }
0x1a72   :  { %v4139_v56 = vpop.permute.xlu1 %4138 }
0x1a77   :  { %v4159_v0 = vpop.permute.xlu1 %4158 }
0x1a7c   :  { %v4175_v10 = vpop.permute.xlu1 %4174 }
0x1a81   :  { %v4240_v57 = vpop.permute.xlu1 %4239 }
0x1a85   :  { %v4244_v26 = vpop.permute.xlu1 %4243 }
0x1a8a   :  { %v4264_v25 = vpop.permute.xlu1 %4263 }
0x1ab8   :  { %v4280_v36 = vpop.permute.xlu1 %4279 }
0x1abd   :  { %v4300_v44 = vpop.permute.xlu1 %4299 }
0x1aec   :  { %v3810_v46 = vpop.f32.mrf.mxu1 }
0x1aed   :  { %v3811_v47 = vadd.f32 %v4675_v45, %v3810_v46 }
0x1aee   :  { %v5202_v42 = vpop.f32.mrf.mxu1 }
0x1aef   :  { %v3814_v48 = vmax.f32 %v3811_v47, 0.0  ;;  %v4260_v42 = vpop.permute.xlu0 %4259 }
0x1af1   :  { %4677 = vmatmul.mubr.msk.f32.vlgmr.msra.gmra.mxu0 %vm1740_vm8, %v3814_v48  ;;  %5220 = vmatmul.mubr.msk.f32.vlgmr.msra.gmra.mxu1 %vm1740_vm8, %v3814_v48 }
0x1bb1   :  { %v3925_v3 = vpop.f32.mrf.mxu0  ;;  %v6083_v5 = vpop.f32.mrf.mxu1 }
0x1bb2   :  { %v3926_v9 = vadd.f32 %v3925_v3, %v3844_v1 }
0x1bb3   :  { %v5221_v11 = vpop.f32.mrf.mxu1  ;;  %v3927_v6 = vpop.f32.mrf.mxu0 }
0x1bb4   :  { %v4013_v12 = vrot.slane %v3926_v9, %v6081_v2  ;;  %v3928_v28 = vadd.f32 %v3927_v6, %v3848_v23 }
0x1bb6   :  { %v4014_v14 = vcombine.high %v4013_v12, %v4013_v12  ;;  %v4021_v59 = vrot.slane %v4013_v12, %v6081_v2  ;;  %v4200_v30 = vrot.slane %v3928_v28, %v6081_v2 }
0x1bb8   :  { %v6088_v16 = vrot.slane %v4021_v59, %v6073_v61  ;;  %v4028_v18 = vrot.slane %v4014_v14, %v6081_v2  ;;  %v4208_v35 = vrot.slane %v4200_v30, %v6081_v2  ;;  %v4201_v31 = vcombine.high %v4200_v30, %v4200_v30 }
0x1bba   :  { %v4161_v20 = vmul.f32 %v4155_v17, %v6088_v16  ;;  %v4061_v21 = vmul.f32 %v4055_v41, %v6088_v16  ;;  %v6097_v22 = vrot.slane %v4028_v18, %v6073_v61  ;;  %v4181_v24 = vmul.f32 %v4175_v10, %v6088_v16 }
0x1bbb   :  { %v4081_v8 = vmul.f32 %v4075_v49, %v6088_v16  ;;  %v4101_v29 = vmul.f32 %v4095_v51, %v6088_v16  ;;  %v4121_v33 = vmul.f32 %v4115_v52, %v6088_v16  ;;  %v4141_v38 = vmul.f32 %v4135_v13, %v6088_v16 }
0x1bbc   :  { %4165 = vrot.lane.b32.xlu0 %v4161_v20, %s5453_s30  ;;  %4065 = vrot.lane.b32.xlu1 %v4061_v21, %s5454_s6  ;;  %v4062_v27 = vmul.f32 %v4059_v7, %v6097_v22  ;;  %v4082_v34 = vmul.f32 %v4079_v50, %v6097_v22  ;;  %v4102_v39 = vmul.f32 %v4099_v15, %v6097_v22  ;;  %v4304_v50 = vpop.permute.xlu1 %4303  ;;  %v3851_v51 = vsub.s32 2, %v6070_v55 }
0x1bbd   :  { %v6121_v37 = vrot.slane %v4208_v35, %v6073_v61  ;;  %v4142_v32 = vmul.f32 %v4139_v56, %v6097_v22  ;;  %v4122_v40 = vmul.f32 %v6067_v53, %v6097_v22  ;;  %v4215_v45 = vrot.slane %v4201_v31, %v6081_v2  ;;  %v4284_v53 = vpop.permute.xlu0 %4283 }
0x1bbe   :  { %v4162_v46 = vmul.f32 %v4159_v0, %v6097_v22  ;;  %v4182_v41 = vmul.f32 %v4179_v43, %v6097_v22  ;;  %v3852_v56 = vrot.slane %v6076_v62, %v3851_v51  ;;  %v5459_v21 = vmov 32  }
0x1bbf   :  { %v4246_v47 = vmul.f32 %v4240_v57, %v6121_v37  ;;  %v6134_v48 = vrot.slane %v4215_v45, %v6073_v61  ;;  %v4266_v49 = vmul.f32 %v4260_v42, %v6121_v37  ;;  %v4286_v52 = vmul.f32 %v4280_v36, %v6121_v37  ;;  %5306 = vset.pattern.permute.xlu0 %v5459_v21 }
0x1bc0   :  { %4185 = vrot.lane.b32.xlu0 %v4181_v24, %s5436_s0  ;;  %4085 = vrot.lane.b32.xlu1 %v4081_v8, %s5455_s12  ;;  %v4324_v13 = vpop.permute.xlu1 %4323  ;;  %v4306_v60 = vmul.f32 %v4300_v44, %v6121_v37  ;;  %v6151_v0 = vadd.f32 %v6083_v5, %v3852_v56 }
0x1bc1   :  { %v4247_v15 = vmul.f32 %v4244_v26, %v6134_v48  ;;  %v4267_v58 = vmul.f32 %v4264_v25, %v6134_v48  ;;  %v4320_v63 = vpop.permute.xlu0 %4319  ;;  %v4287_v1 = vmul.f32 %v4284_v53, %v6134_v48  ;;  %v4307_v9 = vmul.f32 %v4304_v50, %v6134_v48 }
0x1bc2   :  { %v4326_v3 = vmul.f32 %v4320_v63, %v6121_v37  ;;  %v4385_v62 = vrot.slane %v6151_v0, %v6081_v2  ;;  %v4327_v12 = vmul.f32 %v4324_v13, %v6134_v48 }
0x1bc4   :  { %4105 = vrot.lane.b32.xlu1 %v4101_v29, %s5456_s20  ;;  %4067 = vrot.lane.b32.xlu0 %v4062_v27, %s5454_s6  ;;  %v4340_v7 = vpop.permute.xlu1 %4339  ;;  %v4393_v11 = vrot.slane %v4385_v62, %v6081_v2  ;;  %v4386_v57 = vcombine.high %v4385_v62, %v4385_v62 }
0x1bc5   :  { %v4346_v10 = vmul.f32 %v4340_v7, %v6121_v37  ;;  %v4344_v59 = vpop.permute.xlu0 %4343 }
0x1bc6   :  { %v4347_v17 = vmul.f32 %v4344_v59, %v6134_v48  ;;  %v6170_v18 = vrot.slane %v4393_v11, %v6073_v61  ;;  %v4400_v23 = vrot.slane %v4386_v57, %v6081_v2 }
0x1bc8   :  { %4125 = vrot.lane.b32.xlu1 %v4121_v33, %s5457_s27  ;;  %4087 = vrot.lane.b32.xlu0 %v4082_v34, %s5455_s12  ;;  %v4360_v5 = vpop.permute.xlu1 %4359  ;;  %v6179_v8 = vrot.slane %v4400_v23, %v6073_v61 }
0x1bc9   :  { %v4366_v14 = vmul.f32 %v4360_v5, %v6121_v37  ;;  %v4032_v6 = vpop.permute.xlu0 %4031 }
0x1bca   :  { %v4049_v2 = vmul.f32 %v6088_v16, %v4032_v6 }
0x1bcc   :  { %4145 = vrot.lane.b32.xlu1 %v4141_v38, %s5458_s4  ;;  %4107 = vrot.lane.b32.xlu0 %v4102_v39, %s5456_s20  ;;  %v4364_v20 = vpop.permute.xlu1 %4363 }
0x1bcd   :  { %v4367_v24 = vmul.f32 %v4364_v20, %v6134_v48  ;;  %v4222_v29 = vpop.permute.xlu0 %4221 }
0x1bd0   :  { %4147 = vrot.lane.b32.xlu1 %v4142_v32, %s5458_s4  ;;  %4127 = vrot.lane.b32.xlu0 %v4122_v40, %s5457_s27  ;;  %v4037_v26 = vpop.permute.xlu1 %4036 }
0x1bd1   :  { %v4050_v32 = vmul.f32 %v6097_v22, %v4037_v26 }
0x1bd4   :  { %4167 = vrot.lane.b32.xlu1 %v4162_v46, %s5453_s30  ;;  %4250 = vrot.lane.b32.xlu0 %v4246_v47, %s5454_s6  ;;  %v4218_v28 = vpop.permute.xlu1 %4217 }
0x1bd5   :  { %v4234_v16 = vmul.f32 %v6121_v37, %v4218_v28 }
0x1bd8   :  { %4187 = vrot.lane.b32.xlu1 %v4182_v41, %s5436_s0  ;;  %4270 = vrot.lane.b32.xlu0 %v4266_v49, %s5455_s12 }
0x1bdc   :  { %4252 = vrot.lane.b32.xlu1 %v4247_v15, %s5454_s6  ;;  %4290 = vrot.lane.b32.xlu0 %v4286_v52, %s5456_s20 }
0x1be0   :  { %4272 = vrot.lane.b32.xlu1 %v4267_v58, %s5455_s12  ;;  %4310 = vrot.lane.b32.xlu0 %v4306_v60, %s5457_s27 }
0x1be4   :  { %4292 = vrot.lane.b32.xlu1 %v4287_v1, %s5456_s20  ;;  %4330 = vrot.lane.b32.xlu0 %v4326_v3, %s5458_s4  ;;  %v4235_v1 = vmul.f32 %v6134_v48, %v4222_v29 }
0x1be8   :  { %4312 = vrot.lane.b32.xlu1 %v4307_v9, %s5457_s27  ;;  %4350 = vrot.lane.b32.xlu0 %v4346_v10, %s5453_s30 }
0x1bec   :  { %4332 = vrot.lane.b32.xlu1 %v4327_v12, %s5458_s4  ;;  %4370 = vrot.lane.b32.xlu0 %v4366_v14, %s5436_s0 }
0x1bf0   :  { %4352 = vrot.lane.b32.xlu1 %v4347_v17, %s5453_s30  ;;  %4415 = vrot.lane.b32.xlu0 %v6170_v18, %s5454_s6 }
0x1bf4   :  { %4372 = vrot.lane.b32.xlu1 %v4367_v24, %s5436_s0 }
0x1bf8   :  { %4417 = vrot.lane.b32.xlu1 %v6179_v8, %s5454_s6 }
0x1c2e   :  { %v4166_v27 = vpop.permute.xlu0 %4165  ;;  %v4066_v25 = vpop.permute.xlu1 %4065 }
0x1c2f   :  { %v4071_v38 = vadd.f32 %v4066_v25, %v4049_v2 }
0x1c32   :  { %v4186_v30 = vpop.permute.xlu0 %4185  ;;  %v4086_v33 = vpop.permute.xlu1 %4085 }
0x1c33   :  { %v4091_v39 = vadd.f32 %v4086_v33, %v4071_v38 }
0x1c36   :  { %v4106_v34 = vpop.permute.xlu1 %4105  ;;  %v4068_v35 = vpop.permute.xlu0 %4067 }
0x1c37   :  { %v4111_v40 = vadd.f32 %v4106_v34, %v4091_v39  ;;  %v4072_v43 = vadd.f32 %v4068_v35, %v4050_v32 }
0x1c3a   :  { %v4126_v36 = vpop.permute.xlu1 %4125  ;;  %v4088_v31 = vpop.permute.xlu0 %4087 }
0x1c3b   :  { %v4131_v44 = vadd.f32 %v4126_v36, %v4111_v40  ;;  %v4092_v47 = vadd.f32 %v4088_v31, %v4072_v43 }
0x1c3e   :  { %v4146_v45 = vpop.permute.xlu1 %4145  ;;  %v4108_v46 = vpop.permute.xlu0 %4107 }
0x1c3f   :  { %v4151_v42 = vadd.f32 %v4146_v45, %v4131_v44  ;;  %v4112_v49 = vadd.f32 %v4108_v46, %v4092_v47 }
0x1c41   :  { %v4171_v41 = vadd.f32 %v4166_v27, %v4151_v42 }
0x1c42   :  { %v4148_v50 = vpop.permute.xlu1 %4147  ;;  %v4128_v51 = vpop.permute.xlu0 %4127 }
0x1c43   :  { %v4132_v15 = vadd.f32 %v4128_v51, %v4112_v49  ;;  %v4191_v52 = vadd.f32 %v4186_v30, %v4171_v41 }
0x1c45   :  { %v4152_v53 = vadd.f32 %v4148_v50, %v4132_v15  ;;  %v4236_v13 = vadd.f32 %v4234_v16, %v4191_v52  ;;  %v4454_v50 = vand.u32 127, %v3841_v54 }
0x1c46   :  { %v4168_v56 = vpop.permute.xlu1 %4167  ;;  %v4251_v58 = vpop.permute.xlu0 %4250 }
0x1c47   :  { %v4172_v22 = vadd.f32 %v4168_v56, %v4152_v53  ;;  %v4256_v11 = vadd.f32 %v4251_v58, %v4236_v13  ;;  %v4457_v16 = vsub.s32 %v4454_v50, %v6070_v55 }
0x1c4a   :  { %v4188_v60 = vpop.permute.xlu1 %4187  ;;  %v4271_v63 = vpop.permute.xlu0 %4270 }
0x1c4b   :  { %v4192_v3 = vadd.f32 %v4188_v60, %v4172_v22  ;;  %v4276_v12 = vadd.f32 %v4271_v63, %v4256_v11 }
0x1c4d   :  { %v4237_v7 = vadd.f32 %v4235_v1, %v4192_v3 }
0x1c4e   :  { %v4253_v62 = vpop.permute.xlu1 %4252  ;;  %v4291_v9 = vpop.permute.xlu0 %4290 }
0x1c4f   :  { %v4296_v59 = vadd.f32 %v4291_v9, %v4276_v12  ;;  %v4257_v21 = vadd.f32 %v4253_v62, %v4237_v7 }
0x1c52   :  { %v4273_v10 = vpop.permute.xlu1 %4272  ;;  %v4311_v5 = vpop.permute.xlu0 %4310 }
0x1c53   :  { %v4316_v57 = vadd.f32 %v4311_v5, %v4296_v59  ;;  %v4277_v24 = vadd.f32 %v4273_v10, %v4257_v21 }
0x1c56   :  { %v4293_v37 = vpop.permute.xlu1 %4292  ;;  %v4331_v14 = vpop.permute.xlu0 %4330 }
0x1c57   :  { %v4336_v23 = vadd.f32 %v4331_v14, %v4316_v57  ;;  %v4297_v28 = vadd.f32 %v4293_v37, %v4277_v24 }
0x1c5a   :  { %v4313_v17 = vpop.permute.xlu1 %4312  ;;  %v4351_v20 = vpop.permute.xlu0 %4350 }
0x1c5b   :  { %v4356_v26 = vadd.f32 %v4351_v20, %v4336_v23  ;;  %v4317_v27 = vadd.f32 %v4313_v17, %v4297_v28 }
0x1c5e   :  { %v4333_v6 = vpop.permute.xlu1 %4332  ;;  %v4371_v48 = vpop.permute.xlu0 %4370 }
0x1c5f   :  { %v4376_v29 = vadd.f32 %v4371_v48, %v4356_v26  ;;  %v4337_v33 = vadd.f32 %v4333_v6, %v4317_v27 }
0x1c61   :  { %v4411_v25 = vadd.f32 %v6170_v18, %v4376_v29 }
0x1c62   :  { %v4353_v30 = vpop.permute.xlu1 %4352  ;;  %v4416_v34 = vpop.permute.xlu0 %4415 }
0x1c63   :  { %v4413_v2 = vmax.f32 %v4411_v25, 0.0  ;;  %v4357_v35 = vadd.f32 %v4353_v30, %v4337_v33 }
0x1c65   :  { %v4421_v38 = vmul.f32 %v4416_v34, %v4413_v2 }
0x1c66   :  { %v4373_v39 = vpop.permute.xlu1 %4372 }
0x1c67   :  { %v4377_v36 = vadd.f32 %v4373_v39, %v4357_v35  ;;  %v4424_v31 = vsel %vm4423_vm14, %v4421_v38, 0.0 }
0x1c68   :  { %4425 = vadd.xlane.f32.xlu0 %v4424_v31 }
0x1c69   :  { %v4412_v32 = vadd.f32 %v6179_v8, %v4377_v36 }
0x1c6a   :  { %v4418_v43 = vpop.permute.xlu1 %4417 }
0x1c6b   :  { %v4414_v40 = vmax.f32 %v4412_v32, 0.0 }
0x1c6d   :  { %v4422_v44 = vmul.f32 %v4418_v43, %v4414_v40 }
0x1c6f   :  { %v4427_v45 = vsel %vm4423_vm14, %v4422_v44, 0.0 }
0x1c70   :  { %4428 = vadd.xlane.f32.xlu1 %v4427_v45 }
0x1c7e   :  { %4431 = vperm.xlu0 %5306, %v6151_v0  }
0x1c82   :  { %5308 = vset.pattern.permute.xlu0 %v5433_v4 }
0x1cf1   :  { %v4426_v18 = vpop.xlane.xlu0 %4425 }
0x1cf9   :  { %v4432_v46 = vpop.permute.xlu0 %4431  ;;  %v4429_v49 = vpop.xlane.xlu1 %4428 }
0x1cfa   :  { %v4436_v47 = vrot.slane %v4432_v46, %v6073_v61  ;;  %v4440_v42 = vrot.slane %v4432_v46, %v3847_v19 }
0x1cfc   :  { %v4443_v41 = vadd.f32 %v4436_v47, %v4426_v18  ;;  %v4444_v8 = vadd.f32 %v4440_v42, %v4429_v49 }
0x1cfe   :  { %4448 = vperm.xlu1 %5307, %v4443_v41  }
0x1d02   :  { %4451 = vperm.xlu1 %5307, %v4444_v8  }
0x1d79   :  { %v4449_v51 = vpop.permute.xlu1 %4448 }
0x1d7a   :  { %v4458_v0 = vrot.slane %v4449_v51, %v4457_v16 }
0x1d7d   :  { %v4452_v4 = vpop.permute.xlu1 %4451 }
0x1d7e   :  { %v4462_v15 = vrot.slane %v4452_v4, %v4457_v16 }
0x1d80   :  { %v4463_v61 = vsel %vm3740_vm13, %v4462_v15, %v4458_v0 }
0x1d81   :  { %4466 = vst.msk [vmem:[#allocation2] sm:$0x3] %vm4465_vm15, %v4463_v61 }
0x1d82   :  { %5392 = shalt.err (!%p5389_p4)
}
0x1d83   :  { %4476 = dma.vmem_to_hbm [thread:$0]  %s4474_s22, 32, %s5619_s13, [#allocation3]  }
0x1d84   :  { %5401 = dma.done.wait [#allocation3], 32  }
0x1d85   :  { %5402 = vsyncadd [#allocation3], 4294967264 }
0x1d86   :  { %4480 = vsyncpa [#allocation3], 1 }

</bundles_post_ra>
